<compile_context>
chip_gen: v5e
topology: v5e:2x2
jax: 0.10.0
libtpu: 0.0.40
codegen_flags: <defaults>
</compile_context>

<pallas_src>
import functools

import jax
import jax.numpy as jnp
from jax.experimental import pallas as pl
from jax.experimental.pallas import tpu as pltpu

LANE = 128


def _ceil_to(v, m):
    return ((v + m - 1) // m) * m


# ---------------------------------------------------------------------------
# Fully fused encoder kernel (one image per grid step)
# ---------------------------------------------------------------------------
def _encoder_kernel(x_ref, w_ref, b_ref, o_ref, act_ref, tmp_ref, *, layer_cfg):
    # x_ref  : (1, H0+2, W0+2, C)  zero-padded (spatial + channel) input image
    # w_ref  : (L, 9, C, C)        3x3 weights, tap-major, BN scale folded in
    # b_ref  : (L, 1, C)           folded conv-bias + BN bias
    # o_ref  : (1, Hf, Wf, C)      final activation
    # act_ref: (Ha+2, Wa+2, C)     scratch: zero-padded intermediate activation
    # tmp_ref: (Rmax, C)           scratch: W-pool staging (flat row-major)
    # layer_cfg: static tuple of (H_in, W_in, pool_after) per layer
    C = o_ref.shape[-1]
    n_layers = len(layer_cfg)

    for l, (H, W, pool) in enumerate(layer_cfg):
        HW = H * W

        # ---- Conv2d(3x3, SAME): 9 register-accumulated GEMMs (K = C) ------
        acc = None
        t = 0
        for dy in range(3):
            for dx in range(3):
                if l == 0:
                    tap = x_ref[0, dy:dy + H, dx:dx + W, :]
                else:
                    tap = act_ref[dy:dy + H, dx:dx + W, :]
                tap = tap.reshape(HW, C)
                contrib = jnp.dot(tap, w_ref[l, t],
                                  preferred_element_type=jnp.float32)
                acc = contrib if acc is None else acc + contrib
                t += 1

        # ---- Epilogue: folded bias + ReLU (BN scale already in weights) ---
        y = jnp.maximum(acc + b_ref[l], 0.0)               # (HW, C) f32

        if l == n_layers - 1:
            o_ref[0] = y.reshape(H, W, C).astype(o_ref.dtype)
            continue

        if pool:
            # 2x2 / stride-2 max pool.
            # 1) H-pool in registers: rows 2h and 2h+1 are contiguous blocks
            #    of W sublanes (vreg-aligned selection when W % 8 == 0).
            yh = y.reshape(H // 2, 2, W, C)
            mh = jnp.maximum(yh[:, 0], yh[:, 1])           # (H//2, W, C)
            # 2) W-pool via small staging tile + stride-2 sublane loads.
            rows = (H // 2) * W
            tmp_ref[0:rows, :] = mh.reshape(rows, C)
            even_w = tmp_ref[pl.ds(0, rows // 2, stride=2)]
            odd_w = tmp_ref[pl.ds(1, rows // 2, stride=2)]
            nxt = jnp.maximum(even_w, odd_w)               # (H//2 * W//2, C)
            hn, wn = H // 2, W // 2
        else:
            nxt = y
            hn, wn = H, W

        # Write next layer's zero-padded input into the activation scratch.
        act_ref[...] = jnp.zeros_like(act_ref)
        act_ref[1:1 + hn, 1:1 + wn, :] = nxt.reshape(hn, wn, C)


# ---------------------------------------------------------------------------
# Wrapper: geometry, BN folding, channel padding, pallas_call
# ---------------------------------------------------------------------------
def _layer_geometry(h0, w0, n_layers):
    n_pools = n_layers - 2          # pool follows layers 0 .. n_layers-3
    cfg = []
    h, w = h0, w0
    for l in range(n_layers):
        pool = l < n_pools
        cfg.append((h, w, pool))
        if pool:
            assert h % 2 == 0 and w % 2 == 0, "MaxPool2d(2) needs even H, W"
            h, w = h // 2, w // 2
    return tuple(cfg), (h, w)


def _fold_pad_params(params, c_pad):
    """Fold BN scale into weights, zero-pad channels to c_pad, tap-major."""
    w_list, b_list = [], []
    for p in params:
        ci, co = p['w'].shape[2], p['w'].shape[3]
        w = p['w'] * p['scale'].reshape(1, 1, 1, co)        # fold BN scale
        w = jnp.pad(w, ((0, 0), (0, 0), (0, c_pad - ci), (0, c_pad - co)))
        w_list.append(w.reshape(9, c_pad, c_pad))
        b_list.append(jnp.pad(p['bias'], ((0, 0), (0, c_pad - co))))
    return jnp.stack(w_list), jnp.stack(b_list)             # (L,9,C,C),(L,1,C)


def encoder_forward(x_nchw, params):
    x = jnp.transpose(x_nchw, (0, 2, 3, 1))                 # NCHW -> NHWC
    n, h0, w0, cin = x.shape
    n_layers = len(params)

    c_all = [cin] + [p['w'].shape[3] for p in params]
    c_pad = _ceil_to(max(c_all), LANE)

    layer_cfg, (hf, wf) = _layer_geometry(h0, w0, n_layers)

    # Single pad of the input: +1 spatial halo, channels to a 128 multiple.
    xp = jnp.pad(x, ((0, 0), (1, 1), (1, 1), (0, c_pad - cin)))
    w_all, b_all = _fold_pad_params(params, c_pad)

    # Scratch geometry.
    inter = [(hh, ww) for (hh, ww, _) in layer_cfg[1:]] or [(1, 1)]
    ha = max(hh for hh, _ in inter)
    wa = max(ww for _, ww in inter)
    pool_rows = max([(hh // 2) * ww for hh, ww, pp in layer_cfg if pp],
                    default=8)

    kernel = functools.partial(_encoder_kernel, layer_cfg=layer_cfg)
    out = pl.pallas_call(
        kernel,
        out_shape=jax.ShapeDtypeStruct((n, hf, wf, c_pad), x.dtype),
        grid=(n,),
        in_specs=[
            pl.BlockSpec((1, h0 + 2, w0 + 2, c_pad), lambda i: (i, 0, 0, 0)),
            pl.BlockSpec((n_layers, 9, c_pad, c_pad), lambda i: (0, 0, 0, 0)),
            pl.BlockSpec((n_layers, 1, c_pad), lambda i: (0, 0, 0)),
        ],
        out_specs=pl.BlockSpec((1, hf, wf, c_pad), lambda i: (i, 0, 0, 0)),
        scratch_shapes=[
            pltpu.VMEM((ha + 2, wa + 2, c_pad), jnp.float32),
            pltpu.VMEM((pool_rows, c_pad), jnp.float32),
        ],
        compiler_params=pltpu.CompilerParams(
            dimension_semantics=("parallel",),
            vmem_limit_bytes=32 * 1024 * 1024),
    )(xp, w_all, b_all)

    latent = params[-1]['w'].shape[-1]
    out = out[..., :latent]                                 # drop channel pad
    return jnp.transpose(out, (0, 3, 1, 2))                 # NHWC -> NCHW


# ---------------------------------------------------------------------------
# Parameter init (deterministic; conv-bias + eval-mode BN folded to scale/bias)
# ---------------------------------------------------------------------------
def init_encoder_params(key, in_channels, channels_list, latent_channels):
    dims = [(in_channels, channels_list[0])]
    dims += list(zip(channels_list[:-1], channels_list[1:]))
    dims += [(channels_list[-1], latent_channels)]

    params = []
    for k, (cin, cout) in zip(jax.random.split(key, len(dims)), dims):
        ks = jax.random.split(k, 6)
        w = 0.1 * jax.random.normal(ks[0], (3, 3, cin, cout), jnp.float32)
        b = 0.05 * jax.random.normal(ks[1], (cout,), jnp.float32)
        gamma = 1.0 + 0.1 * jax.random.normal(ks[2], (cout,), jnp.float32)
        beta = 0.05 * jax.random.normal(ks[3], (cout,), jnp.float32)
        mean = 0.05 * jax.random.normal(ks[4], (cout,), jnp.float32)
        var = 0.5 + jnp.abs(jax.random.normal(ks[5], (cout,), jnp.float32))
        eps = 1e-5
        scale = gamma / jnp.sqrt(var + eps)
        bias = (b - mean) * scale + beta
        params.append(dict(w=w,
                           scale=scale.reshape(1, cout),
                           bias=bias.reshape(1, cout)))
    return params


# ---------------------------------------------------------------------------
# Pure-JAX reference
# ---------------------------------------------------------------------------
def _conv_bn_relu_ref(x, w, scale, bias):
    y = jax.lax.conv_general_dilated(
        x, w, window_strides=(1, 1), padding='SAME',
        dimension_numbers=('NHWC', 'HWIO', 'NHWC'))
    y = y * scale.reshape(1, 1, 1, -1) + bias.reshape(1, 1, 1, -1)
    return jnp.maximum(y, 0.0)


def _maxpool_ref(x):
    return jax.lax.reduce_window(x, -jnp.inf, jax.lax.max,
                                 (1, 2, 2, 1), (1, 2, 2, 1), 'VALID')


def encoder_forward_ref(x_nchw, params):
    x = jnp.transpose(x_nchw, (0, 2, 3, 1))
    x = _conv_bn_relu_ref(x, params[0]['w'], params[0]['scale'], params[0]['bias'])
    for p in params[1:-1]:
        x = _maxpool_ref(x)
        x = _conv_bn_relu_ref(x, p['w'], p['scale'], p['bias'])
    x = _conv_bn_relu_ref(x, params[-1]['w'], params[-1]['scale'], params[-1]['bias'])
    return jnp.transpose(x, (0, 3, 1, 2))


if __name__ == "__main__":
    key = jax.random.PRNGKey(0)
    k_param, k_x = jax.random.split(key)

    in_channels = 4
    channels_list = [8, 16]
    latent_channels = 8

    x = jax.random.normal(k_x, (2, in_channels, 16, 16), jnp.float32)   # NCHW
    params = init_encoder_params(k_param, in_channels, channels_list,
                                 latent_channels)

    out = encoder_forward(x, params)
    out = jax.block_until_ready(out)

    ref = encoder_forward_ref(x, params)
    assert out.shape == (2, latent_channels, 8, 8), out.shape
    assert jnp.allclose(out, ref, atol=1e-4, rtol=1e-4), \
        float(jnp.max(jnp.abs(out - ref)))

    print("KERNEL_OK")
</pallas_src>

<mosaic_0001>
module attributes {stable_mosaic.version = 11 : i64} {
  func.func @_encoder_kernel(%arg0: i32, %arg1: memref<1x18x18x128xf32, #tpu.memory_space<vmem>>, %arg2: memref<3x9x128x128xf32, #tpu.memory_space<vmem>>, %arg3: memref<3x1x128xf32, #tpu.memory_space<vmem>>, %arg4: memref<1x8x8x128xf32, #tpu.memory_space<vmem>>, %arg5: memref<10x10x128xf32, #tpu.memory_space<vmem>>, %arg6: memref<128x128xf32, #tpu.memory_space<vmem>>) attributes {dimension_semantics = [#tpu.dimension_semantics<parallel>], iteration_bounds = array<i64: 2>, scalar_prefetch = 0 : i64, scratch_operands = 2 : i64, tpu.core_type = #tpu.core_type<tc>, window_params = [{transform_indices = @transform_0, window_bounds = array<i64: 1, 18, 18, 128>}, {pipeline_mode = #tpu.pipeline_mode<synchronous>, transform_indices = @transform_1, window_bounds = array<i64: 3, 9, 128, 128>}, {pipeline_mode = #tpu.pipeline_mode<synchronous>, transform_indices = @transform_2, window_bounds = array<i64: 3, 1, 128>}, {transform_indices = @transform_3, window_bounds = array<i64: 1, 8, 8, 128>}]} {
    %c0 = arith.constant 0 : index
    %c0_0 = arith.constant 0 : index
    %c0_1 = arith.constant 0 : index
    %c0_2 = arith.constant 0 : index
    %0 = vector.load %arg1[%c0, %c0_0, %c0_1, %c0_2] : memref<1x18x18x128xf32, #tpu.memory_space<vmem>>, vector<1x16x16x128xf32>
    %1 = vector.shape_cast %0 : vector<1x16x16x128xf32> to vector<16x16x128xf32>
    %2 = vector.shape_cast %1 : vector<16x16x128xf32> to vector<256x128xf32>
    %c0_3 = arith.constant 0 : index
    %c0_4 = arith.constant 0 : index
    %c0_5 = arith.constant 0 : index
    %c0_6 = arith.constant 0 : index
    %3 = vector.load %arg2[%c0_3, %c0_4, %c0_5, %c0_6] : memref<3x9x128x128xf32, #tpu.memory_space<vmem>>, vector<1x1x128x128xf32>
    %4 = vector.shape_cast %3 : vector<1x1x128x128xf32> to vector<128x128xf32>
    %cst = arith.constant dense<0.000000e+00> : vector<256x128xf32>
    %5 = tpu.matmul %2, %4, %cst {dimension_numbers = #tpu.dot_dimension_numbers<[1], [0], [0], [1], [0, 0, 1, 1], [], []>} : vector<256x128xf32>, vector<128x128xf32>, vector<256x128xf32> -> vector<256x128xf32>
    %c0_7 = arith.constant 0 : index
    %c0_8 = arith.constant 0 : index
    %c1 = arith.constant 1 : index
    %c0_9 = arith.constant 0 : index
    %6 = vector.load %arg1[%c0_7, %c0_8, %c1, %c0_9] : memref<1x18x18x128xf32, #tpu.memory_space<vmem>>, vector<1x16x16x128xf32>
    %7 = vector.shape_cast %6 : vector<1x16x16x128xf32> to vector<16x16x128xf32>
    %8 = vector.shape_cast %7 : vector<16x16x128xf32> to vector<256x128xf32>
    %c0_10 = arith.constant 0 : index
    %c1_11 = arith.constant 1 : index
    %c0_12 = arith.constant 0 : index
    %c0_13 = arith.constant 0 : index
    %9 = vector.load %arg2[%c0_10, %c1_11, %c0_12, %c0_13] : memref<3x9x128x128xf32, #tpu.memory_space<vmem>>, vector<1x1x128x128xf32>
    %10 = vector.shape_cast %9 : vector<1x1x128x128xf32> to vector<128x128xf32>
    %cst_14 = arith.constant dense<0.000000e+00> : vector<256x128xf32>
    %11 = tpu.matmul %8, %10, %cst_14 {dimension_numbers = #tpu.dot_dimension_numbers<[1], [0], [0], [1], [0, 0, 1, 1], [], []>} : vector<256x128xf32>, vector<128x128xf32>, vector<256x128xf32> -> vector<256x128xf32>
    %12 = arith.addf %5, %11 : vector<256x128xf32>
    %c0_15 = arith.constant 0 : index
    %c0_16 = arith.constant 0 : index
    %c2 = arith.constant 2 : index
    %c0_17 = arith.constant 0 : index
    %13 = vector.load %arg1[%c0_15, %c0_16, %c2, %c0_17] : memref<1x18x18x128xf32, #tpu.memory_space<vmem>>, vector<1x16x16x128xf32>
    %14 = vector.shape_cast %13 : vector<1x16x16x128xf32> to vector<16x16x128xf32>
    %15 = vector.shape_cast %14 : vector<16x16x128xf32> to vector<256x128xf32>
    %c0_18 = arith.constant 0 : index
    %c2_19 = arith.constant 2 : index
    %c0_20 = arith.constant 0 : index
    %c0_21 = arith.constant 0 : index
    %16 = vector.load %arg2[%c0_18, %c2_19, %c0_20, %c0_21] : memref<3x9x128x128xf32, #tpu.memory_space<vmem>>, vector<1x1x128x128xf32>
    %17 = vector.shape_cast %16 : vector<1x1x128x128xf32> to vector<128x128xf32>
    %cst_22 = arith.constant dense<0.000000e+00> : vector<256x128xf32>
    %18 = tpu.matmul %15, %17, %cst_22 {dimension_numbers = #tpu.dot_dimension_numbers<[1], [0], [0], [1], [0, 0, 1, 1], [], []>} : vector<256x128xf32>, vector<128x128xf32>, vector<256x128xf32> -> vector<256x128xf32>
    %19 = arith.addf %12, %18 : vector<256x128xf32>
    %c0_23 = arith.constant 0 : index
    %c1_24 = arith.constant 1 : index
    %c0_25 = arith.constant 0 : index
    %c0_26 = arith.constant 0 : index
    %20 = vector.load %arg1[%c0_23, %c1_24, %c0_25, %c0_26] : memref<1x18x18x128xf32, #tpu.memory_space<vmem>>, vector<1x16x16x128xf32>
    %21 = vector.shape_cast %20 : vector<1x16x16x128xf32> to vector<16x16x128xf32>
    %22 = vector.shape_cast %21 : vector<16x16x128xf32> to vector<256x128xf32>
    %c0_27 = arith.constant 0 : index
    %c3 = arith.constant 3 : index
    %c0_28 = arith.constant 0 : index
    %c0_29 = arith.constant 0 : index
    %23 = vector.load %arg2[%c0_27, %c3, %c0_28, %c0_29] : memref<3x9x128x128xf32, #tpu.memory_space<vmem>>, vector<1x1x128x128xf32>
    %24 = vector.shape_cast %23 : vector<1x1x128x128xf32> to vector<128x128xf32>
    %cst_30 = arith.constant dense<0.000000e+00> : vector<256x128xf32>
    %25 = tpu.matmul %22, %24, %cst_30 {dimension_numbers = #tpu.dot_dimension_numbers<[1], [0], [0], [1], [0, 0, 1, 1], [], []>} : vector<256x128xf32>, vector<128x128xf32>, vector<256x128xf32> -> vector<256x128xf32>
    %26 = arith.addf %19, %25 : vector<256x128xf32>
    %c0_31 = arith.constant 0 : index
    %c1_32 = arith.constant 1 : index
    %c1_33 = arith.constant 1 : index
    %c0_34 = arith.constant 0 : index
    %27 = vector.load %arg1[%c0_31, %c1_32, %c1_33, %c0_34] : memref<1x18x18x128xf32, #tpu.memory_space<vmem>>, vector<1x16x16x128xf32>
    %28 = vector.shape_cast %27 : vector<1x16x16x128xf32> to vector<16x16x128xf32>
    %29 = vector.shape_cast %28 : vector<16x16x128xf32> to vector<256x128xf32>
    %c0_35 = arith.constant 0 : index
    %c4 = arith.constant 4 : index
    %c0_36 = arith.constant 0 : index
    %c0_37 = arith.constant 0 : index
    %30 = vector.load %arg2[%c0_35, %c4, %c0_36, %c0_37] : memref<3x9x128x128xf32, #tpu.memory_space<vmem>>, vector<1x1x128x128xf32>
    %31 = vector.shape_cast %30 : vector<1x1x128x128xf32> to vector<128x128xf32>
    %cst_38 = arith.constant dense<0.000000e+00> : vector<256x128xf32>
    %32 = tpu.matmul %29, %31, %cst_38 {dimension_numbers = #tpu.dot_dimension_numbers<[1], [0], [0], [1], [0, 0, 1, 1], [], []>} : vector<256x128xf32>, vector<128x128xf32>, vector<256x128xf32> -> vector<256x128xf32>
    %33 = arith.addf %26, %32 : vector<256x128xf32>
    %c0_39 = arith.constant 0 : index
    %c1_40 = arith.constant 1 : index
    %c2_41 = arith.constant 2 : index
    %c0_42 = arith.constant 0 : index
    %34 = vector.load %arg1[%c0_39, %c1_40, %c2_41, %c0_42] : memref<1x18x18x128xf32, #tpu.memory_space<vmem>>, vector<1x16x16x128xf32>
    %35 = vector.shape_cast %34 : vector<1x16x16x128xf32> to vector<16x16x128xf32>
    %36 = vector.shape_cast %35 : vector<16x16x128xf32> to vector<256x128xf32>
    %c0_43 = arith.constant 0 : index
    %c5 = arith.constant 5 : index
    %c0_44 = arith.constant 0 : index
    %c0_45 = arith.constant 0 : index
    %37 = vector.load %arg2[%c0_43, %c5, %c0_44, %c0_45] : memref<3x9x128x128xf32, #tpu.memory_space<vmem>>, vector<1x1x128x128xf32>
    %38 = vector.shape_cast %37 : vector<1x1x128x128xf32> to vector<128x128xf32>
    %cst_46 = arith.constant dense<0.000000e+00> : vector<256x128xf32>
    %39 = tpu.matmul %36, %38, %cst_46 {dimension_numbers = #tpu.dot_dimension_numbers<[1], [0], [0], [1], [0, 0, 1, 1], [], []>} : vector<256x128xf32>, vector<128x128xf32>, vector<256x128xf32> -> vector<256x128xf32>
    %40 = arith.addf %33, %39 : vector<256x128xf32>
    %c0_47 = arith.constant 0 : index
    %c2_48 = arith.constant 2 : index
    %c0_49 = arith.constant 0 : index
    %c0_50 = arith.constant 0 : index
    %41 = vector.load %arg1[%c0_47, %c2_48, %c0_49, %c0_50] : memref<1x18x18x128xf32, #tpu.memory_space<vmem>>, vector<1x16x16x128xf32>
    %42 = vector.shape_cast %41 : vector<1x16x16x128xf32> to vector<16x16x128xf32>
    %43 = vector.shape_cast %42 : vector<16x16x128xf32> to vector<256x128xf32>
    %c0_51 = arith.constant 0 : index
    %c6 = arith.constant 6 : index
    %c0_52 = arith.constant 0 : index
    %c0_53 = arith.constant 0 : index
    %44 = vector.load %arg2[%c0_51, %c6, %c0_52, %c0_53] : memref<3x9x128x128xf32, #tpu.memory_space<vmem>>, vector<1x1x128x128xf32>
    %45 = vector.shape_cast %44 : vector<1x1x128x128xf32> to vector<128x128xf32>
    %cst_54 = arith.constant dense<0.000000e+00> : vector<256x128xf32>
    %46 = tpu.matmul %43, %45, %cst_54 {dimension_numbers = #tpu.dot_dimension_numbers<[1], [0], [0], [1], [0, 0, 1, 1], [], []>} : vector<256x128xf32>, vector<128x128xf32>, vector<256x128xf32> -> vector<256x128xf32>
    %47 = arith.addf %40, %46 : vector<256x128xf32>
    %c0_55 = arith.constant 0 : index
    %c2_56 = arith.constant 2 : index
    %c1_57 = arith.constant 1 : index
    %c0_58 = arith.constant 0 : index
    %48 = vector.load %arg1[%c0_55, %c2_56, %c1_57, %c0_58] : memref<1x18x18x128xf32, #tpu.memory_space<vmem>>, vector<1x16x16x128xf32>
    %49 = vector.shape_cast %48 : vector<1x16x16x128xf32> to vector<16x16x128xf32>
    %50 = vector.shape_cast %49 : vector<16x16x128xf32> to vector<256x128xf32>
    %c0_59 = arith.constant 0 : index
    %c7 = arith.constant 7 : index
    %c0_60 = arith.constant 0 : index
    %c0_61 = arith.constant 0 : index
    %51 = vector.load %arg2[%c0_59, %c7, %c0_60, %c0_61] : memref<3x9x128x128xf32, #tpu.memory_space<vmem>>, vector<1x1x128x128xf32>
    %52 = vector.shape_cast %51 : vector<1x1x128x128xf32> to vector<128x128xf32>
    %cst_62 = arith.constant dense<0.000000e+00> : vector<256x128xf32>
    %53 = tpu.matmul %50, %52, %cst_62 {dimension_numbers = #tpu.dot_dimension_numbers<[1], [0], [0], [1], [0, 0, 1, 1], [], []>} : vector<256x128xf32>, vector<128x128xf32>, vector<256x128xf32> -> vector<256x128xf32>
    %54 = arith.addf %47, %53 : vector<256x128xf32>
    %c0_63 = arith.constant 0 : index
    %c2_64 = arith.constant 2 : index
    %c2_65 = arith.constant 2 : index
    %c0_66 = arith.constant 0 : index
    %55 = vector.load %arg1[%c0_63, %c2_64, %c2_65, %c0_66] : memref<1x18x18x128xf32, #tpu.memory_space<vmem>>, vector<1x16x16x128xf32>
    %56 = vector.shape_cast %55 : vector<1x16x16x128xf32> to vector<16x16x128xf32>
    %57 = vector.shape_cast %56 : vector<16x16x128xf32> to vector<256x128xf32>
    %c0_67 = arith.constant 0 : index
    %c8 = arith.constant 8 : index
    %c0_68 = arith.constant 0 : index
    %c0_69 = arith.constant 0 : index
    %58 = vector.load %arg2[%c0_67, %c8, %c0_68, %c0_69] : memref<3x9x128x128xf32, #tpu.memory_space<vmem>>, vector<1x1x128x128xf32>
    %59 = vector.shape_cast %58 : vector<1x1x128x128xf32> to vector<128x128xf32>
    %cst_70 = arith.constant dense<0.000000e+00> : vector<256x128xf32>
    %60 = tpu.matmul %57, %59, %cst_70 {dimension_numbers = #tpu.dot_dimension_numbers<[1], [0], [0], [1], [0, 0, 1, 1], [], []>} : vector<256x128xf32>, vector<128x128xf32>, vector<256x128xf32> -> vector<256x128xf32>
    %61 = arith.addf %54, %60 : vector<256x128xf32>
    %c0_71 = arith.constant 0 : index
    %c0_72 = arith.constant 0 : index
    %c0_73 = arith.constant 0 : index
    %62 = vector.load %arg3[%c0_71, %c0_72, %c0_73] : memref<3x1x128xf32, #tpu.memory_space<vmem>>, vector<1x1x128xf32>
    %63 = vector.shape_cast %62 : vector<1x1x128xf32> to vector<1x128xf32>
    %64 = vector.broadcast %63 : vector<1x128xf32> to vector<256x128xf32>
    %65 = arith.addf %61, %64 : vector<256x128xf32>
    %cst_74 = arith.constant 0.000000e+00 : f32
    %66 = vector.broadcast %cst_74 : f32 to vector<256x128xf32>
    %67 = arith.maximumf %65, %66 : vector<256x128xf32>
    %68 = vector.shape_cast %67 : vector<256x128xf32> to vector<8x2x16x128xf32>
    %69 = vector.extract_strided_slice %68 {offsets = [0, 0, 0, 0], sizes = [8, 1, 16, 128], strides = [1, 1, 1, 1]} : vector<8x2x16x128xf32> to vector<8x1x16x128xf32>
    %70 = vector.shape_cast %69 : vector<8x1x16x128xf32> to vector<8x16x128xf32>
    %71 = vector.extract_strided_slice %68 {offsets = [0, 1, 0, 0], sizes = [8, 1, 16, 128], strides = [1, 1, 1, 1]} : vector<8x2x16x128xf32> to vector<8x1x16x128xf32>
    %72 = vector.shape_cast %71 : vector<8x1x16x128xf32> to vector<8x16x128xf32>
    %73 = arith.maximumf %70, %72 : vector<8x16x128xf32>
    %74 = vector.shape_cast %73 : vector<8x16x128xf32> to vector<128x128xf32>
    %c0_75 = arith.constant 0 : index
    %c0_76 = arith.constant 0 : index
    %75 = vector.load %arg6[%c0_75, %c0_76] : memref<128x128xf32, #tpu.memory_space<vmem>>, vector<128x128xf32>
    tpu.vector_store %arg6[%c0_75, %c0_76], %74 {strides = array<i32>} : memref<128x128xf32, #tpu.memory_space<vmem>>, vector<128x128xf32>,
    %c0_77 = arith.constant 0 : index
    %c0_78 = arith.constant 0 : index
    %76 = tpu.strided_load %arg6[%c0_77, %c0_78] {strides = array<i32: 2, 1>} : memref<128x128xf32, #tpu.memory_space<vmem>>, vector<64x128xf32>
    %c1_79 = arith.constant 1 : index
    %c0_80 = arith.constant 0 : index
    %77 = tpu.strided_load %arg6[%c1_79, %c0_80] {strides = array<i32: 2, 1>} : memref<128x128xf32, #tpu.memory_space<vmem>>, vector<64x128xf32>
    %78 = arith.maximumf %76, %77 : vector<64x128xf32>
    %cst_81 = arith.constant 0.000000e+00 : f32
    %79 = vector.broadcast %cst_81 : f32 to vector<10x10x128xf32>
    %c0_82 = arith.constant 0 : index
    %c0_83 = arith.constant 0 : index
    %c0_84 = arith.constant 0 : index
    %80 = vector.load %arg5[%c0_82, %c0_83, %c0_84] : memref<10x10x128xf32, #tpu.memory_space<vmem>>, vector<10x10x128xf32>
    tpu.vector_store %arg5[%c0_82, %c0_83, %c0_84], %79 {strides = array<i32>} : memref<10x10x128xf32, #tpu.memory_space<vmem>>, vector<10x10x128xf32>,
    %81 = vector.shape_cast %78 : vector<64x128xf32> to vector<8x8x128xf32>
    %c1_85 = arith.constant 1 : index
    %c1_86 = arith.constant 1 : index
    %c0_87 = arith.constant 0 : index
    %82 = vector.load %arg5[%c1_85, %c1_86, %c0_87] : memref<10x10x128xf32, #tpu.memory_space<vmem>>, vector<8x8x128xf32>
    tpu.vector_store %arg5[%c1_85, %c1_86, %c0_87], %81 {strides = array<i32>} : memref<10x10x128xf32, #tpu.memory_space<vmem>>, vector<8x8x128xf32>,
    %c0_88 = arith.constant 0 : index
    %c0_89 = arith.constant 0 : index
    %c0_90 = arith.constant 0 : index
    %83 = vector.load %arg5[%c0_88, %c0_89, %c0_90] : memref<10x10x128xf32, #tpu.memory_space<vmem>>, vector<8x8x128xf32>
    %84 = vector.shape_cast %83 : vector<8x8x128xf32> to vector<64x128xf32>
    %c1_91 = arith.constant 1 : index
    %c0_92 = arith.constant 0 : index
    %c0_93 = arith.constant 0 : index
    %c0_94 = arith.constant 0 : index
    %85 = vector.load %arg2[%c1_91, %c0_92, %c0_93, %c0_94] : memref<3x9x128x128xf32, #tpu.memory_space<vmem>>, vector<1x1x128x128xf32>
    %86 = vector.shape_cast %85 : vector<1x1x128x128xf32> to vector<128x128xf32>
    %cst_95 = arith.constant dense<0.000000e+00> : vector<64x128xf32>
    %87 = tpu.matmul %84, %86, %cst_95 {dimension_numbers = #tpu.dot_dimension_numbers<[1], [0], [0], [1], [0, 0, 1, 1], [], []>} : vector<64x128xf32>, vector<128x128xf32>, vector<64x128xf32> -> vector<64x128xf32>
    %c0_96 = arith.constant 0 : index
    %c1_97 = arith.constant 1 : index
    %c0_98 = arith.constant 0 : index
    %88 = vector.load %arg5[%c0_96, %c1_97, %c0_98] : memref<10x10x128xf32, #tpu.memory_space<vmem>>, vector<8x8x128xf32>
    %89 = vector.shape_cast %88 : vector<8x8x128xf32> to vector<64x128xf32>
    %c1_99 = arith.constant 1 : index
    %c1_100 = arith.constant 1 : index
    %c0_101 = arith.constant 0 : index
    %c0_102 = arith.constant 0 : index
    %90 = vector.load %arg2[%c1_99, %c1_100, %c0_101, %c0_102] : memref<3x9x128x128xf32, #tpu.memory_space<vmem>>, vector<1x1x128x128xf32>
    %91 = vector.shape_cast %90 : vector<1x1x128x128xf32> to vector<128x128xf32>
    %cst_103 = arith.constant dense<0.000000e+00> : vector<64x128xf32>
    %92 = tpu.matmul %89, %91, %cst_103 {dimension_numbers = #tpu.dot_dimension_numbers<[1], [0], [0], [1], [0, 0, 1, 1], [], []>} : vector<64x128xf32>, vector<128x128xf32>, vector<64x128xf32> -> vector<64x128xf32>
    %93 = arith.addf %87, %92 : vector<64x128xf32>
    %c0_104 = arith.constant 0 : index
    %c2_105 = arith.constant 2 : index
    %c0_106 = arith.constant 0 : index
    %94 = vector.load %arg5[%c0_104, %c2_105, %c0_106] : memref<10x10x128xf32, #tpu.memory_space<vmem>>, vector<8x8x128xf32>
    %95 = vector.shape_cast %94 : vector<8x8x128xf32> to vector<64x128xf32>
    %c1_107 = arith.constant 1 : index
    %c2_108 = arith.constant 2 : index
    %c0_109 = arith.constant 0 : index
    %c0_110 = arith.constant 0 : index
    %96 = vector.load %arg2[%c1_107, %c2_108, %c0_109, %c0_110] : memref<3x9x128x128xf32, #tpu.memory_space<vmem>>, vector<1x1x128x128xf32>
    %97 = vector.shape_cast %96 : vector<1x1x128x128xf32> to vector<128x128xf32>
    %cst_111 = arith.constant dense<0.000000e+00> : vector<64x128xf32>
    %98 = tpu.matmul %95, %97, %cst_111 {dimension_numbers = #tpu.dot_dimension_numbers<[1], [0], [0], [1], [0, 0, 1, 1], [], []>} : vector<64x128xf32>, vector<128x128xf32>, vector<64x128xf32> -> vector<64x128xf32>
    %99 = arith.addf %93, %98 : vector<64x128xf32>
    %c1_112 = arith.constant 1 : index
    %c0_113 = arith.constant 0 : index
    %c0_114 = arith.constant 0 : index
    %100 = vector.load %arg5[%c1_112, %c0_113, %c0_114] : memref<10x10x128xf32, #tpu.memory_space<vmem>>, vector<8x8x128xf32>
    %101 = vector.shape_cast %100 : vector<8x8x128xf32> to vector<64x128xf32>
    %c1_115 = arith.constant 1 : index
    %c3_116 = arith.constant 3 : index
    %c0_117 = arith.constant 0 : index
    %c0_118 = arith.constant 0 : index
    %102 = vector.load %arg2[%c1_115, %c3_116, %c0_117, %c0_118] : memref<3x9x128x128xf32, #tpu.memory_space<vmem>>, vector<1x1x128x128xf32>
    %103 = vector.shape_cast %102 : vector<1x1x128x128xf32> to vector<128x128xf32>
    %cst_119 = arith.constant dense<0.000000e+00> : vector<64x128xf32>
    %104 = tpu.matmul %101, %103, %cst_119 {dimension_numbers = #tpu.dot_dimension_numbers<[1], [0], [0], [1], [0, 0, 1, 1], [], []>} : vector<64x128xf32>, vector<128x128xf32>, vector<64x128xf32> -> vector<64x128xf32>
    %105 = arith.addf %99, %104 : vector<64x128xf32>
    %c1_120 = arith.constant 1 : index
    %c1_121 = arith.constant 1 : index
    %c0_122 = arith.constant 0 : index
    %106 = vector.load %arg5[%c1_120, %c1_121, %c0_122] : memref<10x10x128xf32, #tpu.memory_space<vmem>>, vector<8x8x128xf32>
    %107 = vector.shape_cast %106 : vector<8x8x128xf32> to vector<64x128xf32>
    %c1_123 = arith.constant 1 : index
    %c4_124 = arith.constant 4 : index
    %c0_125 = arith.constant 0 : index
    %c0_126 = arith.constant 0 : index
    %108 = vector.load %arg2[%c1_123, %c4_124, %c0_125, %c0_126] : memref<3x9x128x128xf32, #tpu.memory_space<vmem>>, vector<1x1x128x128xf32>
    %109 = vector.shape_cast %108 : vector<1x1x128x128xf32> to vector<128x128xf32>
    %cst_127 = arith.constant dense<0.000000e+00> : vector<64x128xf32>
    %110 = tpu.matmul %107, %109, %cst_127 {dimension_numbers = #tpu.dot_dimension_numbers<[1], [0], [0], [1], [0, 0, 1, 1], [], []>} : vector<64x128xf32>, vector<128x128xf32>, vector<64x128xf32> -> vector<64x128xf32>
    %111 = arith.addf %105, %110 : vector<64x128xf32>
    %c1_128 = arith.constant 1 : index
    %c2_129 = arith.constant 2 : index
    %c0_130 = arith.constant 0 : index
    %112 = vector.load %arg5[%c1_128, %c2_129, %c0_130] : memref<10x10x128xf32, #tpu.memory_space<vmem>>, vector<8x8x128xf32>
    %113 = vector.shape_cast %112 : vector<8x8x128xf32> to vector<64x128xf32>
    %c1_131 = arith.constant 1 : index
    %c5_132 = arith.constant 5 : index
    %c0_133 = arith.constant 0 : index
    %c0_134 = arith.constant 0 : index
    %114 = vector.load %arg2[%c1_131, %c5_132, %c0_133, %c0_134] : memref<3x9x128x128xf32, #tpu.memory_space<vmem>>, vector<1x1x128x128xf32>
    %115 = vector.shape_cast %114 : vector<1x1x128x128xf32> to vector<128x128xf32>
    %cst_135 = arith.constant dense<0.000000e+00> : vector<64x128xf32>
    %116 = tpu.matmul %113, %115, %cst_135 {dimension_numbers = #tpu.dot_dimension_numbers<[1], [0], [0], [1], [0, 0, 1, 1], [], []>} : vector<64x128xf32>, vector<128x128xf32>, vector<64x128xf32> -> vector<64x128xf32>
    %117 = arith.addf %111, %116 : vector<64x128xf32>
    %c2_136 = arith.constant 2 : index
    %c0_137 = arith.constant 0 : index
    %c0_138 = arith.constant 0 : index
    %118 = vector.load %arg5[%c2_136, %c0_137, %c0_138] : memref<10x10x128xf32, #tpu.memory_space<vmem>>, vector<8x8x128xf32>
    %119 = vector.shape_cast %118 : vector<8x8x128xf32> to vector<64x128xf32>
    %c1_139 = arith.constant 1 : index
    %c6_140 = arith.constant 6 : index
    %c0_141 = arith.constant 0 : index
    %c0_142 = arith.constant 0 : index
    %120 = vector.load %arg2[%c1_139, %c6_140, %c0_141, %c0_142] : memref<3x9x128x128xf32, #tpu.memory_space<vmem>>, vector<1x1x128x128xf32>
    %121 = vector.shape_cast %120 : vector<1x1x128x128xf32> to vector<128x128xf32>
    %cst_143 = arith.constant dense<0.000000e+00> : vector<64x128xf32>
    %122 = tpu.matmul %119, %121, %cst_143 {dimension_numbers = #tpu.dot_dimension_numbers<[1], [0], [0], [1], [0, 0, 1, 1], [], []>} : vector<64x128xf32>, vector<128x128xf32>, vector<64x128xf32> -> vector<64x128xf32>
    %123 = arith.addf %117, %122 : vector<64x128xf32>
    %c2_144 = arith.constant 2 : index
    %c1_145 = arith.constant 1 : index
    %c0_146 = arith.constant 0 : index
    %124 = vector.load %arg5[%c2_144, %c1_145, %c0_146] : memref<10x10x128xf32, #tpu.memory_space<vmem>>, vector<8x8x128xf32>
    %125 = vector.shape_cast %124 : vector<8x8x128xf32> to vector<64x128xf32>
    %c1_147 = arith.constant 1 : index
    %c7_148 = arith.constant 7 : index
    %c0_149 = arith.constant 0 : index
    %c0_150 = arith.constant 0 : index
    %126 = vector.load %arg2[%c1_147, %c7_148, %c0_149, %c0_150] : memref<3x9x128x128xf32, #tpu.memory_space<vmem>>, vector<1x1x128x128xf32>
    %127 = vector.shape_cast %126 : vector<1x1x128x128xf32> to vector<128x128xf32>
    %cst_151 = arith.constant dense<0.000000e+00> : vector<64x128xf32>
    %128 = tpu.matmul %125, %127, %cst_151 {dimension_numbers = #tpu.dot_dimension_numbers<[1], [0], [0], [1], [0, 0, 1, 1], [], []>} : vector<64x128xf32>, vector<128x128xf32>, vector<64x128xf32> -> vector<64x128xf32>
    %129 = arith.addf %123, %128 : vector<64x128xf32>
    %c2_152 = arith.constant 2 : index
    %c2_153 = arith.constant 2 : index
    %c0_154 = arith.constant 0 : index
    %130 = vector.load %arg5[%c2_152, %c2_153, %c0_154] : memref<10x10x128xf32, #tpu.memory_space<vmem>>, vector<8x8x128xf32>
    %131 = vector.shape_cast %130 : vector<8x8x128xf32> to vector<64x128xf32>
    %c1_155 = arith.constant 1 : index
    %c8_156 = arith.constant 8 : index
    %c0_157 = arith.constant 0 : index
    %c0_158 = arith.constant 0 : index
    %132 = vector.load %arg2[%c1_155, %c8_156, %c0_157, %c0_158] : memref<3x9x128x128xf32, #tpu.memory_space<vmem>>, vector<1x1x128x128xf32>
    %133 = vector.shape_cast %132 : vector<1x1x128x128xf32> to vector<128x128xf32>
    %cst_159 = arith.constant dense<0.000000e+00> : vector<64x128xf32>
    %134 = tpu.matmul %131, %133, %cst_159 {dimension_numbers = #tpu.dot_dimension_numbers<[1], [0], [0], [1], [0, 0, 1, 1], [], []>} : vector<64x128xf32>, vector<128x128xf32>, vector<64x128xf32> -> vector<64x128xf32>
    %135 = arith.addf %129, %134 : vector<64x128xf32>
    %c1_160 = arith.constant 1 : index
    %c0_161 = arith.constant 0 : index
    %c0_162 = arith.constant 0 : index
    %136 = vector.load %arg3[%c1_160, %c0_161, %c0_162] : memref<3x1x128xf32, #tpu.memory_space<vmem>>, vector<1x1x128xf32>
    %137 = vector.shape_cast %136 : vector<1x1x128xf32> to vector<1x128xf32>
    %138 = vector.broadcast %137 : vector<1x128xf32> to vector<64x128xf32>
    %139 = arith.addf %135, %138 : vector<64x128xf32>
    %cst_163 = arith.constant 0.000000e+00 : f32
    %140 = vector.broadcast %cst_163 : f32 to vector<64x128xf32>
    %141 = arith.maximumf %139, %140 : vector<64x128xf32>
    %cst_164 = arith.constant 0.000000e+00 : f32
    %142 = vector.broadcast %cst_164 : f32 to vector<10x10x128xf32>
    %c0_165 = arith.constant 0 : index
    %c0_166 = arith.constant 0 : index
    %c0_167 = arith.constant 0 : index
    %143 = vector.load %arg5[%c0_165, %c0_166, %c0_167] : memref<10x10x128xf32, #tpu.memory_space<vmem>>, vector<10x10x128xf32>
    tpu.vector_store %arg5[%c0_165, %c0_166, %c0_167], %142 {strides = array<i32>} : memref<10x10x128xf32, #tpu.memory_space<vmem>>, vector<10x10x128xf32>,
    %144 = vector.shape_cast %141 : vector<64x128xf32> to vector<8x8x128xf32>
    %c1_168 = arith.constant 1 : index
    %c1_169 = arith.constant 1 : index
    %c0_170 = arith.constant 0 : index
    %145 = vector.load %arg5[%c1_168, %c1_169, %c0_170] : memref<10x10x128xf32, #tpu.memory_space<vmem>>, vector<8x8x128xf32>
    tpu.vector_store %arg5[%c1_168, %c1_169, %c0_170], %144 {strides = array<i32>} : memref<10x10x128xf32, #tpu.memory_space<vmem>>, vector<8x8x128xf32>,
    %c0_171 = arith.constant 0 : index
    %c0_172 = arith.constant 0 : index
    %c0_173 = arith.constant 0 : index
    %146 = vector.load %arg5[%c0_171, %c0_172, %c0_173] : memref<10x10x128xf32, #tpu.memory_space<vmem>>, vector<8x8x128xf32>
    %147 = vector.shape_cast %146 : vector<8x8x128xf32> to vector<64x128xf32>
    %c2_174 = arith.constant 2 : index
    %c0_175 = arith.constant 0 : index
    %c0_176 = arith.constant 0 : index
    %c0_177 = arith.constant 0 : index
    %148 = vector.load %arg2[%c2_174, %c0_175, %c0_176, %c0_177] : memref<3x9x128x128xf32, #tpu.memory_space<vmem>>, vector<1x1x128x128xf32>
    %149 = vector.shape_cast %148 : vector<1x1x128x128xf32> to vector<128x128xf32>
    %cst_178 = arith.constant dense<0.000000e+00> : vector<64x128xf32>
    %150 = tpu.matmul %147, %149, %cst_178 {dimension_numbers = #tpu.dot_dimension_numbers<[1], [0], [0], [1], [0, 0, 1, 1], [], []>} : vector<64x128xf32>, vector<128x128xf32>, vector<64x128xf32> -> vector<64x128xf32>
    %c0_179 = arith.constant 0 : index
    %c1_180 = arith.constant 1 : index
    %c0_181 = arith.constant 0 : index
    %151 = vector.load %arg5[%c0_179, %c1_180, %c0_181] : memref<10x10x128xf32, #tpu.memory_space<vmem>>, vector<8x8x128xf32>
    %152 = vector.shape_cast %151 : vector<8x8x128xf32> to vector<64x128xf32>
    %c2_182 = arith.constant 2 : index
    %c1_183 = arith.constant 1 : index
    %c0_184 = arith.constant 0 : index
    %c0_185 = arith.constant 0 : index
    %153 = vector.load %arg2[%c2_182, %c1_183, %c0_184, %c0_185] : memref<3x9x128x128xf32, #tpu.memory_space<vmem>>, vector<1x1x128x128xf32>
    %154 = vector.shape_cast %153 : vector<1x1x128x128xf32> to vector<128x128xf32>
    %cst_186 = arith.constant dense<0.000000e+00> : vector<64x128xf32>
    %155 = tpu.matmul %152, %154, %cst_186 {dimension_numbers = #tpu.dot_dimension_numbers<[1], [0], [0], [1], [0, 0, 1, 1], [], []>} : vector<64x128xf32>, vector<128x128xf32>, vector<64x128xf32> -> vector<64x128xf32>
    %156 = arith.addf %150, %155 : vector<64x128xf32>
    %c0_187 = arith.constant 0 : index
    %c2_188 = arith.constant 2 : index
    %c0_189 = arith.constant 0 : index
    %157 = vector.load %arg5[%c0_187, %c2_188, %c0_189] : memref<10x10x128xf32, #tpu.memory_space<vmem>>, vector<8x8x128xf32>
    %158 = vector.shape_cast %157 : vector<8x8x128xf32> to vector<64x128xf32>
    %c2_190 = arith.constant 2 : index
    %c2_191 = arith.constant 2 : index
    %c0_192 = arith.constant 0 : index
    %c0_193 = arith.constant 0 : index
    %159 = vector.load %arg2[%c2_190, %c2_191, %c0_192, %c0_193] : memref<3x9x128x128xf32, #tpu.memory_space<vmem>>, vector<1x1x128x128xf32>
    %160 = vector.shape_cast %159 : vector<1x1x128x128xf32> to vector<128x128xf32>
    %cst_194 = arith.constant dense<0.000000e+00> : vector<64x128xf32>
    %161 = tpu.matmul %158, %160, %cst_194 {dimension_numbers = #tpu.dot_dimension_numbers<[1], [0], [0], [1], [0, 0, 1, 1], [], []>} : vector<64x128xf32>, vector<128x128xf32>, vector<64x128xf32> -> vector<64x128xf32>
    %162 = arith.addf %156, %161 : vector<64x128xf32>
    %c1_195 = arith.constant 1 : index
    %c0_196 = arith.constant 0 : index
    %c0_197 = arith.constant 0 : index
    %163 = vector.load %arg5[%c1_195, %c0_196, %c0_197] : memref<10x10x128xf32, #tpu.memory_space<vmem>>, vector<8x8x128xf32>
    %164 = vector.shape_cast %163 : vector<8x8x128xf32> to vector<64x128xf32>
    %c2_198 = arith.constant 2 : index
    %c3_199 = arith.constant 3 : index
    %c0_200 = arith.constant 0 : index
    %c0_201 = arith.constant 0 : index
    %165 = vector.load %arg2[%c2_198, %c3_199, %c0_200, %c0_201] : memref<3x9x128x128xf32, #tpu.memory_space<vmem>>, vector<1x1x128x128xf32>
    %166 = vector.shape_cast %165 : vector<1x1x128x128xf32> to vector<128x128xf32>
    %cst_202 = arith.constant dense<0.000000e+00> : vector<64x128xf32>
    %167 = tpu.matmul %164, %166, %cst_202 {dimension_numbers = #tpu.dot_dimension_numbers<[1], [0], [0], [1], [0, 0, 1, 1], [], []>} : vector<64x128xf32>, vector<128x128xf32>, vector<64x128xf32> -> vector<64x128xf32>
    %168 = arith.addf %162, %167 : vector<64x128xf32>
    %c1_203 = arith.constant 1 : index
    %c1_204 = arith.constant 1 : index
    %c0_205 = arith.constant 0 : index
    %169 = vector.load %arg5[%c1_203, %c1_204, %c0_205] : memref<10x10x128xf32, #tpu.memory_space<vmem>>, vector<8x8x128xf32>
    %170 = vector.shape_cast %169 : vector<8x8x128xf32> to vector<64x128xf32>
    %c2_206 = arith.constant 2 : index
    %c4_207 = arith.constant 4 : index
    %c0_208 = arith.constant 0 : index
    %c0_209 = arith.constant 0 : index
    %171 = vector.load %arg2[%c2_206, %c4_207, %c0_208, %c0_209] : memref<3x9x128x128xf32, #tpu.memory_space<vmem>>, vector<1x1x128x128xf32>
    %172 = vector.shape_cast %171 : vector<1x1x128x128xf32> to vector<128x128xf32>
    %cst_210 = arith.constant dense<0.000000e+00> : vector<64x128xf32>
    %173 = tpu.matmul %170, %172, %cst_210 {dimension_numbers = #tpu.dot_dimension_numbers<[1], [0], [0], [1], [0, 0, 1, 1], [], []>} : vector<64x128xf32>, vector<128x128xf32>, vector<64x128xf32> -> vector<64x128xf32>
    %174 = arith.addf %168, %173 : vector<64x128xf32>
    %c1_211 = arith.constant 1 : index
    %c2_212 = arith.constant 2 : index
    %c0_213 = arith.constant 0 : index
    %175 = vector.load %arg5[%c1_211, %c2_212, %c0_213] : memref<10x10x128xf32, #tpu.memory_space<vmem>>, vector<8x8x128xf32>
    %176 = vector.shape_cast %175 : vector<8x8x128xf32> to vector<64x128xf32>
    %c2_214 = arith.constant 2 : index
    %c5_215 = arith.constant 5 : index
    %c0_216 = arith.constant 0 : index
    %c0_217 = arith.constant 0 : index
    %177 = vector.load %arg2[%c2_214, %c5_215, %c0_216, %c0_217] : memref<3x9x128x128xf32, #tpu.memory_space<vmem>>, vector<1x1x128x128xf32>
    %178 = vector.shape_cast %177 : vector<1x1x128x128xf32> to vector<128x128xf32>
    %cst_218 = arith.constant dense<0.000000e+00> : vector<64x128xf32>
    %179 = tpu.matmul %176, %178, %cst_218 {dimension_numbers = #tpu.dot_dimension_numbers<[1], [0], [0], [1], [0, 0, 1, 1], [], []>} : vector<64x128xf32>, vector<128x128xf32>, vector<64x128xf32> -> vector<64x128xf32>
    %180 = arith.addf %174, %179 : vector<64x128xf32>
    %c2_219 = arith.constant 2 : index
    %c0_220 = arith.constant 0 : index
    %c0_221 = arith.constant 0 : index
    %181 = vector.load %arg5[%c2_219, %c0_220, %c0_221] : memref<10x10x128xf32, #tpu.memory_space<vmem>>, vector<8x8x128xf32>
    %182 = vector.shape_cast %181 : vector<8x8x128xf32> to vector<64x128xf32>
    %c2_222 = arith.constant 2 : index
    %c6_223 = arith.constant 6 : index
    %c0_224 = arith.constant 0 : index
    %c0_225 = arith.constant 0 : index
    %183 = vector.load %arg2[%c2_222, %c6_223, %c0_224, %c0_225] : memref<3x9x128x128xf32, #tpu.memory_space<vmem>>, vector<1x1x128x128xf32>
    %184 = vector.shape_cast %183 : vector<1x1x128x128xf32> to vector<128x128xf32>
    %cst_226 = arith.constant dense<0.000000e+00> : vector<64x128xf32>
    %185 = tpu.matmul %182, %184, %cst_226 {dimension_numbers = #tpu.dot_dimension_numbers<[1], [0], [0], [1], [0, 0, 1, 1], [], []>} : vector<64x128xf32>, vector<128x128xf32>, vector<64x128xf32> -> vector<64x128xf32>
    %186 = arith.addf %180, %185 : vector<64x128xf32>
    %c2_227 = arith.constant 2 : index
    %c1_228 = arith.constant 1 : index
    %c0_229 = arith.constant 0 : index
    %187 = vector.load %arg5[%c2_227, %c1_228, %c0_229] : memref<10x10x128xf32, #tpu.memory_space<vmem>>, vector<8x8x128xf32>
    %188 = vector.shape_cast %187 : vector<8x8x128xf32> to vector<64x128xf32>
    %c2_230 = arith.constant 2 : index
    %c7_231 = arith.constant 7 : index
    %c0_232 = arith.constant 0 : index
    %c0_233 = arith.constant 0 : index
    %189 = vector.load %arg2[%c2_230, %c7_231, %c0_232, %c0_233] : memref<3x9x128x128xf32, #tpu.memory_space<vmem>>, vector<1x1x128x128xf32>
    %190 = vector.shape_cast %189 : vector<1x1x128x128xf32> to vector<128x128xf32>
    %cst_234 = arith.constant dense<0.000000e+00> : vector<64x128xf32>
    %191 = tpu.matmul %188, %190, %cst_234 {dimension_numbers = #tpu.dot_dimension_numbers<[1], [0], [0], [1], [0, 0, 1, 1], [], []>} : vector<64x128xf32>, vector<128x128xf32>, vector<64x128xf32> -> vector<64x128xf32>
    %192 = arith.addf %186, %191 : vector<64x128xf32>
    %c2_235 = arith.constant 2 : index
    %c2_236 = arith.constant 2 : index
    %c0_237 = arith.constant 0 : index
    %193 = vector.load %arg5[%c2_235, %c2_236, %c0_237] : memref<10x10x128xf32, #tpu.memory_space<vmem>>, vector<8x8x128xf32>
    %194 = vector.shape_cast %193 : vector<8x8x128xf32> to vector<64x128xf32>
    %c2_238 = arith.constant 2 : index
    %c8_239 = arith.constant 8 : index
    %c0_240 = arith.constant 0 : index
    %c0_241 = arith.constant 0 : index
    %195 = vector.load %arg2[%c2_238, %c8_239, %c0_240, %c0_241] : memref<3x9x128x128xf32, #tpu.memory_space<vmem>>, vector<1x1x128x128xf32>
    %196 = vector.shape_cast %195 : vector<1x1x128x128xf32> to vector<128x128xf32>
    %cst_242 = arith.constant dense<0.000000e+00> : vector<64x128xf32>
    %197 = tpu.matmul %194, %196, %cst_242 {dimension_numbers = #tpu.dot_dimension_numbers<[1], [0], [0], [1], [0, 0, 1, 1], [], []>} : vector<64x128xf32>, vector<128x128xf32>, vector<64x128xf32> -> vector<64x128xf32>
    %198 = arith.addf %192, %197 : vector<64x128xf32>
    %c2_243 = arith.constant 2 : index
    %c0_244 = arith.constant 0 : index
    %c0_245 = arith.constant 0 : index
    %199 = vector.load %arg3[%c2_243, %c0_244, %c0_245] : memref<3x1x128xf32, #tpu.memory_space<vmem>>, vector<1x1x128xf32>
    %200 = vector.shape_cast %199 : vector<1x1x128xf32> to vector<1x128xf32>
    %201 = vector.broadcast %200 : vector<1x128xf32> to vector<64x128xf32>
    %202 = arith.addf %198, %201 : vector<64x128xf32>
    %cst_246 = arith.constant 0.000000e+00 : f32
    %203 = vector.broadcast %cst_246 : f32 to vector<64x128xf32>
    %204 = arith.maximumf %202, %203 : vector<64x128xf32>
    %205 = vector.shape_cast %204 : vector<64x128xf32> to vector<8x8x128xf32>
    %c0_247 = arith.constant 0 : index
    %c0_248 = arith.constant 0 : index
    %c0_249 = arith.constant 0 : index
    %c0_250 = arith.constant 0 : index
    %206 = vector.load %arg4[%c0_247, %c0_248, %c0_249, %c0_250] : memref<1x8x8x128xf32, #tpu.memory_space<vmem>>, vector<1x8x8x128xf32>
    %207 = vector.shape_cast %206 : vector<1x8x8x128xf32> to vector<8x8x128xf32>
    %208 = vector.shape_cast %205 : vector<8x8x128xf32> to vector<1x8x8x128xf32>
    tpu.vector_store %arg4[%c0_247, %c0_248, %c0_249, %c0_250], %208 {strides = array<i32>} : memref<1x8x8x128xf32, #tpu.memory_space<vmem>>, vector<1x8x8x128xf32>,
    return
  }
  func.func @transform_0(%arg0: i32) -> (i32, i32, i32, i32) {
    %c0_i32 = arith.constant 0 : i32
    %c0_i32_0 = arith.constant 0 : i32
    %c0_i32_1 = arith.constant 0 : i32
    %c0_i32_2 = arith.constant 0 : i32
    return %arg0, %c0_i32, %c0_i32_0, %c0_i32_1 : i32, i32, i32, i32
  }
  func.func @transform_1(%arg0: i32) -> (i32, i32, i32, i32) {
    %c0_i32 = arith.constant 0 : i32
    %c0_i32_0 = arith.constant 0 : i32
    %c0_i32_1 = arith.constant 0 : i32
    %c0_i32_2 = arith.constant 0 : i32
    %c0_i32_3 = arith.constant 0 : i32
    return %c0_i32, %c0_i32_0, %c0_i32_1, %c0_i32_2 : i32, i32, i32, i32
  }
  func.func @transform_2(%arg0: i32) -> (i32, i32, i32) {
    %c0_i32 = arith.constant 0 : i32
    %c0_i32_0 = arith.constant 0 : i32
    %c0_i32_1 = arith.constant 0 : i32
    %c0_i32_2 = arith.constant 0 : i32
    return %c0_i32, %c0_i32_0, %c0_i32_1 : i32, i32, i32
  }
  func.func @transform_3(%arg0: i32) -> (i32, i32, i32, i32) {
    %c0_i32 = arith.constant 0 : i32
    %c0_i32_0 = arith.constant 0 : i32
    %c0_i32_1 = arith.constant 0 : i32
    %c0_i32_2 = arith.constant 0 : i32
    return %arg0, %c0_i32, %c0_i32_0, %c0_i32_1 : i32, i32, i32, i32
  }
}

</mosaic_0001>

<bundles_post_ra>
// kernel: tpu_custom_call.1
= control target key start
LH: loop header
LB: loop body
LE: loop exit
PB: predicated region body
PF: predicated region fallthrough
CT: control target
= control target key end

     0   :  { %8 = vsyncpa [#allocation5], 0  ;;  %s5607_s0 = inlined_call_operand.vmem [shape: f32[2,18,18,128], index: 0, kind: input, shape index: {}]   ;;  %s5608_s1 = inlined_call_operand.hbm [shape: f32[3,9,128,128], index: 1, kind: input, shape index: {}]   ;;  %s5609_s2 = inlined_call_operand.hbm [shape: f32[3,1,128], index: 2, kind: input, shape index: {}]   ;;  %s5610_s3 = inlined_call_operand.hbm [shape: f32[2,8,8,128], index: 3, kind: output, shape index: {}]  }
   0x1   :  { %9 = vsyncpa [#allocation8], 0 }
   0x2   :  { %10 = vsyncpa [#allocation6], 0 }
   0x3   :  { %12 = vsyncpa [#allocation6 + $0x1], 0  ;;  %s4008_s12 = smov 0   ;;  %s4010_s13 = smov 0  }
   0x4   :  { %s4012_s14 = smov 0   ;;  %s4014_s15 = smov 0  }
   0x5 LB: > { %s4029_s16 = sadd.s32 4294967295, %s3977_s15   ;;  %s3533_s17 = sadd.s32 4294967294, %s3977_s15   ;;  %s3977_s15 = sphi %s4014_s15, %s5700_s15   ;;  %s3973_s14 = sphi %s4012_s14, %s5699_s14   ;;  %s3969_s13 = sphi %s4010_s13, %s5698_s13   ;;  %s3965_s12 = sphi %s4008_s12, %s5697_s12  }
   0x6   : > { %s4033_s18 = sadd.s32 1, %s3977_s15   ;;  %s93_s19 = sadd.s32 1, %s3973_s14 }
   0x7   : > { %s90_s20 = ssub.s32 %s3977_s15, %s4033_s18  ;;  %p103_p0 = scmp.ne.s32.totalorder %s3973_s14, %s3969_s13 }
   0x8   : > { %p91_p1 = scmp.eq.s32.totalorder %s90_s20, 0  ;;  %p104_p2 = scmp.eq.s32.totalorder %s4029_s16, 1 }
   0x9   : > { %p109_p3 = scmp.ne.s32.totalorder %s3969_s13, %s3965_s12  ;;  %p110_p4 = scmp.eq.s32.totalorder %s3533_s17, 1 }
   0xa   : > { %s4044_s21 = scalar_select %p91_p1, %s3973_s14, %s93_s19  }
   0xb   : > { %p4046_p5 = por %p104_p2, %p103_p0  ;;  %p4050_p6 = por %p110_p4, %p109_p3 }
   0xc   : > { %p3534_p7 = scmp.ge.s32.totalorder %s3977_s15, 1  ;;  %p117_p8 = scmp.lt.s32.totalorder %s3977_s15, 3 }
   0xd   : > { %p3795_p9 = scmp.eq.s32.totalorder %s4029_s16, 0  ;;  %s128_s27 = sshll.u32 %s5608_s1, 4  ;;  %s129_s27 = int_to_ptr.hbm [resolvable:$true] %s128_s27 }
   0xe   : > { %p4057_p10 = pnand %p3534_p7, %p117_p8  ;;  %s3979_s28 = smov [#allocation4]  }
   0xf   : > { %s130_s29 = sshll.u32 %s3979_s28, 4  ;;  %s142_s5 = sshll.u32 %s5609_s2, 4  ;;  %s131_s29 = int_to_ptr.vmem [resolvable:$true] %s130_s29  ;;  %s143_s5 = int_to_ptr.hbm [resolvable:$true] %s142_s5 }
  0x10   : > { %p3784_p11 = pneg %p4057_p10  ;;  %s3980_s6 = smov 128  }
  0x11   : > { %s3981_s7 = smov 8   ;;  %s3982_s8 = smov [#allocation7]  }
  0x12   : > { %p3785_p12 = pnand %p3795_p9, %p3784_p11  ;;  %s144_s9 = sshll.u32 %s3982_s8, 4  ;;  %s145_s9 = int_to_ptr.vmem [resolvable:$true] %s144_s9 }
  0x13   : > { %s3983_s10 = smov 16   ;;  %s3984_s11 = smov 1  }
  0x14   : > { %3787 = dma.hbm_to_vmem [thread:$0]  (!%p3785_p12), %s129_s27, 55296, %s131_s29, [#allocation5], %s3980_s6, %s3980_s6, %s3981_s7  }
  0x15   : > { %3790 = dma.hbm_to_vmem [thread:$0]  (!%p3785_p12), %s143_s5, 48, %s145_s9, [#allocation8], %s3983_s10, %s3983_s10, %s3984_s11  }
  0x16   : > { %168 = sbr.rel (%p4057_p10) target bundleno = 1435 (0x59b), region = 32 }
  0x1b   : > { %3952 = dma.done.wait (%p3795_p9), [#allocation5], 55296  }
  0x1c   : > { %3954 = vsyncadd (%p3795_p9), [#allocation5], 4294912000 }
  0x1d   : > { %3956 = dma.done.wait (%p3795_p9), [#allocation8], 48  }
  0x1e   : > { %3958 = vsyncadd (%p3795_p9), [#allocation8], 4294967248  ;;  %v299_v0 = vld [vmem:[#allocation4 + $0xf8] sm:$0xff]  ;;  %v298_v2 = vld [vmem:[#allocation4 + $0xf0] sm:$0xff]  ;;  %p198_p13 = scmp.lt.s32.totalorder %s4029_s16, 1  ;;  %s195_s26 = sand.u32 1, %s3969_s13  }
  0x1f   : > { %v250_v1 = vld [vmem:[#allocation4 + $0x78] sm:$0xff]  ;;  %300 = vmatpush.msra.mxu0 %v299_v0  ;;  %3741 = vmatpush.msra.mxu2 %v299_v0  ;;  %v249_v3 = vld [vmem:[#allocation4 + $0x70] sm:$0xff]  ;;  %v297_v4 = vld [vmem:[#allocation4 + $0xe8] sm:$0xff]  ;;  %s3541_s27 = sshll.u32 %s195_s26, 6  ;;  %s3740_s29 = sshll.u32 %s4029_s16, 6 }
  0x20   : > { %413 = vmatpush.msra.mxu1 %v250_v1  ;;  %3757 = vmatpush.msra.mxu3 %v250_v1  ;;  %v248_v5 = vld [vmem:[#allocation4 + $0x68] sm:$0xff]  ;;  %v296_v6 = vld [vmem:[#allocation4 + $0xe0] sm:$0xff]  ;;  %v295_v8 = vld [vmem:[#allocation4 + $0xd8] sm:$0xff]  ;;  %s199_s17 = scalar_select %p198_p13, %s4029_s16, 1 }
  0x21   : > { %301 = vmatpush.msra.mxu0 %v298_v2  ;;  %3742 = vmatpush.msra.mxu2 %v298_v2  ;;  %v247_v7 = vld [vmem:[#allocation4 + $0x60] sm:$0xff]  ;;  %v246_v9 = vld [vmem:[#allocation4 + $0x58] sm:$0xff]  ;;  %v294_v10 = vld [vmem:[#allocation4 + $0xd0] sm:$0xff]  ;;  %s5535_s28 = scalar_lea.vmem [#allocation9], %s3541_s27  ;;  %s3445_s5 = scalar_lea.hbm %s5610_s3, %s3740_s29 }
  0x22   : > { %414 = vmatpush.msra.mxu1 %v249_v3  ;;  %3758 = vmatpush.msra.mxu3 %v249_v3  ;;  %v245_v11 = vld [vmem:[#allocation4 + $0x50] sm:$0xff]  ;;  %v293_v12 = vld [vmem:[#allocation4 + $0xc8] sm:$0xff]  ;;  %v292_v14 = vld [vmem:[#allocation4 + $0xc0] sm:$0xff]  ;;  %s3773_s19 = smul.u32 432, %s199_s17  ;;  %s3446_s6 = sshll.u32 %s5535_s28, 4  ;;  %s3447_s6 = int_to_ptr.vmem [resolvable:$true] %s3446_s6 }
  0x23   : > { %302 = vmatpush.msra.mxu0 %v297_v4  ;;  %3743 = vmatpush.msra.mxu2 %v297_v4  ;;  %v244_v13 = vld [vmem:[#allocation4 + $0x48] sm:$0xff]  ;;  %v243_v15 = vld [vmem:[#allocation4 + $0x40] sm:$0xff]  ;;  %v291_v16 = vld [vmem:[#allocation4 + $0xb8] sm:$0xff]  ;;  %s3448_s7 = sshll.u32 %s3445_s5, 4  ;;  %s3434_s16 = scalar_lea.sflag [#allocation6], %s195_s26  ;;  %s3449_s7 = int_to_ptr.hbm [resolvable:$true] %s3448_s7 }
  0x24   : > { %415 = vmatpush.msra.mxu1 %v248_v5  ;;  %3759 = vmatpush.msra.mxu3 %v248_v5  ;;  %v242_v17 = vld [vmem:[#allocation4 + $0x38] sm:$0xff]  ;;  %v290_v18 = vld [vmem:[#allocation4 + $0xb0] sm:$0xff]  ;;  %v289_v20 = vld [vmem:[#allocation4 + $0xa8] sm:$0xff]  ;;  %s4086_s25 = scalar_lea.vmem %s5607_s0, %s3773_s19  ;;  %s3921_s8 = sshra.s32 %s3449_s7, 4  ;;  %s3922_s8 = int_to_ptr.hbm [resolvable:$true] %s3921_s8 }
  0x25   : > { %303 = vmatpush.msra.mxu0 %v296_v6  ;;  %3744 = vmatpush.msra.mxu2 %v296_v6  ;;  %v241_v19 = vld [vmem:[#allocation4 + $0x30] sm:$0xff]  ;;  %v240_v21 = vld [vmem:[#allocation4 + $0x28] sm:$0xff]  ;;  %v288_v22 = vld [vmem:[#allocation4 + $0xa0] sm:$0xff]  ;;  %s3923_s9 = scalar_lea.hbm %s3922_s8, 64  ;;  %s3927_s17 = scalar_lea.hbm %s5610_s3, 128 }
  0x26   : > { %416 = vmatpush.msra.mxu1 %v247_v7  ;;  %3760 = vmatpush.msra.mxu3 %v247_v7  ;;  %v239_v23 = vld [vmem:[#allocation4 + $0x20] sm:$0xff]  ;;  %v287_v24 = vld [vmem:[#allocation4 + $0x98] sm:$0xff]  ;;  %v286_v26 = vld [vmem:[#allocation4 + $0x90] sm:$0xff]  ;;  %p3924_p0 = scmp.ne.s32.totalorder %s3922_s8, %s3923_s9  ;;  %p3928_p3 = scmp.lt.s32.totalorder %s3922_s8, %s5610_s3 }
  0x27   : > { %304 = vmatpush.msra.mxu0 %v295_v8  ;;  %3745 = vmatpush.msra.mxu2 %v295_v8  ;;  %v238_v25 = vld [vmem:[#allocation4 + $0x18] sm:$0xff]  ;;  %v237_v27 = vld [vmem:[#allocation4 + $0x10] sm:$0xff]  ;;  %v285_v28 = vld [vmem:[#allocation4 + $0x88] sm:$0xff]  ;;  %p3929_p4 = scmp.lt.s32.totalorder %s3927_s17, %s3923_s9 }
  0x28   : > { %417 = vmatpush.msra.mxu1 %v246_v9  ;;  %3761 = vmatpush.msra.mxu3 %v246_v9  ;;  %v236_v29 = vld [vmem:[#allocation4 + $0x8] sm:$0xff]  ;;  %v284_v30 = vld [vmem:[#allocation4 + $0x80] sm:$0xff]  ;;  %v279_v33 = vld [vmem:[%s4086_s25 + $0x151] sm:$0xff]  ;;  %p3925_p1 = pnand %p3924_p0, %p4046_p5 }
  0x29   : > { %305 = vmatpush.msra.mxu0 %v294_v10  ;;  %3746 = vmatpush.msra.mxu2 %v294_v10  ;;  %v235_v31 = vld [vmem:[#allocation4] sm:$0xff]  ;;  %v963_v35 = vld [vmem:[#allocation4 + $0x278] sm:$0xff]  ;;  %v4092_v37 = vld [vmem:[%s4086_s25 + $0x150] sm:$0xff]  ;;  %p3930_p7 = por %p3929_p4, %p3928_p3 }
  0x2a   : > { %418 = vmatpush.msra.mxu1 %v245_v11  ;;  %3762 = vmatpush.msra.mxu3 %v245_v11  ;;  %v251_v32 = vld [vmem:[%s4086_s25 + $0x1] sm:$0xff]  ;;  %v574_v36 = vld [vmem:[#allocation4 + $0x178] sm:$0xff]  ;;  %v962_v39 = vld [vmem:[#allocation4 + $0x270] sm:$0xff]  ;;  %p3926_p2 = pneg %p3925_p1 }
  0x2b   : > { %306 = vmatpush.msra.mxu0 %v293_v12  ;;  %3747 = vmatpush.msra.mxu2 %v293_v12  ;;  %v203_v34 = vld [vmem:[%s4086_s25] sm:$0xff]  ;;  %v769_v38 = vld [vmem:[#allocation4 + $0x1f8] sm:$0xff]  ;;  %v573_v40 = vld [vmem:[#allocation4 + $0x170] sm:$0xff] }
  0x2c   : > { %419 = vmatpush.msra.mxu1 %v244_v13  ;;  %3763 = vmatpush.msra.mxu3 %v244_v13  ;;  %v768_v41 = vld [vmem:[#allocation4 + $0x1f0] sm:$0xff]  ;;  %v961_v42 = vld [vmem:[#allocation4 + $0x268] sm:$0xff]  ;;  %v571_v46 = vld [vmem:[#allocation4 + $0x160] sm:$0xff]  ;;  %p3931_p8 = pnand %p3930_p7, %p3926_p2 }
  0x2d   : > { %307 = vmatpush.msra.mxu0 %v292_v14  ;;  %3748 = vmatpush.msra.mxu2 %v292_v14  ;;  %v572_v43 = vld [vmem:[#allocation4 + $0x168] sm:$0xff]  ;;  %v280_v48 = vld [vmem:[%s4086_s25 + $0x159] sm:$0xff]  ;;  %v569_v53 = vld [vmem:[#allocation4 + $0x150] sm:$0xff] }
  0x2e   : > { %420 = vmatpush.msra.mxu1 %v243_v15  ;;  %3764 = vmatpush.msra.mxu3 %v243_v15  ;;  %v767_v44 = vld [vmem:[#allocation4 + $0x1e8] sm:$0xff]  ;;  %v766_v49 = vld [vmem:[#allocation4 + $0x1e0] sm:$0xff]  ;;  %v570_v50 = vld [vmem:[#allocation4 + $0x158] sm:$0xff] }
  0x2f   : > { %308 = vmatpush.msra.mxu0 %v291_v16  ;;  %3749 = vmatpush.msra.mxu2 %v291_v16  ;;  %v252_v45 = vld [vmem:[%s4086_s25 + $0x9] sm:$0xff]  ;;  %v4099_v51 = vld [vmem:[%s4086_s25 + $0x158] sm:$0xff]  ;;  %v960_v55 = vld [vmem:[#allocation4 + $0x260] sm:$0xff] }
  0x30   : > { %421 = vmatpush.msra.mxu1 %v242_v17  ;;  %3765 = vmatpush.msra.mxu3 %v242_v17  ;;  %v204_v47 = vld [vmem:[%s4086_s25 + $0x8] sm:$0xff]  ;;  %v765_v52 = vld [vmem:[#allocation4 + $0x1d8] sm:$0xff]  ;;  %v764_v54 = vld [vmem:[#allocation4 + $0x1d0] sm:$0xff] }
  0x31   : > { %309 = vmatpush.msra.mxu0 %v290_v18  ;;  %3750 = vmatpush.msra.mxu2 %v290_v18  ;;  %v568_v56 = vld [vmem:[#allocation4 + $0x148] sm:$0xff]  ;;  %v4103_v58 = vld [vmem:[%s4086_s25 + $0x19] sm:$0xff]  ;;  %v565_v2 = vld [vmem:[#allocation4 + $0x130] sm:$0xff] }
  0x32   : > { %422 = vmatpush.msra.mxu1 %v241_v19  ;;  %3766 = vmatpush.msra.mxu3 %v241_v19  ;;  %v763_v57 = vld [vmem:[#allocation4 + $0x1c8] sm:$0xff]  ;;  %v567_v59 = vld [vmem:[#allocation4 + $0x140] sm:$0xff]  ;;  %v205_v60 = vld [vmem:[%s4086_s25 + $0x18] sm:$0xff] }
  0x33   : > { %310 = vmatpush.msra.mxu0 %v289_v20  ;;  %3751 = vmatpush.msra.mxu2 %v289_v20  ;;  %v281_v61 = vld [vmem:[%s4086_s25 + $0x169] sm:$0xff]  ;;  %v762_v62 = vld [vmem:[#allocation4 + $0x1c0] sm:$0xff]  ;;  %v566_v63 = vld [vmem:[#allocation4 + $0x138] sm:$0xff] }
  0x34   : > { %423 = vmatpush.msra.mxu1 %v240_v21  ;;  %3767 = vmatpush.msra.mxu3 %v240_v21  ;;  %v4109_v0 = vld [vmem:[%s4086_s25 + $0x168] sm:$0xff]  ;;  %v761_v1 = vld [vmem:[#allocation4 + $0x1b8] sm:$0xff]  ;;  %v760_v3 = vld [vmem:[#allocation4 + $0x1b0] sm:$0xff] }
  0x35   : > { %311 = vmatpush.msra.mxu0 %v288_v22  ;;  %3752 = vmatpush.msra.mxu2 %v288_v22  ;;  %v564_v4 = vld [vmem:[#allocation4 + $0x128] sm:$0xff]  ;;  %v563_v7 = vld [vmem:[#allocation4 + $0x120] sm:$0xff]  ;;  %v282_v9 = vld [vmem:[%s4086_s25 + $0x171] sm:$0xff] }
  0x36   : > { %424 = vmatpush.msra.mxu1 %v239_v23  ;;  %3768 = vmatpush.msra.mxu3 %v239_v23  ;;  %v759_v5 = vld [vmem:[#allocation4 + $0x1a8] sm:$0xff]  ;;  %v206_v8 = vld [vmem:[%s4086_s25 + $0x20] sm:$0xff]  ;;  %v562_v11 = vld [vmem:[#allocation4 + $0x118] sm:$0xff] }
  0x37   : > { %312 = vmatpush.msra.mxu0 %v287_v24  ;;  %3753 = vmatpush.msra.mxu2 %v287_v24  ;;  %v4113_v6 = vld [vmem:[%s4086_s25 + $0x21] sm:$0xff]  ;;  %v4119_v12 = vld [vmem:[%s4086_s25 + $0x170] sm:$0xff]  ;;  %v757_v13 = vld [vmem:[#allocation4 + $0x198] sm:$0xff] }
  0x38   : > { %425 = vmatpush.msra.mxu1 %v238_v25  ;;  %3769 = vmatpush.msra.mxu3 %v238_v25  ;;  %v758_v10 = vld [vmem:[#allocation4 + $0x1a0] sm:$0xff]  ;;  %v561_v14 = vld [vmem:[#allocation4 + $0x110] sm:$0xff]  ;;  %v959_v15 = vld [vmem:[#allocation4 + $0x258] sm:$0xff] }
  0x39   : > { %313 = vmatpush.msra.mxu0 %v286_v26  ;;  %3754 = vmatpush.msra.mxu2 %v286_v26  ;;  %v756_v16 = vld [vmem:[#allocation4 + $0x190] sm:$0xff]  ;;  %v560_v17 = vld [vmem:[#allocation4 + $0x108] sm:$0xff]  ;;  %v559_v20 = vld [vmem:[#allocation4 + $0x100] sm:$0xff] }
  0x3a   : > { %426 = vmatpush.msra.mxu1 %v237_v27  ;;  %3770 = vmatpush.msra.mxu3 %v237_v27  ;;  %v755_v18 = vld [vmem:[#allocation4 + $0x188] sm:$0xff]  ;;  %v4123_v19 = vld [vmem:[%s4086_s25 + $0x31] sm:$0xff]  ;;  %v754_v23 = vld [vmem:[#allocation4 + $0x180] sm:$0xff] }
  0x3b   : > { %314 = vmatpush.msra.mxu0 %v285_v28  ;;  %3755 = vmatpush.msra.mxu2 %v285_v28  ;;  %v207_v21 = vld [vmem:[%s4086_s25 + $0x30] sm:$0xff]  ;;  %v526_v22 = vld [vmem:[%s4086_s25 + $0x2] sm:$0xff]  ;;  %v4129_v25 = vld [vmem:[%s4086_s25 + $0x39] sm:$0xff] }
  0x3c   : > { %427 = vmatpush.msra.mxu1 %v236_v29  ;;  %3771 = vmatpush.msra.mxu3 %v236_v29  ;;  %v958_v24 = vld [vmem:[#allocation4 + $0x250] sm:$0xff]  ;;  %v208_v26 = vld [vmem:[%s4086_s25 + $0x38] sm:$0xff]  ;;  %v209_v29 = vld [vmem:[%s4086_s25 + $0x48] sm:$0xff] }
  0x3d   : > { %315 = vmatpush.msra.mxu0 %v284_v30  ;;  %3756 = vmatpush.msra.mxu2 %v284_v30  ;;  %v527_v27 = vld [vmem:[%s4086_s25 + $0xa] sm:$0xff]  ;;  %v4139_v30 = vld [vmem:[%s4086_s25 + $0x1a] sm:$0xff] }
  0x3e   : > { %428 = vmatpush.msra.mxu1 %v235_v31  ;;  %316 = vmatmul.f32.vlgmr.msra.gmra.mxu0 %v251_v32  ;;  %v4135_v28 = vld [vmem:[%s4086_s25 + $0x49] sm:$0xff]  ;;  %v4144_v32 = vld [vmem:[%s4086_s25 + $0x51] sm:$0xff] }
  0x3f   : > { %400 = vmatmul.f32.vlgmr.msra.gmra.mxu2 %v279_v33  ;;  %429 = vmatmul.f32.vlgmr.msra.gmra.mxu1 %v203_v34  ;;  %v210_v33 = vld [vmem:[%s4086_s25 + $0x50] sm:$0xff]  ;;  %v4148_v34 = vld [vmem:[%s4086_s25 + $0x22] sm:$0xff] }
  0x40   : > { %964 = vmatpush.msrb.mxu0 %v963_v35  ;;  %3772 = vmatpush.msra.mxu3 %v235_v31  ;;  %v957_v31 = vld [vmem:[#allocation4 + $0x248] sm:$0xff] }
  0x41   : > { %575 = vmatpush.msrb.mxu2 %v574_v36  ;;  %513 = vmatmul.f32.vlgmr.msra.gmra.mxu3 %v4092_v37  ;;  %v4153_v35 = vld [vmem:[%s4086_s25 + $0x61] sm:$0xff] }
  0x42   : > { %770 = vmatpush.msrb.mxu3 %v769_v38  ;;  %965 = vmatpush.msrb.mxu0 %v962_v39  ;;  %v211_v36 = vld [vmem:[%s4086_s25 + $0x60] sm:$0xff]  ;;  %v4157_v38 = vld [vmem:[%s4086_s25 + $0x32] sm:$0xff] }
  0x43   : > { %576 = vmatpush.msrb.mxu2 %v573_v40  ;;  %v956_v39 = vld [vmem:[#allocation4 + $0x240] sm:$0xff]  ;;  %v4162_v40 = vld [vmem:[%s4086_s25 + $0x69] sm:$0xff] }
  0x44   : > { %771 = vmatpush.msrb.mxu3 %v768_v41  ;;  %966 = vmatpush.msrb.mxu0 %v961_v42  ;;  %v212_v41 = vld [vmem:[%s4086_s25 + $0x68] sm:$0xff]  ;;  %v4166_v42 = vld [vmem:[%s4086_s25 + $0x3a] sm:$0xff] }
  0x45   : > { %577 = vmatpush.msrb.mxu2 %v572_v43  ;;  %v4171_v43 = vld [vmem:[%s4086_s25 + $0x79] sm:$0xff] }
  0x46   : > { %772 = vmatpush.msrb.mxu3 %v767_v44  ;;  %319 = vmatmul.f32.gmra.mxu0 %v252_v45  ;;  %v213_v44 = vld [vmem:[%s4086_s25 + $0x78] sm:$0xff]  ;;  %v4175_v45 = vld [vmem:[%s4086_s25 + $0x4a] sm:$0xff] }
  0x47   : > { %578 = vmatpush.msrb.mxu2 %v571_v46  ;;  %432 = vmatmul.f32.gmra.mxu1 %v204_v47  ;;  %v955_v46 = vld [vmem:[#allocation4 + $0x238] sm:$0xff]  ;;  %v4180_v47 = vld [vmem:[%s4086_s25 + $0x81] sm:$0xff] }
  0x48   : > { %403 = vmatmul.f32.gmra.mxu2 %v280_v48  ;;  %773 = vmatpush.msrb.mxu3 %v766_v49  ;;  %v214_v48 = vld [vmem:[%s4086_s25 + $0x80] sm:$0xff]  ;;  %v4184_v49 = vld [vmem:[%s4086_s25 + $0x52] sm:$0xff] }
  0x49   : > { %579 = vmatpush.msrb.mxu2 %v570_v50  ;;  %516 = vmatmul.f32.gmra.mxu3 %v4099_v51  ;;  %v4189_v50 = vld [vmem:[%s4086_s25 + $0x91] sm:$0xff] }
  0x4a   : > { %774 = vmatpush.msrb.mxu3 %v765_v52  ;;  %967 = vmatpush.msrb.mxu0 %v960_v55  ;;  %v215_v52 = vld [vmem:[%s4086_s25 + $0x90] sm:$0xff]  ;;  %v4198_v55 = vld [vmem:[%s4086_s25 + $0x99] sm:$0xff] }
  0x4b   : > { %580 = vmatpush.msrb.mxu2 %v569_v53  ;;  %v4193_v53 = vld [vmem:[%s4086_s25 + $0x62] sm:$0xff] }
  0x4c   : > { %775 = vmatpush.msrb.mxu3 %v764_v54  ;;  %968 = vmatpush.msrb.mxu0 %v959_v15  ;;  %v954_v54 = vld [vmem:[#allocation4 + $0x230] sm:$0xff] }
  0x4d   : > { %581 = vmatpush.msrb.mxu2 %v568_v56  ;;  %v216_v56 = vld [vmem:[%s4086_s25 + $0x98] sm:$0xff] }
  0x4e   : > { %776 = vmatpush.msrb.mxu3 %v763_v57  ;;  %322 = vmatmul.f32.gmra.mxu0 %v4103_v58  ;;  %v4202_v57 = vld [vmem:[%s4086_s25 + $0x6a] sm:$0xff] }
  0x4f   : > { %582 = vmatpush.msrb.mxu2 %v567_v59  ;;  %435 = vmatmul.f32.gmra.mxu1 %v205_v60  ;;  %v4207_v59 = vld [vmem:[%s4086_s25 + $0xa9] sm:$0xff] }
  0x50   : > { %406 = vmatmul.f32.gmra.mxu2 %v281_v61  ;;  %777 = vmatpush.msrb.mxu3 %v762_v62  ;;  %v217_v61 = vld [vmem:[%s4086_s25 + $0xa8] sm:$0xff]  ;;  %v4211_v62 = vld [vmem:[%s4086_s25 + $0x7a] sm:$0xff] }
  0x51   : > { %583 = vmatpush.msrb.mxu2 %v566_v63  ;;  %519 = vmatmul.f32.gmra.mxu3 %v4109_v0  ;;  %v4216_v63 = vld [vmem:[%s4086_s25 + $0xb1] sm:$0xff] }
  0x52   : > { %778 = vmatpush.msrb.mxu3 %v761_v1  ;;  %969 = vmatpush.msrb.mxu0 %v958_v24  ;;  %v218_v1 = vld [vmem:[%s4086_s25 + $0xb0] sm:$0xff] }
  0x53   : > { %584 = vmatpush.msrb.mxu2 %v565_v2  ;;  %v4220_v2 = vld [vmem:[%s4086_s25 + $0x82] sm:$0xff] }
  0x54   : > { %779 = vmatpush.msrb.mxu3 %v760_v3  ;;  %970 = vmatpush.msrb.mxu0 %v957_v31  ;;  %v952_v3 = vld [vmem:[#allocation4 + $0x220] sm:$0xff]  ;;  %v4259_v31 = vld [vmem:[%s4086_s25 + $0xaa] sm:$0xff] }
  0x55   : > { %585 = vmatpush.msrb.mxu2 %v564_v4 }
  0x56   : > { %780 = vmatpush.msrb.mxu3 %v759_v5  ;;  %325 = vmatmul.f32.gmra.mxu0 %v4113_v6  ;;  %v4225_v5 = vld [vmem:[%s4086_s25 + $0xc1] sm:$0xff] }
  0x57   : > { %586 = vmatpush.msrb.mxu2 %v563_v7  ;;  %438 = vmatmul.f32.gmra.mxu1 %v206_v8 }
  0x58   : > { %409 = vmatmul.f32.gmra.mxu2 %v282_v9  ;;  %781 = vmatpush.msrb.mxu3 %v758_v10  ;;  %v4229_v9 = vld [vmem:[%s4086_s25 + $0x92] sm:$0xff] }
  0x59   : > { %587 = vmatpush.msrb.mxu2 %v562_v11  ;;  %522 = vmatmul.f32.gmra.mxu3 %v4119_v12 }
  0x5a   : > { %782 = vmatpush.msrb.mxu3 %v757_v13  ;;  %971 = vmatpush.msrb.mxu0 %v956_v39  ;;  %v4236_v13 = vld [vmem:[%s4086_s25 + $0xc9] sm:$0xff]  ;;  %v270_v39 = vld [vmem:[%s4086_s25 + $0xe1] sm:$0xff] }
  0x5b   : > { %588 = vmatpush.msrb.mxu2 %v561_v14 }
  0x5c   : > { %783 = vmatpush.msrb.mxu3 %v756_v16  ;;  %972 = vmatpush.msrb.mxu0 %v955_v46  ;;  %v220_v16 = vld [vmem:[%s4086_s25 + $0xc8] sm:$0xff]  ;;  %v222_v46 = vld [vmem:[%s4086_s25 + $0xe0] sm:$0xff] }
  0x5d   : > { %589 = vmatpush.msrb.mxu2 %v560_v17 }
  0x5e   : > { %784 = vmatpush.msrb.mxu3 %v755_v18  ;;  %328 = vmatmul.f32.gmra.mxu0 %v4123_v19  ;;  %v4244_v18 = vld [vmem:[%s4086_s25 + $0x9a] sm:$0xff] }
  0x5f   : > { %590 = vmatpush.msrb.mxu2 %v559_v20  ;;  %441 = vmatmul.f32.gmra.mxu1 %v207_v21  ;;  %v951_v20 = vld [vmem:[#allocation4 + $0x218] sm:$0xff] }
  0x60   : > { %591 = vmatmul.f32.vlgmr.msrb.gmra.mxu2 %v526_v22  ;;  %785 = vmatpush.msrb.mxu3 %v754_v23  ;;  %v4251_v23 = vld [vmem:[%s4086_s25 + $0xd9] sm:$0xff] }
  0x61   : > { %786 = vmatmul.f32.vlgmr.msrb.gmra.mxu3 %v205_v60  ;;  %973 = vmatpush.msrb.mxu0 %v954_v54  ;;  %v953_v60 = vld [vmem:[#allocation4 + $0x228] sm:$0xff]  ;;  %v950_v54 = vld [vmem:[#allocation4 + $0x210] sm:$0xff] }
  0x63   : > { %974 = vmatpush.msrb.mxu0 %v953_v60 }
  0x65   : > { %975 = vmatpush.msrb.mxu0 %v952_v3 }
  0x66   : > { %331 = vmatmul.f32.gmra.mxu0 %v4129_v25 }
  0x67   : > { %444 = vmatmul.f32.gmra.mxu1 %v208_v26  ;;  %976 = vmatpush.msrb.mxu0 %v951_v20  ;;  %v1157_v20 = vld [vmem:[#allocation4 + $0x2f8] sm:$0xff] }
  0x68   : > { %594 = vmatmul.f32.gmra.mxu2 %v527_v27  ;;  %v221_v27 = vld [vmem:[%s4086_s25 + $0xd8] sm:$0xff]  ;;  %1158 = vmatpush.msrb.mxu1 %v1157_v20 }
  0x69   : > { %789 = vmatmul.f32.gmra.mxu3 %v206_v8  ;;  %v219_v8 = vld [vmem:[%s4086_s25 + $0xc0] sm:$0xff]  ;;  %977 = vmatpush.msrb.mxu0 %v950_v54  ;;  %v1153_v20 = vld [vmem:[#allocation4 + $0x2d8] sm:$0xff] }
  0x6e   : > { %334 = vmatmul.f32.gmra.mxu0 %v4135_v28 }
  0x6f   : > { %447 = vmatmul.f32.gmra.mxu1 %v209_v29 }
  0x70   : > { %597 = vmatmul.f32.gmra.mxu2 %v4139_v30 }
  0x71   : > { %792 = vmatmul.f32.gmra.mxu3 %v207_v21 }
  0x76   : > { %337 = vmatmul.f32.gmra.mxu0 %v4144_v32 }
  0x77   : > { %450 = vmatmul.f32.gmra.mxu1 %v210_v33 }
  0x78   : > { %600 = vmatmul.f32.gmra.mxu2 %v4148_v34 }
  0x79   : > { %795 = vmatmul.f32.gmra.mxu3 %v208_v26 }
  0x7e   : > { %340 = vmatmul.f32.gmra.mxu0 %v4153_v35 }
  0x7f   : > { %453 = vmatmul.f32.gmra.mxu1 %v211_v36 }
  0x80   : > { %603 = vmatmul.f32.gmra.mxu2 %v4157_v38 }
  0x81   : > { %798 = vmatmul.f32.gmra.mxu3 %v209_v29 }
  0x86   : > { %343 = vmatmul.f32.gmra.mxu0 %v4162_v40 }
  0x87   : > { %456 = vmatmul.f32.gmra.mxu1 %v212_v41 }
  0x88   : > { %606 = vmatmul.f32.gmra.mxu2 %v4166_v42 }
  0x89   : > { %801 = vmatmul.f32.gmra.mxu3 %v210_v33 }
  0x8e   : > { %346 = vmatmul.f32.gmra.mxu0 %v4171_v43 }
  0x8f   : > { %459 = vmatmul.f32.gmra.mxu1 %v213_v44 }
  0x90   : > { %609 = vmatmul.f32.gmra.mxu2 %v4175_v45 }
  0x91   : > { %804 = vmatmul.f32.gmra.mxu3 %v211_v36 }
  0x96   : > { %349 = vmatmul.f32.gmra.mxu0 %v4180_v47 }
  0x97   : > { %462 = vmatmul.f32.gmra.mxu1 %v214_v48 }
  0x98   : > { %612 = vmatmul.f32.gmra.mxu2 %v4184_v49 }
  0x99   : > { %807 = vmatmul.f32.gmra.mxu3 %v212_v41 }
  0x9e   : > { %352 = vmatmul.f32.gmra.mxu0 %v4189_v50 }
  0x9f   : > { %465 = vmatmul.f32.gmra.mxu1 %v215_v52 }
  0xa0   : > { %615 = vmatmul.f32.gmra.mxu2 %v4193_v53 }
  0xa1   : > { %810 = vmatmul.f32.gmra.mxu3 %v213_v44 }
  0xa6   : > { %355 = vmatmul.f32.gmra.mxu0 %v4198_v55 }
  0xa7   : > { %468 = vmatmul.f32.gmra.mxu1 %v216_v56 }
  0xa8   : > { %618 = vmatmul.f32.gmra.mxu2 %v4202_v57 }
  0xa9   : > { %813 = vmatmul.f32.gmra.mxu3 %v214_v48 }
  0xae   : > { %358 = vmatmul.f32.gmra.mxu0 %v4207_v59 }
  0xaf   : > { %471 = vmatmul.f32.gmra.mxu1 %v217_v61 }
  0xb0   : > { %621 = vmatmul.f32.gmra.mxu2 %v4211_v62 }
  0xb1   : > { %816 = vmatmul.f32.gmra.mxu3 %v215_v52  ;;  %v4272_v52 = vld [vmem:[%s4086_s25 + $0xb2] sm:$0xff] }
  0xb6   : > { %361 = vmatmul.f32.gmra.mxu0 %v4216_v63 }
  0xb7   : > { %474 = vmatmul.f32.gmra.mxu1 %v218_v1 }
  0xb8   : > { %624 = vmatmul.f32.gmra.mxu2 %v4220_v2 }
  0xb9   : > { %819 = vmatmul.f32.gmra.mxu3 %v216_v56 }
  0xbb   : > { %v317_v4 = vpop.f32.mrf.mxu0 }
  0xbc   : > { %v430_v7 = vpop.f32.mrf.mxu1 }
  0xbe   : > { %364 = vmatmul.f32.gmra.mxu0 %v4225_v5 }
  0xbf   : > { %477 = vmatmul.f32.gmra.mxu1 %v219_v8 }
  0xc0   : > { %627 = vmatmul.f32.gmra.mxu2 %v4229_v9 }
  0xc1   : > { %822 = vmatmul.f32.gmra.mxu3 %v217_v61  ;;  %v271_v61 = vld [vmem:[%s4086_s25 + $0xf1] sm:$0xff] }
  0xc2   : > { %v401_v10 = vpop.f32.mrf.mxu2 }
  0xc3   : > { %v4233_v11 = vpop.f32.mrf.mxu0 }
  0xc4   : > { %v4238_v14 = vpop.f32.mrf.mxu1  ;;  %v514_v15 = vpop.f32.mrf.mxu3 }
  0xc5   : > { %v4241_v17 = vadd.f32 %v514_v15, %v401_v10  ;;  %v4284_v15 = vld [vmem:[%s4086_s25 + $0xc2] sm:$0xff] }
  0xc6   : > { %367 = vmatmul.f32.gmra.mxu0 %v4236_v13 }
  0xc7   : > { %5622 = vst [vmem:[#allocation13_spill] sm:$0xff] %v4241_v17  ;;  %480 = vmatmul.f32.gmra.mxu1 %v220_v16  ;;  %v4322_v17 = vld [vmem:[%s4086_s25 + $0xe2] sm:$0xff] }
  0xc8   : > { %630 = vmatmul.f32.gmra.mxu2 %v4244_v18  ;;  %5628 = vst [vmem:[#allocation19_spill] sm:$0xff] %v4322_v17 }
  0xc9   : > { %825 = vmatmul.f32.gmra.mxu3 %v218_v1 }
  0xcb   : > { %v404_v21 = vpop.f32.mrf.mxu2  ;;  %v4248_v22 = vpop.f32.mrf.mxu0 }
  0xcc   : > { %v4253_v24 = vpop.f32.mrf.mxu1  ;;  %v517_v26 = vpop.f32.mrf.mxu3 }
  0xcd   : > { %v4256_v29 = vadd.f32 %v517_v26, %v404_v21 }
  0xce   : > { %370 = vmatmul.f32.gmra.mxu0 %v4251_v23 }
  0xcf   : > { %5623 = vst [vmem:[#allocation14_spill] sm:$0xff] %v4256_v29  ;;  %483 = vmatmul.f32.gmra.mxu1 %v221_v27  ;;  %v4308_v29 = vld [vmem:[%s4086_s25 + $0xda] sm:$0xff] }
  0xd0   : > { %633 = vmatmul.f32.gmra.mxu2 %v4259_v31 }
  0xd1   : > { %828 = vmatmul.f32.gmra.mxu3 %v219_v8  ;;  %v223_v8 = vld [vmem:[%s4086_s25 + $0xf0] sm:$0xff] }
  0xd3   : > { %v407_v33 = vpop.f32.mrf.mxu2  ;;  %v4263_v36 = vpop.f32.mrf.mxu0 }
  0xd4   : > { %v4266_v41 = vpop.f32.mrf.mxu1  ;;  %v520_v44 = vpop.f32.mrf.mxu3 }
  0xd5   : > { %v4269_v48 = vadd.f32 %v520_v44, %v407_v33  ;;  %v272_v33 = vld [vmem:[%s4086_s25 + $0xf9] sm:$0xff] }
  0xd6   : > { %373 = vmatmul.f32.gmra.mxu0 %v270_v39 }
  0xd7   : > { %5624 = vst [vmem:[#allocation15_spill] sm:$0xff] %v4269_v48  ;;  %486 = vmatmul.f32.gmra.mxu1 %v222_v46  ;;  %v1152_v48 = vld [vmem:[#allocation4 + $0x2d0] sm:$0xff] }
  0xd8   : > { %636 = vmatmul.f32.gmra.mxu2 %v4272_v52 }
  0xd9   : > { %831 = vmatmul.f32.gmra.mxu3 %v220_v16  ;;  %v431_v16 = vadd.f32 %v430_v7, %v317_v4  ;;  %v1155_v4 = vld [vmem:[#allocation4 + $0x2e8] sm:$0xff]  ;;  %v1154_v7 = vld [vmem:[#allocation4 + $0x2e0] sm:$0xff] }
  0xdb   : > { %v410_v56 = vpop.f32.mrf.mxu2  ;;  %v4275_v60 = vpop.f32.mrf.mxu0 }
  0xdc   : > { %v4278_v1 = vpop.f32.mrf.mxu1  ;;  %v523_v3 = vpop.f32.mrf.mxu3 }
  0xdd   : > { %v4281_v10 = vadd.f32 %v523_v3, %v410_v56  ;;  %v224_v56 = vld [vmem:[%s4086_s25 + $0xf8] sm:$0xff]  ;;  %v949_v3 = vld [vmem:[#allocation4 + $0x208] sm:$0xff] }
  0xde   : > { %376 = vmatmul.f32.gmra.mxu0 %v271_v61  ;;  %v4294_v61 = vld [vmem:[%s4086_s25 + $0xca] sm:$0xff] }
  0xdf   : > { %5625 = vst [vmem:[#allocation16_spill] sm:$0xff] %v4281_v10  ;;  %489 = vmatmul.f32.gmra.mxu1 %v223_v8  ;;  %v1156_v10 = vld [vmem:[#allocation4 + $0x2f0] sm:$0xff]  ;;  %978 = vmatpush.msrb.mxu0 %v949_v3 }
  0xe0   : > { %639 = vmatmul.f32.gmra.mxu2 %v4284_v15  ;;  %1159 = vmatpush.msrb.mxu1 %v1156_v10  ;;  %v273_v10 = vld [vmem:[%s4086_s25 + $0x109] sm:$0xff] }
  0xe1   : > { %834 = vmatmul.f32.gmra.mxu3 %v221_v27 }
  0xe2   : > { %1160 = vmatpush.msrb.mxu1 %v1155_v4 }
  0xe3   : > { %v592_v21 = vpop.f32.mrf.mxu2  ;;  %v4287_v26 = vpop.f32.mrf.mxu0 }
  0xe4   : > { %v688_v39 = vadd.f32 %v592_v21, %v431_v16  ;;  %v4290_v44 = vpop.f32.mrf.mxu1  ;;  %v787_v54 = vpop.f32.mrf.mxu3  ;;  %v434_v16 = vadd.f32 %v4238_v14, %v4233_v11  ;;  %1161 = vmatpush.msrb.mxu1 %v1154_v7  ;;  %v1151_v11 = vld [vmem:[#allocation4 + $0x2c8] sm:$0xff]  ;;  %v1150_v14 = vld [vmem:[#allocation4 + $0x2c0] sm:$0xff]  ;;  %v437_v7 = vadd.f32 %v4253_v24, %v4248_v22  ;;  %v1352_v22 = vld [vmem:[#allocation4 + $0x378] sm:$0xff] }
  0xe5   : > { %v1147_v24 = vld [vmem:[#allocation4 + $0x2a8] sm:$0xff]  ;;  %1353 = vmatpush.msra.mxu2 %v1352_v22 }
  0xe6   : > { %v4296_v27 = vadd.f32 %v787_v54, %v688_v39  ;;  %379 = vmatmul.f32.gmra.mxu0 %v272_v33  ;;  %1162 = vmatpush.msrb.mxu1 %v1153_v20 }
  0xe7   : > { %492 = vmatmul.f32.gmra.mxu1 %v224_v56 }
  0xe8   : > { %5626 = vst [vmem:[#allocation17_spill] sm:$0xff] %v4296_v27  ;;  %642 = vmatmul.f32.gmra.mxu2 %v4294_v61  ;;  %v225_v27 = vld [vmem:[%s4086_s25 + $0x108] sm:$0xff]  ;;  %1163 = vmatpush.msrb.mxu1 %v1152_v48  ;;  %v274_v48 = vld [vmem:[%s4086_s25 + $0x111] sm:$0xff] }
  0xe9   : > { %837 = vmatmul.f32.gmra.mxu3 %v222_v46  ;;  %v948_v46 = vld [vmem:[#allocation4 + $0x200] sm:$0xff] }
  0xea   : > { %1164 = vmatpush.msrb.mxu1 %v1151_v11  ;;  %979 = vmatpush.msrb.mxu0 %v948_v46  ;;  %v1148_v11 = vld [vmem:[#allocation4 + $0x2b0] sm:$0xff]  ;;  %v1146_v46 = vld [vmem:[#allocation4 + $0x2a0] sm:$0xff] }
  0xeb   : > { %v595_v21 = vpop.f32.mrf.mxu2  ;;  %v4301_v3 = vpop.f32.mrf.mxu0 }
  0xec   : > { %v689_v39 = vadd.f32 %v595_v21, %v434_v16  ;;  %v4304_v33 = vpop.f32.mrf.mxu1  ;;  %v790_v54 = vpop.f32.mrf.mxu3  ;;  %1165 = vmatpush.msrb.mxu1 %v1150_v14  ;;  %v1149_v16 = vld [vmem:[#allocation4 + $0x2b8] sm:$0xff] }
  0xed   : > { %v1546_v14 = vld [vmem:[#allocation4 + $0x3f8] sm:$0xff] }
  0xee   : > { %v4310_v4 = vadd.f32 %v790_v54, %v689_v39  ;;  %382 = vmatmul.f32.gmra.mxu0 %v273_v10  ;;  %1166 = vmatpush.msrb.mxu1 %v1149_v16  ;;  %v1145_v16 = vld [vmem:[#allocation4 + $0x298] sm:$0xff] }
  0xef   : > { %495 = vmatmul.f32.gmra.mxu1 %v225_v27  ;;  %1547 = vmatpush.msra.mxu3 %v1546_v14  ;;  %v1142_v14 = vld [vmem:[#allocation4 + $0x280] sm:$0xff] }
  0xf0   : > { %5627 = vst [vmem:[#allocation18_spill] sm:$0xff] %v4310_v4  ;;  %645 = vmatmul.f32.gmra.mxu2 %v4308_v29  ;;  %v226_v4 = vld [vmem:[%s4086_s25 + $0x110] sm:$0xff]  ;;  %1167 = vmatpush.msrb.mxu1 %v1148_v11 }
  0xf1   : > { %840 = vmatmul.f32.gmra.mxu3 %v223_v8 }
  0xf2   : > { %1168 = vmatpush.msrb.mxu1 %v1147_v24  ;;  %v1144_v24 = vld [vmem:[#allocation4 + $0x290] sm:$0xff] }
  0xf3   : > { %v598_v20 = vpop.f32.mrf.mxu2  ;;  %v4315_v21 = vpop.f32.mrf.mxu0 }
  0xf4   : > { %v690_v10 = vadd.f32 %v598_v20, %v437_v7  ;;  %v4318_v39 = vpop.f32.mrf.mxu1  ;;  %v793_v54 = vpop.f32.mrf.mxu3  ;;  %v440_v7 = vadd.f32 %v4266_v41, %v4263_v36  ;;  %1169 = vmatpush.msrb.mxu1 %v1146_v46  ;;  %v1143_v36 = vld [vmem:[#allocation4 + $0x288] sm:$0xff]  ;;  %v1740_v41 = vld [vmem:[#allocation4 + $0x478] sm:$0xff]  ;;  %v443_v46 = vadd.f32 %v4278_v1, %v4275_v60  ;;  %v1545_v60 = vld [vmem:[#allocation4 + $0x3f0] sm:$0xff]  ;;  %v446_v1 = vadd.f32 %v4290_v44, %v4287_v26 }
  0xf5   : > { %1741 = vmatpush.msra.mxu0 %v1740_v41  ;;  %1548 = vmatpush.msra.mxu3 %v1545_v60  ;;  %v1739_v26 = vld [vmem:[#allocation4 + $0x470] sm:$0xff]  ;;  %v449_v44 = vadd.f32 %v4304_v33, %v4301_v3  ;;  %v1544_v3 = vld [vmem:[#allocation4 + $0x3e8] sm:$0xff]  ;;  %v452_v33 = vadd.f32 %v4318_v39, %v4315_v21 }
  0xf6   : > { %v4324_v8 = vadd.f32 %v793_v54, %v690_v10  ;;  %385 = vmatmul.f32.gmra.mxu0 %v274_v48  ;;  %v275_v10 = vld [vmem:[%s4086_s25 + $0x121] sm:$0xff]  ;;  %1170 = vmatpush.msrb.mxu1 %v1145_v16 }
  0xf7   : > { %498 = vmatmul.f32.gmra.mxu1 %v226_v4  ;;  %1742 = vmatpush.msra.mxu0 %v1739_v26  ;;  %v1738_v21 = vld [vmem:[#allocation4 + $0x468] sm:$0xff] }
  0xf8   : > { %5629 = vst [vmem:[#allocation20_spill] sm:$0xff] %v4324_v8  ;;  %648 = vmatmul.f32.gmra.mxu2 %v4322_v17  ;;  %v227_v8 = vld [vmem:[%s4086_s25 + $0x120] sm:$0xff]  ;;  %v4336_v17 = vld [vmem:[%s4086_s25 + $0xf2] sm:$0xff]  ;;  %1171 = vmatpush.msrb.mxu1 %v1144_v24  ;;  %v228_v24 = vld [vmem:[%s4086_s25 + $0x128] sm:$0xff] }
  0xf9   : > { %843 = vmatmul.f32.gmra.mxu3 %v224_v56  ;;  %1743 = vmatpush.msra.mxu0 %v1738_v21  ;;  %v1347_v21 = vld [vmem:[#allocation4 + $0x350] sm:$0xff] }
  0xfa   : > { %1172 = vmatpush.msrb.mxu1 %v1143_v36  ;;  %1549 = vmatpush.msra.mxu3 %v1544_v3 }
  0xfb   : > { %v601_v20 = vpop.f32.mrf.mxu2  ;;  %v4329_v48 = vpop.f32.mrf.mxu0 }
  0xfc   : > { %v691_v54 = vadd.f32 %v601_v20, %v440_v7  ;;  %v4332_v11 = vpop.f32.mrf.mxu1  ;;  %v796_v22 = vpop.f32.mrf.mxu3  ;;  %1173 = vmatpush.msrb.mxu1 %v1142_v14  ;;  %v276_v20 = vld [vmem:[%s4086_s25 + $0x129] sm:$0xff] }
  0xfd   : > { %v455_v39 = vadd.f32 %v4332_v11, %v4329_v48 }
  0xfe   : > { %v4338_v56 = vadd.f32 %v796_v22, %v691_v54  ;;  %388 = vmatmul.f32.gmra.mxu0 %v275_v10 }
  0xff   : > { %501 = vmatmul.f32.gmra.mxu1 %v227_v8 }
 0x100   : > { %5630 = vst [vmem:[#allocation21_spill] sm:$0xff] %v4338_v56  ;;  %651 = vmatmul.f32.gmra.mxu2 %v4336_v17  ;;  %v4350_v56 = vld [vmem:[%s4086_s25 + $0xfa] sm:$0xff] }
 0x101   : > { %846 = vmatmul.f32.gmra.mxu3 %v225_v27  ;;  %5631 = vst [vmem:[#allocation22_spill] sm:$0xff] %v4350_v56  ;;  %v1351_v27 = vld [vmem:[#allocation4 + $0x370] sm:$0xff] }
 0x102   : > { %1354 = vmatpush.msra.mxu2 %v1351_v27  ;;  %v4366_v27 = vld [vmem:[%s4086_s25 + $0x10a] sm:$0xff] }
 0x103   : > { %v604_v7 = vpop.f32.mrf.mxu2  ;;  %v4343_v16 = vpop.f32.mrf.mxu0 }
 0x104   : > { %v692_v10 = vadd.f32 %v604_v7, %v443_v46  ;;  %v4346_v54 = vpop.f32.mrf.mxu1  ;;  %v799_v22 = vpop.f32.mrf.mxu3  ;;  %v4360_v46 = vld [vmem:[%s4086_s25 + $0x139] sm:$0xff] }
 0x105   : > { %5633 = vst [vmem:[#allocation24_spill] sm:$0xff] %v4360_v46  ;;  %v458_v48 = vadd.f32 %v4346_v54, %v4343_v16  ;;  %v1345_v16 = vld [vmem:[#allocation4 + $0x340] sm:$0xff]  ;;  %v1540_v54 = vld [vmem:[#allocation4 + $0x3c8] sm:$0xff] }
 0x106   : > { %v4352_v36 = vadd.f32 %v799_v22, %v692_v10  ;;  %391 = vmatmul.f32.gmra.mxu0 %v276_v20  ;;  %v229_v22 = vld [vmem:[%s4086_s25 + $0x138] sm:$0xff] }
 0x107   : > { %504 = vmatmul.f32.gmra.mxu1 %v228_v24 }
 0x108   : > { %5632 = vst [vmem:[#allocation23_spill] sm:$0xff] %v4352_v36  ;;  %654 = vmatmul.f32.gmra.mxu2 %v4350_v56 }
 0x109   : > { %849 = vmatmul.f32.gmra.mxu3 %v226_v4 }
 0x10b   : > { %v607_v41 = vpop.f32.mrf.mxu2  ;;  %v4357_v14 = vpop.f32.mrf.mxu0 }
 0x10c   : > { %v693_v7 = vadd.f32 %v607_v41, %v446_v1  ;;  %v4362_v20 = vpop.f32.mrf.mxu1  ;;  %v802_v10 = vpop.f32.mrf.mxu3  ;;  %v4377_v41 = vld [vmem:[%s4086_s25 + $0x141] sm:$0xff] }
 0x10e   : > { %v4368_v4 = vadd.f32 %v802_v10, %v693_v7  ;;  %394 = vmatmul.f32.gmra.mxu0 %v4360_v46  ;;  %v230_v7 = vld [vmem:[%s4086_s25 + $0x140] sm:$0xff]  ;;  %v4381_v10 = vld [vmem:[%s4086_s25 + $0x112] sm:$0xff] }
 0x10f   : > { %507 = vmatmul.f32.gmra.mxu1 %v229_v22 }
 0x110   : > { %5634 = vst [vmem:[#allocation25_spill] sm:$0xff] %v4368_v4  ;;  %657 = vmatmul.f32.gmra.mxu2 %v4366_v27 }
 0x111   : > { %852 = vmatmul.f32.gmra.mxu3 %v227_v8  ;;  %v1350_v8 = vld [vmem:[#allocation4 + $0x368] sm:$0xff] }
 0x112   : > { %1355 = vmatpush.msra.mxu2 %v1350_v8 }
 0x113   : > { %v610_v60 = vpop.f32.mrf.mxu2  ;;  %v4374_v1 = vpop.f32.mrf.mxu0 }
 0x114   : > { %v694_v36 = vadd.f32 %v610_v60, %v449_v44  ;;  %v805_v56 = vpop.f32.mrf.mxu3  ;;  %v4383_v4 = vpop.f32.mrf.mxu1 }
 0x116   : > { %v4385_v46 = vadd.f32 %v805_v56, %v694_v36  ;;  %397 = vmatmul.f32.gmra.mxu0 %v4377_v41  ;;  %v4394_v36 = vld [vmem:[%s4086_s25 + $0x122] sm:$0xff] }
 0x117   : > { %510 = vmatmul.f32.gmra.mxu1 %v230_v7 }
 0x118   : > { %5635 = vst [vmem:[#allocation26_spill] sm:$0xff] %v4385_v46  ;;  %660 = vmatmul.f32.gmra.mxu2 %v4381_v10 }
 0x119   : > { %855 = vmatmul.f32.gmra.mxu3 %v228_v24 }
 0x11b   : > { %v613_v26 = vpop.f32.mrf.mxu2  ;;  %v4391_v44 = vpop.f32.mrf.mxu0 }
 0x11c   : > { %v695_v60 = vadd.f32 %v613_v26, %v452_v33  ;;  %v808_v56 = vpop.f32.mrf.mxu3  ;;  %v4400_v8 = vpop.f32.mrf.mxu1 }
 0x11e   : > { %v4396_v46 = vadd.f32 %v808_v56, %v695_v60  ;;  %980 = vmatmul.f32.vlgmr.msrb.gmra.mxu0 %v4103_v58  ;;  %v4408_v60 = vld [vmem:[%s4086_s25 + $0x12a] sm:$0xff]  ;;  %v1348_v56 = vld [vmem:[#allocation4 + $0x358] sm:$0xff] }
 0x11f   : > { %1174 = vmatmul.f32.vlgmr.msrb.gmra.mxu1 %v4139_v30  ;;  %v1349_v30 = vld [vmem:[#allocation4 + $0x360] sm:$0xff] }
 0x120   : > { %663 = vmatmul.f32.gmra.mxu2 %v4394_v36 }
 0x121   : > { %858 = vmatmul.f32.gmra.mxu3 %v229_v22  ;;  %1356 = vmatpush.msra.mxu2 %v1349_v30  ;;  %v1543_v22 = vld [vmem:[#allocation4 + $0x3e0] sm:$0xff]  ;;  %v1541_v30 = vld [vmem:[#allocation4 + $0x3d0] sm:$0xff] }
 0x122   : > { %1550 = vmatpush.msra.mxu3 %v1543_v22  ;;  %v1737_v22 = vld [vmem:[#allocation4 + $0x460] sm:$0xff] }
 0x123   : > { %v616_v24 = vpop.f32.mrf.mxu2  ;;  %v4405_v3 = vpop.f32.mrf.mxu0  ;;  %1357 = vmatpush.msra.mxu2 %v1348_v56  ;;  %v1344_v56 = vld [vmem:[#allocation4 + $0x338] sm:$0xff]  ;;  %1744 = vmatpush.msra.mxu0 %v1737_v22 }
 0x124   : > { %v696_v33 = vadd.f32 %v616_v24, %v455_v39  ;;  %v811_v26 = vpop.f32.mrf.mxu3  ;;  %v4417_v11 = vpop.f32.mrf.mxu1  ;;  %v1542_v39 = vld [vmem:[#allocation4 + $0x3d8] sm:$0xff] }
 0x125   : > { %1358 = vmatpush.msra.mxu2 %v1347_v21  ;;  %1551 = vmatpush.msra.mxu3 %v1542_v39  ;;  %v461_v21 = vadd.f32 %v4362_v20, %v4357_v14  ;;  %v1538_v39 = vld [vmem:[#allocation4 + $0x3b8] sm:$0xff]  ;;  %v1341_v14 = vld [vmem:[#allocation4 + $0x320] sm:$0xff]  ;;  %v1536_v20 = vld [vmem:[#allocation4 + $0x3a8] sm:$0xff] }
 0x126   : > { %v4410_v58 = vadd.f32 %v811_v26, %v696_v33  ;;  %983 = vmatmul.f32.gmra.mxu0 %v4113_v6  ;;  %v1346_v26 = vld [vmem:[#allocation4 + $0x348] sm:$0xff]  ;;  %v1340_v22 = vld [vmem:[#allocation4 + $0x318] sm:$0xff] }
 0x127   : > { %1177 = vmatmul.f32.gmra.mxu1 %v4148_v34  ;;  %1359 = vmatpush.msra.mxu2 %v1346_v26 }
 0x128   : > { %5636 = vst [vmem:[#allocation27_spill] sm:$0xff] %v4410_v58  ;;  %666 = vmatmul.f32.gmra.mxu2 %v4408_v60  ;;  %v4422_v58 = vld [vmem:[%s4086_s25 + $0x13a] sm:$0xff]  ;;  %1552 = vmatpush.msra.mxu3 %v1541_v30  ;;  %v1342_v30 = vld [vmem:[#allocation4 + $0x328] sm:$0xff] }
 0x129   : > { %861 = vmatmul.f32.gmra.mxu3 %v230_v7  ;;  %1360 = vmatpush.msra.mxu2 %v1345_v16  ;;  %v4437_v16 = vld [vmem:[%s4086_s25 + $0x142] sm:$0xff] }
 0x12a   : > { %1553 = vmatpush.msra.mxu3 %v1540_v54 }
 0x12b   : > { %v619_v6 = vpop.f32.mrf.mxu2  ;;  %v4419_v24 = vpop.f32.mrf.mxu0  ;;  %1361 = vmatpush.msra.mxu2 %v1344_v56  ;;  %v1535_v56 = vld [vmem:[#allocation4 + $0x3a0] sm:$0xff] }
 0x12c   : > { %v697_v34 = vadd.f32 %v619_v6, %v458_v48  ;;  %v814_v33 = vpop.f32.mrf.mxu3  ;;  %v1539_v48 = vld [vmem:[#allocation4 + $0x3c0] sm:$0xff] }
 0x12d   : > { %1554 = vmatpush.msra.mxu3 %v1539_v48  ;;  %v464_v48 = vadd.f32 %v4383_v4, %v4374_v1  ;;  %v1337_v4 = vld [vmem:[#allocation4 + $0x300] sm:$0xff]  ;;  %v1532_v1 = vld [vmem:[#allocation4 + $0x388] sm:$0xff] }
 0x12e   : > { %v4424_v7 = vadd.f32 %v814_v33, %v697_v34  ;;  %986 = vmatmul.f32.gmra.mxu0 %v4123_v19  ;;  %v1343_v19 = vld [vmem:[#allocation4 + $0x330] sm:$0xff]  ;;  %v4434_v34 = vpop.f32.mrf.mxu1 }
 0x12f   : > { %1180 = vmatmul.f32.gmra.mxu1 %v4157_v38  ;;  %1362 = vmatpush.msra.mxu2 %v1343_v19 }
 0x130   : > { %669 = vmatmul.f32.gmra.mxu2 %v4422_v58  ;;  %1555 = vmatpush.msra.mxu3 %v1538_v39 }
 0x131   : > { %864 = vmatmul.f32.gmra.mxu3 %v4092_v37  ;;  %v1537_v37 = vld [vmem:[#allocation4 + $0x3b0] sm:$0xff]  ;;  %1363 = vmatpush.msra.mxu2 %v1342_v30 }
 0x132   : > { %1556 = vmatpush.msra.mxu3 %v1537_v37 }
 0x133   : > { %v622_v6 = vpop.f32.mrf.mxu2  ;;  %v4432_v38 = vpop.f32.mrf.mxu0  ;;  %1364 = vmatpush.msra.mxu2 %v1341_v14  ;;  %v1736_v14 = vld [vmem:[#allocation4 + $0x458] sm:$0xff] }
 0x134   : > { %v698_v33 = vadd.f32 %v622_v6, %v461_v21  ;;  %v817_v26 = vpop.f32.mrf.mxu3  ;;  %1557 = vmatpush.msra.mxu3 %v1536_v20  ;;  %v1339_v21 = vld [vmem:[#allocation4 + $0x310] sm:$0xff]  ;;  %v1531_v20 = vld [vmem:[#allocation4 + $0x380] sm:$0xff]  ;;  %1745 = vmatpush.msra.mxu0 %v1736_v14 }
 0x135   : > { %1365 = vmatpush.msra.mxu2 %v1340_v22  ;;  %v467_v22 = vadd.f32 %v4400_v8, %v4391_v44  ;;  %v470_v44 = vadd.f32 %v4417_v11, %v4405_v3 }
 0x136   : > { %v4439_v54 = vadd.f32 %v817_v26, %v698_v33  ;;  %989 = vmatmul.f32.gmra.mxu0 %v4129_v25  ;;  %1558 = vmatpush.msra.mxu3 %v1535_v56  ;;  %v1338_v33 = vld [vmem:[#allocation4 + $0x308] sm:$0xff]  ;;  %v4450_v26 = vld [vmem:[%s4086_s25 + $0x152] sm:$0xff]  ;;  %v475_v30 = vpop.f32.mrf.mxu1 }
 0x137   : > { %1183 = vmatmul.f32.gmra.mxu1 %v4166_v42  ;;  %v1534_v42 = vld [vmem:[#allocation4 + $0x398] sm:$0xff]  ;;  %1366 = vmatpush.msra.mxu2 %v1339_v21 }
 0x138   : > { %672 = vmatmul.f32.gmra.mxu2 %v4437_v16  ;;  %1559 = vmatpush.msra.mxu3 %v1534_v42  ;;  %v4463_v21 = vld [vmem:[%s4086_s25 + $0x15a] sm:$0xff] }
 0x139   : > { %867 = vmatmul.f32.gmra.mxu3 %v4099_v51  ;;  %v1533_v51 = vld [vmem:[#allocation4 + $0x390] sm:$0xff]  ;;  %1367 = vmatpush.msra.mxu2 %v1338_v33 }
 0x13a   : > { %1560 = vmatpush.msra.mxu3 %v1533_v51  ;;  %v4476_v33 = vld [vmem:[%s4086_s25 + $0x16a] sm:$0xff] }
 0x13b   : > { %v625_v25 = vpop.f32.mrf.mxu2  ;;  %v4447_v19 = vpop.f32.mrf.mxu0  ;;  %1368 = vmatpush.msra.mxu2 %v1337_v4 }
 0x13c   : > { %v699_v39 = vadd.f32 %v625_v25, %v464_v48  ;;  %v820_v6 = vpop.f32.mrf.mxu3  ;;  %1561 = vmatpush.msra.mxu3 %v1532_v1 }
 0x13e   : > { %v4452_v37 = vadd.f32 %v820_v6, %v699_v39  ;;  %992 = vmatmul.f32.gmra.mxu0 %v4135_v28  ;;  %1562 = vmatpush.msra.mxu3 %v1531_v20 }
 0x13f   : > { %1186 = vmatmul.f32.gmra.mxu1 %v4175_v45 }
 0x140   : > { %675 = vmatmul.f32.gmra.mxu2 %v4450_v26 }
 0x141   : > { %870 = vmatmul.f32.gmra.mxu3 %v4109_v0  ;;  %v478_v0 = vpop.f32.mrf.mxu1 }
 0x143   : > { %v628_v28 = vpop.f32.mrf.mxu2  ;;  %v4460_v56 = vpop.f32.mrf.mxu0 }
 0x144   : > { %v700_v45 = vadd.f32 %v628_v28, %v467_v22  ;;  %v823_v48 = vpop.f32.mrf.mxu3 }
 0x146   : > { %v4465_v25 = vadd.f32 %v823_v48, %v700_v45  ;;  %995 = vmatmul.f32.gmra.mxu0 %v4144_v32  ;;  %v3573_v32 = vld [vmem:[%s4086_s25 + $0x180] sm:$0xff] }
 0x147   : > { %1189 = vmatmul.f32.gmra.mxu1 %v4184_v49  ;;  %v473_v49 = vadd.f32 %v4434_v34, %v4419_v24  ;;  %v476_v24 = vadd.f32 %v475_v30, %v4432_v38  ;;  %v479_v38 = vadd.f32 %v478_v0, %v4447_v19 }
 0x148   : > { %678 = vmatmul.f32.gmra.mxu2 %v4463_v21 }
 0x149   : > { %873 = vmatmul.f32.gmra.mxu3 %v4119_v12  ;;  %v1735_v12 = vld [vmem:[#allocation4 + $0x450] sm:$0xff]  ;;  %v481_v3 = vpop.f32.mrf.mxu1 }
 0x14a   : > { %1746 = vmatpush.msra.mxu0 %v1735_v12  ;;  %v3640_v12 = vld [vmem:[%s4086_s25 + $0x38] sm:$0xff]  ;;  %v482_v19 = vadd.f32 %v481_v3, %v4460_v56 }
 0x14b   : > { %v631_v8 = vpop.f32.mrf.mxu2  ;;  %v4473_v42 = vpop.f32.mrf.mxu0 }
 0x14c   : > { %v701_v39 = vadd.f32 %v631_v8, %v470_v44  ;;  %v826_v6 = vpop.f32.mrf.mxu3  ;;  %v3639_v44 = vld [vmem:[%s4086_s25 + $0x30] sm:$0xff] }
 0x14e   : > { %v4478_v51 = vadd.f32 %v826_v6, %v701_v39  ;;  %998 = vmatmul.f32.gmra.mxu0 %v4153_v35  ;;  %v4489_v35 = vld [vmem:[%s4086_s25 + $0x172] sm:$0xff] }
 0x14f   : > { %1192 = vmatmul.f32.gmra.mxu1 %v4193_v53  ;;  %v4495_v53 = vld [vmem:[%s4086_s25 + $0x188] sm:$0xff] }
 0x150   : > { %681 = vmatmul.f32.gmra.mxu2 %v4476_v33 }
 0x151   : > { %876 = vmatmul.f32.gmra.mxu3 %v3573_v32  ;;  %v484_v28 = vpop.f32.mrf.mxu1 }
 0x152   : > { %v485_v56 = vadd.f32 %v484_v28, %v4473_v42 }
 0x153   : > { %v634_v11 = vpop.f32.mrf.mxu2  ;;  %v4486_v4 = vpop.f32.mrf.mxu0 }
 0x154   : > { %v702_v1 = vadd.f32 %v634_v11, %v473_v49  ;;  %v829_v14 = vpop.f32.mrf.mxu3 }
 0x156   : > { %v4491_v20 = vadd.f32 %v829_v14, %v702_v1  ;;  %1001 = vmatmul.f32.gmra.mxu0 %v4162_v40  ;;  %v3671_v40 = vld [vmem:[%s4086_s25 + $0x31] sm:$0xff] }
 0x157   : > { %1195 = vmatmul.f32.gmra.mxu1 %v4202_v57  ;;  %v1734_v57 = vld [vmem:[#allocation4 + $0x448] sm:$0xff] }
 0x158   : > { %684 = vmatmul.f32.gmra.mxu2 %v4489_v35  ;;  %1747 = vmatpush.msra.mxu0 %v1734_v57  ;;  %v3642_v57 = vld [vmem:[%s4086_s25 + $0x50] sm:$0xff] }
 0x159   : > { %879 = vmatmul.f32.gmra.mxu3 %v4495_v53  ;;  %v487_v49 = vpop.f32.mrf.mxu1 }
 0x15b   : > { %v637_v34 = vpop.f32.mrf.mxu2  ;;  %v4501_v22 = vpop.f32.mrf.mxu0 }
 0x15c   : > { %v703_v45 = vadd.f32 %v637_v34, %v476_v24  ;;  %v832_v48 = vpop.f32.mrf.mxu3  ;;  %v3641_v24 = vld [vmem:[%s4086_s25 + $0x48] sm:$0xff] }
 0x15e   : > { %v4504_v8 = vadd.f32 %v832_v48, %v703_v45  ;;  %1004 = vmatmul.f32.gmra.mxu0 %v4171_v43  ;;  %v1733_v45 = vld [vmem:[#allocation4 + $0x440] sm:$0xff] }
 0x15f   : > { %1198 = vmatmul.f32.gmra.mxu1 %v4211_v62  ;;  %v3672_v62 = vld [vmem:[%s4086_s25 + $0x39] sm:$0xff]  ;;  %1748 = vmatpush.msra.mxu0 %v1733_v45 }
 0x160   : > { %1369 = vmatmul.f32.vlgmr.msra.gmra.mxu2 %v3639_v44 }
 0x161   : > { %1563 = vmatmul.f32.vlgmr.msra.gmra.mxu3 %v3671_v40 }
 0x163   : > { %v640_v30 = vpop.f32.mrf.mxu2  ;;  %v4510_v39 = vpop.f32.mrf.mxu0 }
 0x164   : > { %v704_v6 = vadd.f32 %v640_v30, %v479_v38  ;;  %v835_v32 = vpop.f32.mrf.mxu3  ;;  %v488_v38 = vadd.f32 %v487_v49, %v4486_v4 }
 0x166   : > { %v4513_v43 = vadd.f32 %v835_v32, %v704_v6  ;;  %1007 = vmatmul.f32.gmra.mxu0 %v4180_v47  ;;  %v3673_v47 = vld [vmem:[%s4086_s25 + $0x49] sm:$0xff] }
 0x167   : > { %1201 = vmatmul.f32.gmra.mxu1 %v4220_v2  ;;  %v490_v2 = vpop.f32.mrf.mxu1 }
 0x168   : > { %1372 = vmatmul.f32.gmra.mxu2 %v3640_v12  ;;  %v3643_v12 = vld [vmem:[%s4086_s25 + $0x60] sm:$0xff]  ;;  %v491_v4 = vadd.f32 %v490_v2, %v4501_v22 }
 0x169   : > { %1566 = vmatmul.f32.gmra.mxu3 %v3672_v62 }
 0x16b   : > { %v643_v0 = vpop.f32.mrf.mxu2  ;;  %v4519_v11 = vpop.f32.mrf.mxu0 }
 0x16c   : > { %v705_v1 = vadd.f32 %v643_v0, %v482_v19  ;;  %v838_v14 = vpop.f32.mrf.mxu3 }
 0x16e   : > { %v4522_v34 = vadd.f32 %v838_v14, %v705_v1  ;;  %1010 = vmatmul.f32.gmra.mxu0 %v4189_v50 }
 0x16f   : > { %1204 = vmatmul.f32.gmra.mxu1 %v4229_v9  ;;  %v3674_v9 = vld [vmem:[%s4086_s25 + $0x51] sm:$0xff]  ;;  %v493_v42 = vpop.f32.mrf.mxu1 }
 0x170   : > { %1375 = vmatmul.f32.gmra.mxu2 %v3641_v24  ;;  %v3644_v24 = vld [vmem:[%s4086_s25 + $0x68] sm:$0xff]  ;;  %v494_v22 = vadd.f32 %v493_v42, %v4510_v39 }
 0x171   : > { %1569 = vmatmul.f32.gmra.mxu3 %v3673_v47 }
 0x173   : > { %v646_v3 = vpop.f32.mrf.mxu2  ;;  %v4528_v48 = vpop.f32.mrf.mxu0 }
 0x174   : > { %v706_v44 = vadd.f32 %v646_v3, %v485_v56  ;;  %v841_v40 = vpop.f32.mrf.mxu3  ;;  %v3645_v3 = vld [vmem:[%s4086_s25 + $0x78] sm:$0xff] }
 0x176   : > { %v4531_v50 = vadd.f32 %v841_v40, %v706_v44  ;;  %1013 = vmatmul.f32.gmra.mxu0 %v4198_v55  ;;  %v3675_v55 = vld [vmem:[%s4086_s25 + $0x61] sm:$0xff] }
 0x177   : > { %1207 = vmatmul.f32.gmra.mxu1 %v4244_v18  ;;  %v1732_v18 = vld [vmem:[#allocation4 + $0x438] sm:$0xff]  ;;  %v496_v0 = vpop.f32.mrf.mxu1 }
 0x178   : > { %1378 = vmatmul.f32.gmra.mxu2 %v3642_v57  ;;  %1749 = vmatpush.msra.mxu0 %v1732_v18  ;;  %v497_v39 = vadd.f32 %v496_v0, %v4519_v11 }
 0x179   : > { %1572 = vmatmul.f32.gmra.mxu3 %v3674_v9 }
 0x17b   : > { %v649_v28 = vpop.f32.mrf.mxu2  ;;  %v4537_v30 = vpop.f32.mrf.mxu0 }
 0x17c   : > { %v707_v6 = vadd.f32 %v649_v28, %v488_v38  ;;  %v844_v32 = vpop.f32.mrf.mxu3  ;;  %v3646_v28 = vld [vmem:[%s4086_s25 + $0x80] sm:$0xff] }
 0x17e   : > { %v4540_v62 = vadd.f32 %v844_v32, %v707_v6  ;;  %1016 = vmatmul.f32.gmra.mxu0 %v4207_v59 }
 0x17f   : > { %1210 = vmatmul.f32.gmra.mxu1 %v4259_v31  ;;  %v3676_v31 = vld [vmem:[%s4086_s25 + $0x69] sm:$0xff]  ;;  %v499_v44 = vpop.f32.mrf.mxu1 }
 0x180   : > { %1381 = vmatmul.f32.gmra.mxu2 %v3643_v12  ;;  %v500_v11 = vadd.f32 %v499_v44, %v4528_v48  ;;  %v4597_v44 = vld [vmem:[%s4086_s25 + $0xf1] sm:$0xff] }
 0x181   : > { %1575 = vmatmul.f32.gmra.mxu3 %v3675_v55 }
 0x183   : > { %v652_v49 = vpop.f32.mrf.mxu2  ;;  %v4546_v19 = vpop.f32.mrf.mxu0 }
 0x184   : > { %v708_v1 = vadd.f32 %v652_v49, %v491_v4  ;;  %v847_v14 = vpop.f32.mrf.mxu3  ;;  %v3647_v4 = vld [vmem:[%s4086_s25 + $0x90] sm:$0xff] }
 0x186   : > { %v4549_v59 = vadd.f32 %v847_v14, %v708_v1  ;;  %1019 = vmatmul.f32.gmra.mxu0 %v4216_v63  ;;  %v3677_v63 = vld [vmem:[%s4086_s25 + $0x79] sm:$0xff] }
 0x187   : > { %1213 = vmatmul.f32.gmra.mxu1 %v4272_v52  ;;  %v1731_v52 = vld [vmem:[#allocation4 + $0x430] sm:$0xff] }
 0x188   : > { %1384 = vmatmul.f32.gmra.mxu2 %v3644_v24  ;;  %1750 = vmatpush.msra.mxu0 %v1731_v52  ;;  %v4585_v24 = vld [vmem:[%s4086_s25 + $0xe1] sm:$0xff] }
 0x189   : > { %1578 = vmatmul.f32.gmra.mxu3 %v3676_v31 }
 0x18b   : > { %v655_v47 = vpop.f32.mrf.mxu2  ;;  %v4555_v2 = vpop.f32.mrf.mxu0 }
 0x18c   : > { %v709_v45 = vadd.f32 %v655_v47, %v494_v22  ;;  %v850_v56 = vpop.f32.mrf.mxu3  ;;  %v3648_v22 = vld [vmem:[%s4086_s25 + $0x98] sm:$0xff] }
 0x18e   : > { %v4558_v40 = vadd.f32 %v850_v56, %v709_v45  ;;  %1022 = vmatmul.f32.gmra.mxu0 %v4225_v5  ;;  %v3678_v5 = vld [vmem:[%s4086_s25 + $0x81] sm:$0xff]  ;;  %v5639_v45 = vld [vmem:[#allocation19_spill] sm:$0xff] }
 0x18f   : > { %1216 = vmatmul.f32.gmra.mxu1 %v4284_v15  ;;  %v502_v15 = vpop.f32.mrf.mxu1 }
 0x190   : > { %1387 = vmatmul.f32.gmra.mxu2 %v3645_v3  ;;  %v503_v48 = vadd.f32 %v502_v15, %v4537_v30 }
 0x191   : > { %1581 = vmatmul.f32.gmra.mxu3 %v3677_v63 }
 0x193   : > { %v658_v57 = vpop.f32.mrf.mxu2  ;;  %v4564_v9 = vpop.f32.mrf.mxu0 }
 0x194   : > { %v710_v38 = vadd.f32 %v658_v57, %v497_v39  ;;  %v853_v42 = vpop.f32.mrf.mxu3  ;;  %v3649_v57 = vld [vmem:[%s4086_s25 + $0xa8] sm:$0xff] }
 0x196   : > { %v4567_v6 = vadd.f32 %v853_v42, %v710_v38  ;;  %1025 = vmatmul.f32.gmra.mxu0 %v4236_v13  ;;  %v3679_v13 = vld [vmem:[%s4086_s25 + $0x91] sm:$0xff]  ;;  %v3681_v42 = vld [vmem:[%s4086_s25 + $0xa9] sm:$0xff] }
 0x197   : > { %1219 = vmatmul.f32.gmra.mxu1 %v4294_v61  ;;  %v1730_v61 = vld [vmem:[#allocation4 + $0x428] sm:$0xff]  ;;  %v505_v0 = vpop.f32.mrf.mxu1 }
 0x198   : > { %1390 = vmatmul.f32.gmra.mxu2 %v3646_v28  ;;  %1751 = vmatpush.msra.mxu0 %v1730_v61  ;;  %v506_v30 = vadd.f32 %v505_v0, %v4546_v19  ;;  %v1729_v19 = vld [vmem:[#allocation4 + $0x420] sm:$0xff]  ;;  %v5642_v61 = vld [vmem:[#allocation22_spill] sm:$0xff] }
 0x199   : > { %1584 = vmatmul.f32.gmra.mxu3 %v3678_v5 }
 0x19a   : > { %1752 = vmatpush.msra.mxu0 %v1729_v19 }
 0x19b   : > { %v661_v32 = vpop.f32.mrf.mxu2  ;;  %v4573_v12 = vpop.f32.mrf.mxu0 }
 0x19c   : > { %v711_v55 = vadd.f32 %v661_v32, %v500_v11  ;;  %v856_v18 = vpop.f32.mrf.mxu3  ;;  %v4609_v11 = vld [vmem:[%s4086_s25 + $0xf9] sm:$0xff] }
 0x19e   : > { %v4576_v49 = vadd.f32 %v856_v18, %v711_v55  ;;  %1028 = vmatmul.f32.gmra.mxu0 %v4251_v23  ;;  %v3650_v18 = vld [vmem:[%s4086_s25 + $0xb0] sm:$0xff] }
 0x19f   : > { %1222 = vmatmul.f32.gmra.mxu1 %v4308_v29  ;;  %v3680_v29 = vld [vmem:[%s4086_s25 + $0x99] sm:$0xff]  ;;  %v508_v39 = vpop.f32.mrf.mxu1 }
 0x1a0   : > { %5637 = vst [vmem:[#allocation28_spill] sm:$0xff] %v4576_v49  ;;  %1393 = vmatmul.f32.gmra.mxu2 %v3647_v4  ;;  %v509_v28 = vadd.f32 %v508_v39, %v4555_v2 }
 0x1a1   : > { %1587 = vmatmul.f32.gmra.mxu3 %v3679_v13 }
 0x1a3   : > { %v664_v1 = vpop.f32.mrf.mxu2  ;;  %v4582_v14 = vpop.f32.mrf.mxu0 }
 0x1a4   : > { %v712_v31 = vadd.f32 %v664_v1, %v503_v48  ;;  %v859_v23 = vpop.f32.mrf.mxu3  ;;  %v4621_v1 = vld [vmem:[%s4086_s25 + $0x109] sm:$0xff] }
 0x1a6   : > { %v4588_v47 = vadd.f32 %v859_v23, %v712_v31  ;;  %1031 = vmatmul.f32.gmra.mxu0 %v4585_v24 }
 0x1a7   : > { %1225 = vmatmul.f32.gmra.mxu1 %v5639_v45  ;;  %v511_v13 = vpop.f32.mrf.mxu1  ;;  %v3683_v45 = vld [vmem:[%s4086_s25 + $0xc1] sm:$0xff] }
 0x1a8   : > { %5638 = vst [vmem:[#allocation29_spill] sm:$0xff] %v4588_v47  ;;  %1396 = vmatmul.f32.gmra.mxu2 %v3648_v22  ;;  %v512_v2 = vadd.f32 %v511_v13, %v4564_v9  ;;  %v3651_v22 = vld [vmem:[%s4086_s25 + $0xc0] sm:$0xff]  ;;  %v1728_v9 = vld [vmem:[#allocation4 + $0x418] sm:$0xff] }
 0x1a9   : > { %1590 = vmatmul.f32.gmra.mxu3 %v3680_v29  ;;  %1753 = vmatpush.msra.mxu0 %v1728_v9  ;;  %v3653_v13 = vld [vmem:[%s4086_s25 + $0xd8] sm:$0xff] }
 0x1ab   : > { %v667_v56 = vpop.f32.mrf.mxu2  ;;  %v4594_v3 = vpop.f32.mrf.mxu0 }
 0x1ac   : > { %v713_v63 = vadd.f32 %v667_v56, %v506_v30  ;;  %v862_v52 = vpop.f32.mrf.mxu3 }
 0x1ae   : > { %v4600_v38 = vadd.f32 %v862_v52, %v713_v63  ;;  %1034 = vmatmul.f32.gmra.mxu0 %v4597_v44  ;;  %v4632_v63 = vld [vmem:[%s4086_s25 + $0x111] sm:$0xff]  ;;  %v5644_v52 = vld [vmem:[#allocation13_spill] sm:$0xff] }
 0x1af   : > { %1228 = vmatmul.f32.gmra.mxu1 %v4336_v17  ;;  %v3682_v17 = vld [vmem:[%s4086_s25 + $0xb1] sm:$0xff] }
 0x1b0   : > { %5640 = vst [vmem:[#allocation19_spill] sm:$0xff] %v4600_v38  ;;  %1399 = vmatmul.f32.gmra.mxu2 %v3649_v57 }
 0x1b1   : > { %1593 = vmatmul.f32.gmra.mxu3 %v3681_v42  ;;  %v3652_v42 = vld [vmem:[%s4086_s25 + $0xc8] sm:$0xff] }
 0x1b3   : > { %v670_v5 = vpop.f32.mrf.mxu2  ;;  %v4606_v15 = vpop.f32.mrf.mxu0 }
 0x1b4   : > { %v714_v32 = vadd.f32 %v670_v5, %v509_v28  ;;  %v865_v55 = vpop.f32.mrf.mxu3 }
 0x1b6   : > { %v4612_v4 = vadd.f32 %v865_v55, %v714_v32  ;;  %1037 = vmatmul.f32.gmra.mxu0 %v4609_v11  ;;  %v4644_v32 = vld [vmem:[%s4086_s25 + $0x121] sm:$0xff]  ;;  %v5646_v55 = vld [vmem:[#allocation14_spill] sm:$0xff] }
 0x1b7   : > { %1231 = vmatmul.f32.gmra.mxu1 %v5642_v61 }
 0x1b8   : > { %5641 = vst [vmem:[#allocation30_spill] sm:$0xff] %v4612_v4  ;;  %1402 = vmatmul.f32.gmra.mxu2 %v3650_v18 }
 0x1b9   : > { %1596 = vmatmul.f32.gmra.mxu3 %v3682_v17 }
 0x1bb   : > { %v673_v48 = vpop.f32.mrf.mxu2  ;;  %v4618_v0 = vpop.f32.mrf.mxu0 }
 0x1bc   : > { %v715_v31 = vadd.f32 %v673_v48, %v512_v2  ;;  %v868_v23 = vpop.f32.mrf.mxu3  ;;  %v3685_v2 = vld [vmem:[%s4086_s25 + $0xd9] sm:$0xff]  ;;  %v1727_v48 = vld [vmem:[#allocation4 + $0x410] sm:$0xff] }
 0x1bd   : > { %1754 = vmatpush.msra.mxu0 %v1727_v48  ;;  %v5653_v48 = vld [vmem:[#allocation24_spill] sm:$0xff] }
 0x1be   : > { %v4624_v29 = vadd.f32 %v868_v23, %v715_v31  ;;  %1040 = vmatmul.f32.gmra.mxu0 %v4621_v1 }
 0x1bf   : > { %1234 = vmatmul.f32.gmra.mxu1 %v4366_v27  ;;  %v3684_v27 = vld [vmem:[%s4086_s25 + $0xc9] sm:$0xff] }
 0x1c0   : > { %5643 = vst [vmem:[#allocation22_spill] sm:$0xff] %v4624_v29  ;;  %1405 = vmatmul.f32.gmra.mxu2 %v3651_v22  ;;  %v4656_v22 = vld [vmem:[%s4086_s25 + $0x129] sm:$0xff] }
 0x1c1   : > { %1599 = vmatmul.f32.gmra.mxu3 %v3683_v45  ;;  %v5648_v45 = vld [vmem:[#allocation15_spill] sm:$0xff] }
 0x1c3   : > { %v676_v30 = vpop.f32.mrf.mxu2  ;;  %v4629_v56 = vpop.f32.mrf.mxu0 }
 0x1c4   : > { %v716_v39 = vadd.f32 %v676_v30, %v5644_v52  ;;  %v871_v57 = vpop.f32.mrf.mxu3  ;;  %v3654_v52 = vld [vmem:[%s4086_s25 + $0xe0] sm:$0xff] }
 0x1c6   : > { %v4636_v19 = vadd.f32 %v871_v57, %v716_v39  ;;  %1043 = vmatmul.f32.gmra.mxu0 %v4632_v63 }
 0x1c7   : > { %1237 = vmatmul.f32.gmra.mxu1 %v4381_v10  ;;  %v1175_v10 = vpop.f32.mrf.mxu1 }
 0x1c8   : > { %5645 = vst [vmem:[#allocation13_spill] sm:$0xff] %v4636_v19  ;;  %1408 = vmatmul.f32.gmra.mxu2 %v3652_v42 }
 0x1c9   : > { %1602 = vmatmul.f32.gmra.mxu3 %v3684_v27  ;;  %v5650_v27 = vld [vmem:[#allocation16_spill] sm:$0xff] }
 0x1cb   : > { %v679_v28 = vpop.f32.mrf.mxu2  ;;  %v4641_v5 = vpop.f32.mrf.mxu0 }
 0x1cc   : > { %v717_v18 = vadd.f32 %v679_v28, %v5646_v55  ;;  %v874_v17 = vpop.f32.mrf.mxu3 }
 0x1ce   : > { %v4648_v61 = vadd.f32 %v874_v17, %v717_v18  ;;  %1046 = vmatmul.f32.gmra.mxu0 %v4644_v32  ;;  %v3655_v18 = vld [vmem:[%s4086_s25 + $0xf0] sm:$0xff]  ;;  %v5651_v17 = vld [vmem:[#allocation17_spill] sm:$0xff] }
 0x1cf   : > { %1240 = vmatmul.f32.gmra.mxu1 %v4394_v36  ;;  %v1178_v36 = vpop.f32.mrf.mxu1 }
 0x1d0   : > { %5647 = vst [vmem:[#allocation14_spill] sm:$0xff] %v4648_v61  ;;  %1411 = vmatmul.f32.gmra.mxu2 %v3653_v13  ;;  %v1077_v13 = vadd.f32 %v4573_v12, %v5651_v17  ;;  %v2072_v61 = vld [vmem:[#allocation4 + $0x4c8] sm:$0xff] }
 0x1d1   : > { %1605 = vmatmul.f32.gmra.mxu3 %v3685_v2 }
 0x1d3   : > { %v682_v31 = vpop.f32.mrf.mxu2  ;;  %v4653_v23 = vpop.f32.mrf.mxu0 }
 0x1d4   : > { %v718_v9 = vadd.f32 %v682_v31, %v5648_v45  ;;  %v877_v30 = vpop.f32.mrf.mxu3 }
 0x1d6   : > { %v4660_v39 = vadd.f32 %v877_v30, %v718_v9  ;;  %1049 = vmatmul.f32.gmra.mxu0 %v4656_v22 }
 0x1d7   : > { %1243 = vmatmul.f32.gmra.mxu1 %v4408_v60  ;;  %v1726_v60 = vld [vmem:[#allocation4 + $0x408] sm:$0xff]  ;;  %v1181_v9 = vpop.f32.mrf.mxu1 }
 0x1d8   : > { %5649 = vst [vmem:[#allocation15_spill] sm:$0xff] %v4660_v39  ;;  %1414 = vmatmul.f32.gmra.mxu2 %v3654_v52  ;;  %1755 = vmatpush.msra.mxu0 %v1726_v60  ;;  %v3656_v52 = vld [vmem:[%s4086_s25 + $0xf8] sm:$0xff] }
 0x1d9   : > { %1608 = vmatmul.f32.gmra.mxu3 %v4585_v24  ;;  %v1271_v24 = vadd.f32 %v1175_v10, %v1077_v13  ;;  %v3657_v13 = vld [vmem:[%s4086_s25 + $0x108] sm:$0xff] }
 0x1db   : > { %v685_v57 = vpop.f32.mrf.mxu2  ;;  %v4665_v42 = vpop.f32.mrf.mxu0 }
 0x1dc   : > { %v719_v28 = vadd.f32 %v685_v57, %v5650_v27  ;;  %v880_v55 = vpop.f32.mrf.mxu3  ;;  %v5654_v57 = vld [vmem:[#allocation18_spill] sm:$0xff] }
 0x1dd   : > { %v1078_v27 = vadd.f32 %v4582_v14, %v5654_v57  ;;  %v5655_v14 = vld [vmem:[#allocation20_spill] sm:$0xff] }
 0x1de   : > { %v4671_v2 = vadd.f32 %v880_v55, %v719_v28  ;;  %1052 = vmatmul.f32.gmra.mxu0 %v5653_v48  ;;  %v4689_v55 = vld [vmem:[%s4086_s25 + $0x151] sm:$0xff]  ;;  %v1079_v48 = vadd.f32 %v4594_v3, %v5655_v14 }
 0x1df   : > { %1246 = vmatmul.f32.gmra.mxu1 %v4422_v58  ;;  %v1272_v58 = vadd.f32 %v1178_v36, %v1078_v27 }
 0x1e0   : > { %5652 = vst [vmem:[#allocation16_spill] sm:$0xff] %v4671_v2  ;;  %1417 = vmatmul.f32.gmra.mxu2 %v3655_v18  ;;  %v2096_v2 = vld [vmem:[#allocation4 + $0x540] sm:$0xff] }
 0x1e1   : > { %1611 = vmatmul.f32.gmra.mxu3 %v4597_v44 }
 0x1e3   : > { %v1370_v31 = vpop.f32.mrf.mxu2  ;;  %v4676_v45 = vpop.f32.mrf.mxu0 }
 0x1e4   : > { %v1466_v30 = vadd.f32 %v1370_v31, %v1271_v24  ;;  %v1564_v12 = vpop.f32.mrf.mxu3  ;;  %v4702_v31 = vld [vmem:[%s4086_s25 + $0x159] sm:$0xff] }
 0x1e6   : > { %v4681_v28 = vadd.f32 %v1564_v12, %v1466_v30  ;;  %1055 = vmatmul.f32.gmra.mxu0 %v4377_v41  ;;  %v1184_v41 = vpop.f32.mrf.mxu1  ;;  %v3658_v12 = vld [vmem:[%s4086_s25 + $0x110] sm:$0xff] }
 0x1e7   : > { %1249 = vmatmul.f32.gmra.mxu1 %v4437_v16  ;;  %v1725_v16 = vld [vmem:[#allocation4 + $0x400] sm:$0xff] }
 0x1e8   : > { %1420 = vmatmul.f32.gmra.mxu2 %v3656_v52  ;;  %1756 = vmatpush.msra.mxu0 %v1725_v16  ;;  %v5656_v52 = vld [vmem:[#allocation21_spill] sm:$0xff] }
 0x1e9   : > { %1614 = vmatmul.f32.gmra.mxu3 %v4609_v11  ;;  %v1273_v11 = vadd.f32 %v1181_v9, %v1079_v48  ;;  %v1080_v57 = vadd.f32 %v4606_v15, %v5656_v52 }
 0x1eb   : > { %v1373_v44 = vpop.f32.mrf.mxu2  ;;  %v4686_v10 = vpop.f32.mrf.mxu0  ;;  %v1274_v9 = vadd.f32 %v1184_v41, %v1080_v57 }
 0x1ec   : > { %v1467_v18 = vadd.f32 %v1373_v44, %v1272_v58  ;;  %v1567_v17 = vpop.f32.mrf.mxu3  ;;  %v4715_v44 = vld [vmem:[%s4086_s25 + $0x169] sm:$0xff] }
 0x1ee   : > { %v4694_v60 = vadd.f32 %v1567_v17, %v1467_v18  ;;  %1058 = vmatmul.f32.gmra.mxu0 %v4689_v55  ;;  %v3659_v17 = vld [vmem:[%s4086_s25 + $0x120] sm:$0xff] }
 0x1ef   : > { %1252 = vmatmul.f32.gmra.mxu1 %v4450_v26 }
 0x1f0   : > { %1423 = vmatmul.f32.gmra.mxu2 %v3657_v13  ;;  %v5657_v13 = vld [vmem:[#allocation23_spill] sm:$0xff] }
 0x1f1   : > { %1617 = vmatmul.f32.gmra.mxu3 %v4621_v1  ;;  %v1187_v1 = vpop.f32.mrf.mxu1  ;;  %v1081_v14 = vadd.f32 %v4618_v0, %v5657_v13 }
 0x1f3   : > { %v1376_v36 = vpop.f32.mrf.mxu2  ;;  %v4699_v24 = vpop.f32.mrf.mxu0 }
 0x1f4   : > { %v1468_v3 = vadd.f32 %v1376_v36, %v1273_v11  ;;  %v1570_v30 = vpop.f32.mrf.mxu3  ;;  %v4728_v11 = vld [vmem:[%s4086_s25 + $0x171] sm:$0xff] }
 0x1f6   : > { %v4707_v26 = vadd.f32 %v1570_v30, %v1468_v3  ;;  %1061 = vmatmul.f32.gmra.mxu0 %v4702_v31  ;;  %v3660_v3 = vld [vmem:[%s4086_s25 + $0x128] sm:$0xff] }
 0x1f7   : > { %1255 = vmatmul.f32.gmra.mxu1 %v4463_v21  ;;  %v1275_v21 = vadd.f32 %v1187_v1, %v1081_v14  ;;  %v5658_v30 = vld [vmem:[#allocation25_spill] sm:$0xff] }
 0x1f8   : > { %1426 = vmatmul.f32.gmra.mxu2 %v3658_v12  ;;  %v1082_v12 = vadd.f32 %v4629_v56, %v5658_v30  ;;  %v4741_v1 = vld [vmem:[%s4086_s25 + $0x181] sm:$0xff]  ;;  %v1084_v30 = vadd.f32 %v4653_v23, %v4396_v46  ;;  %v3663_v23 = vld [vmem:[%s4086_s25 + $0x150] sm:$0xff] }
 0x1f9   : > { %1620 = vmatmul.f32.gmra.mxu3 %v4632_v63  ;;  %v1190_v63 = vpop.f32.mrf.mxu1  ;;  %v4744_v56 = vld [vmem:[%s4086_s25 + $0x182] sm:$0xff] }
 0x1fb   : > { %v1379_v27 = vpop.f32.mrf.mxu2  ;;  %v4712_v58 = vpop.f32.mrf.mxu0 }
 0x1fc   : > { %v1469_v18 = vadd.f32 %v1379_v27, %v1274_v9  ;;  %v1573_v15 = vpop.f32.mrf.mxu3 }
 0x1fe   : > { %v4720_v48 = vadd.f32 %v1573_v15, %v1469_v18  ;;  %1064 = vmatmul.f32.gmra.mxu0 %v4715_v44  ;;  %v3661_v15 = vld [vmem:[%s4086_s25 + $0x138] sm:$0xff] }
 0x1ff   : > { %1258 = vmatmul.f32.gmra.mxu1 %v4476_v33 }
 0x200   : > { %1429 = vmatmul.f32.gmra.mxu2 %v3659_v17  ;;  %v5659_v17 = vld [vmem:[#allocation26_spill] sm:$0xff] }
 0x201   : > { %1623 = vmatmul.f32.gmra.mxu3 %v4644_v32  ;;  %v1276_v32 = vadd.f32 %v1190_v63, %v1082_v12  ;;  %v1193_v18 = vpop.f32.mrf.mxu1 }
 0x203   : > { %v1382_v41 = vpop.f32.mrf.mxu2  ;;  %v4725_v16 = vpop.f32.mrf.mxu0 }
 0x204   : > { %v1470_v36 = vadd.f32 %v1382_v41, %v1275_v21  ;;  %v1576_v0 = vpop.f32.mrf.mxu3  ;;  %v3606_v41 = vld [vmem:[%s4086_s25 + $0x189] sm:$0xff] }
 0x206   : > { %v4733_v33 = vadd.f32 %v1576_v0, %v1470_v36  ;;  %1067 = vmatmul.f32.gmra.mxu0 %v4728_v11 }
 0x207   : > { %1261 = vmatmul.f32.gmra.mxu1 %v4489_v35  ;;  %v1083_v35 = vadd.f32 %v4641_v5, %v5659_v17  ;;  %v3662_v5 = vld [vmem:[%s4086_s25 + $0x140] sm:$0xff] }
 0x208   : > { %1432 = vmatmul.f32.gmra.mxu2 %v3660_v3  ;;  %v4758_v3 = vld [vmem:[%s4086_s25 + $0x18a] sm:$0xff] }
 0x209   : > { %1626 = vmatmul.f32.gmra.mxu3 %v4656_v22  ;;  %v3693_v22 = vld [vmem:[%s4086_s25 + $0x139] sm:$0xff]  ;;  %v1277_v14 = vadd.f32 %v1193_v18, %v1083_v35 }
 0x20b   : > { %v1385_v52 = vpop.f32.mrf.mxu2  ;;  %v4738_v57 = vpop.f32.mrf.mxu0 }
 0x20c   : > { %v1471_v9 = vadd.f32 %v1385_v52, %v1276_v32  ;;  %v1579_v27 = vpop.f32.mrf.mxu3  ;;  %v3694_v32 = vld [vmem:[%s4086_s25 + $0x141] sm:$0xff]  ;;  %v1196_v52 = vpop.f32.mrf.mxu1 }
 0x20e   : > { %v4749_v13 = vadd.f32 %v1579_v27, %v1471_v9  ;;  %1070 = vmatmul.f32.gmra.mxu0 %v4741_v1  ;;  %v1278_v9 = vadd.f32 %v1196_v52, %v1084_v30  ;;  %v2078_v52 = vld [vmem:[#allocation4 + $0x4f8] sm:$0xff] }
 0x20f   : > { %1264 = vmatmul.f32.gmra.mxu1 %v4744_v56  ;;  %2145 = vmatpush.msrb.mxu2 %v2078_v52  ;;  %v3670_v52 = vld [vmem:[%s4086_s25 + $0x1a0] sm:$0xff] }
 0x210   : > { %1435 = vmatmul.f32.gmra.mxu2 %v3661_v15  ;;  %v3703_v15 = vld [vmem:[%s4086_s25 + $0x32] sm:$0xff] }
 0x211   : > { %1629 = vmatmul.f32.gmra.mxu3 %v3693_v22 }
 0x213   : > { %v1388_v21 = vpop.f32.mrf.mxu2  ;;  %v4754_v63 = vpop.f32.mrf.mxu0 }
 0x214   : > { %v1472_v36 = vadd.f32 %v1388_v21, %v1277_v14  ;;  %v1582_v0 = vpop.f32.mrf.mxu3  ;;  %v3704_v14 = vld [vmem:[%s4086_s25 + $0x3a] sm:$0xff] }
 0x215   : > { %v3664_v21 = vld [vmem:[%s4086_s25 + $0x158] sm:$0xff] }
 0x216   : > { %v4763_v12 = vadd.f32 %v1582_v0, %v1472_v36  ;;  %1073 = vmatmul.f32.gmra.mxu0 %v3606_v41  ;;  %v3705_v0 = vld [vmem:[%s4086_s25 + $0x4a] sm:$0xff] }
 0x217   : > { %1267 = vmatmul.f32.gmra.mxu1 %v4758_v3 }
 0x218   : > { %1438 = vmatmul.f32.gmra.mxu2 %v3662_v5  ;;  %v3665_v5 = vld [vmem:[%s4086_s25 + $0x168] sm:$0xff] }
 0x219   : > { %1632 = vmatmul.f32.gmra.mxu3 %v3694_v32  ;;  %v3666_v32 = vld [vmem:[%s4086_s25 + $0x170] sm:$0xff] }
 0x21b   : > { %v1391_v27 = vpop.f32.mrf.mxu2  ;;  %v4767_v18 = vpop.f32.mrf.mxu0 }
 0x21c   : > { %v1473_v17 = vadd.f32 %v1391_v27, %v1278_v9  ;;  %v1585_v46 = vpop.f32.mrf.mxu3  ;;  %v3707_v27 = vld [vmem:[%s4086_s25 + $0x62] sm:$0xff] }
 0x21e   : > { %v4771_v35 = vadd.f32 %v1585_v46, %v1473_v17  ;;  %1757 = vmatmul.f32.vlgmr.msra.gmra.mxu0 %v3703_v15  ;;  %v2103_v15 = vld [vmem:[#allocation4 + $0x578] sm:$0xff]  ;;  %v3667_v17 = vld [vmem:[%s4086_s25 + $0x180] sm:$0xff]  ;;  %v3708_v46 = vld [vmem:[%s4086_s25 + $0x6a] sm:$0xff] }
 0x21f   : > { %2104 = vmatpush.msra.mxu1 %v2103_v15  ;;  %v3711_v15 = vld [vmem:[%s4086_s25 + $0x92] sm:$0xff] }
 0x220   : > { %1441 = vmatmul.f32.gmra.mxu2 %v3663_v23  ;;  %v2209_v23 = vld [vmem:[#allocation4 + $0x5f0] sm:$0xff] }
 0x221   : > { %1635 = vmatmul.f32.gmra.mxu3 %v4689_v55  ;;  %v3706_v55 = vld [vmem:[%s4086_s25 + $0x52] sm:$0xff] }
 0x223   : > { %v4774_v22 = vpop.f32.mrf.mxu0 }
 0x226   : > { %1760 = vmatmul.f32.gmra.mxu0 %v3704_v14 }
 0x228   : > { %1444 = vmatmul.f32.gmra.mxu2 %v3664_v21  ;;  %v3709_v21 = vld [vmem:[%s4086_s25 + $0x7a] sm:$0xff] }
 0x229   : > { %1638 = vmatmul.f32.gmra.mxu3 %v4702_v31  ;;  %v2210_v31 = vld [vmem:[#allocation4 + $0x5f8] sm:$0xff] }
 0x22a   : > { %2211 = vmatpush.msrb.mxu3 %v2210_v31  ;;  %v3702_v31 = vld [vmem:[%s4086_s25 + $0x1a1] sm:$0xff] }
 0x22b   : > { %v4779_v36 = vpop.f32.mrf.mxu0 }
 0x22c   : > { %2212 = vmatpush.msrb.mxu3 %v2209_v23  ;;  %v2075_v23 = vld [vmem:[#allocation4 + $0x4e0] sm:$0xff] }
 0x22e   : > { %1763 = vmatmul.f32.gmra.mxu0 %v3705_v0  ;;  %v2102_v0 = vld [vmem:[#allocation4 + $0x570] sm:$0xff] }
 0x22f   : > { %2105 = vmatpush.msra.mxu1 %v2102_v0 }
 0x230   : > { %1447 = vmatmul.f32.gmra.mxu2 %v3665_v5  ;;  %v3701_v5 = vld [vmem:[%s4086_s25 + $0x199] sm:$0xff] }
 0x231   : > { %1641 = vmatmul.f32.gmra.mxu3 %v4715_v44 }
 0x233   : > { %v4784_v30 = vpop.f32.mrf.mxu0 }
 0x236   : > { %1766 = vmatmul.f32.gmra.mxu0 %v3706_v55 }
 0x238   : > { %1450 = vmatmul.f32.gmra.mxu2 %v3666_v32  ;;  %v3710_v32 = vld [vmem:[%s4086_s25 + $0x82] sm:$0xff] }
 0x239   : > { %1644 = vmatmul.f32.gmra.mxu3 %v4728_v11  ;;  %v2077_v11 = vld [vmem:[#allocation4 + $0x4f0] sm:$0xff] }
 0x23a   : > { %2146 = vmatpush.msrb.mxu2 %v2077_v11  ;;  %v3712_v11 = vld [vmem:[%s4086_s25 + $0x9a] sm:$0xff] }
 0x23b   : > { %v4789_v9 = vpop.f32.mrf.mxu0 }
 0x23e   : > { %1769 = vmatmul.f32.gmra.mxu0 %v3707_v27 }
 0x240   : > { %1453 = vmatmul.f32.gmra.mxu2 %v3667_v17  ;;  %v2101_v17 = vld [vmem:[#allocation4 + $0x568] sm:$0xff] }
 0x241   : > { %1647 = vmatmul.f32.gmra.mxu3 %v4741_v1  ;;  %v3669_v1 = vld [vmem:[%s4086_s25 + $0x198] sm:$0xff]  ;;  %2106 = vmatpush.msra.mxu1 %v2101_v17 }
 0x242   : > { %v2099_v17 = vld [vmem:[#allocation4 + $0x558] sm:$0xff] }
 0x243   : > { %v4794_v44 = vpop.f32.mrf.mxu0 }
 0x244   : > { %5660 = vst [vmem:[#allocation17_spill] sm:$0xff] %v4794_v44  ;;  %v5674_v44 = vld [vmem:[#allocation27_spill] sm:$0xff] }
 0x246   : > { %1772 = vmatmul.f32.gmra.mxu0 %v3708_v46 }
 0x248   : > { %1456 = vmatmul.f32.gmra.mxu2 %v4495_v53  ;;  %v2076_v53 = vld [vmem:[#allocation4 + $0x4e8] sm:$0xff] }
 0x249   : > { %1650 = vmatmul.f32.gmra.mxu3 %v3606_v41  ;;  %v2208_v41 = vld [vmem:[#allocation4 + $0x5e8] sm:$0xff]  ;;  %2147 = vmatpush.msrb.mxu2 %v2076_v53  ;;  %v2206_v53 = vld [vmem:[#allocation4 + $0x5d8] sm:$0xff] }
 0x24a   : > { %2213 = vmatpush.msrb.mxu3 %v2208_v41 }
 0x24b   : > { %v4798_v14 = vpop.f32.mrf.mxu0  ;;  %2148 = vmatpush.msrb.mxu2 %v2075_v23  ;;  %v3716_v23 = vld [vmem:[%s4086_s25 + $0xca] sm:$0xff] }
 0x24e   : > { %1775 = vmatmul.f32.gmra.mxu0 %v3709_v21  ;;  %v2207_v21 = vld [vmem:[#allocation4 + $0x5e0] sm:$0xff] }
 0x24f   : > { %2214 = vmatpush.msrb.mxu3 %v2207_v21  ;;  %v2073_v21 = vld [vmem:[#allocation4 + $0x4d0] sm:$0xff] }
 0x250   : > { %1459 = vmatmul.f32.gmra.mxu2 %v3669_v1  ;;  %v3713_v1 = vld [vmem:[%s4086_s25 + $0xaa] sm:$0xff] }
 0x251   : > { %1653 = vmatmul.f32.gmra.mxu3 %v3701_v5  ;;  %v2100_v5 = vld [vmem:[#allocation4 + $0x560] sm:$0xff] }
 0x252   : > { %2107 = vmatpush.msra.mxu1 %v2100_v5  ;;  %2215 = vmatpush.msrb.mxu3 %v2206_v53  ;;  %v2098_v5 = vld [vmem:[#allocation4 + $0x550] sm:$0xff]  ;;  %v2097_v53 = vld [vmem:[#allocation4 + $0x548] sm:$0xff] }
 0x253   : > { %v4803_v55 = vpop.f32.mrf.mxu0 }
 0x254   : > { %5661 = vst [vmem:[#allocation24_spill] sm:$0xff] %v4803_v55  ;;  %2108 = vmatpush.msra.mxu1 %v2099_v17  ;;  %v2094_v17 = vld [vmem:[#allocation4 + $0x530] sm:$0xff]  ;;  %v3726_v55 = vld [vmem:[%s4086_s25 + $0x142] sm:$0xff] }
 0x256   : > { %1778 = vmatmul.f32.gmra.mxu0 %v3710_v32  ;;  %2109 = vmatpush.msra.mxu1 %v2098_v5  ;;  %v2203_v5 = vld [vmem:[#allocation4 + $0x5c0] sm:$0xff] }
 0x258   : > { %1462 = vmatmul.f32.gmra.mxu2 %v3670_v52  ;;  %v3714_v52 = vld [vmem:[%s4086_s25 + $0xb2] sm:$0xff]  ;;  %2110 = vmatpush.msra.mxu1 %v2097_v53  ;;  %v2092_v53 = vld [vmem:[#allocation4 + $0x520] sm:$0xff] }
 0x259   : > { %1656 = vmatmul.f32.gmra.mxu3 %v3702_v31  ;;  %v2074_v31 = vld [vmem:[#allocation4 + $0x4d8] sm:$0xff] }
 0x25a   : > { %2149 = vmatpush.msrb.mxu2 %v2074_v31  ;;  %v3717_v31 = vld [vmem:[%s4086_s25 + $0xda] sm:$0xff]  ;;  %2111 = vmatpush.msra.mxu1 %v2096_v2 }
 0x25b   : > { %v4808_v27 = vpop.f32.mrf.mxu0  ;;  %v2070_v2 = vld [vmem:[#allocation4 + $0x4b8] sm:$0xff] }
 0x25c   : > { %5662 = vst [vmem:[#allocation18_spill] sm:$0xff] %v4808_v27  ;;  %2150 = vmatpush.msrb.mxu2 %v2073_v21  ;;  %v2204_v21 = vld [vmem:[#allocation4 + $0x5c8] sm:$0xff] }
 0x25e   : > { %1781 = vmatmul.f32.gmra.mxu0 %v3711_v15  ;;  %v3715_v15 = vld [vmem:[%s4086_s25 + $0xc2] sm:$0xff]  ;;  %2151 = vmatpush.msrb.mxu2 %v2072_v61  ;;  %v2069_v61 = vld [vmem:[#allocation4 + $0x4b0] sm:$0xff] }
 0x263   : > { %v4811_v46 = vpop.f32.mrf.mxu0 }
 0x264   : > { %5663 = vst [vmem:[#allocation20_spill] sm:$0xff] %v4811_v46 }
 0x266   : > { %1784 = vmatmul.f32.gmra.mxu0 %v3712_v11 }
 0x26b   : > { %v4814_v0 = vpop.f32.mrf.mxu0 }
 0x26c   : > { %5664 = vst [vmem:[#allocation21_spill] sm:$0xff] %v4814_v0 }
 0x26e   : > { %1787 = vmatmul.f32.gmra.mxu0 %v3713_v1  ;;  %v2205_v1 = vld [vmem:[#allocation4 + $0x5d0] sm:$0xff] }
 0x26f   : > { %2216 = vmatpush.msrb.mxu3 %v2205_v1  ;;  %v2093_v1 = vld [vmem:[#allocation4 + $0x528] sm:$0xff] }
 0x271   : > { %2217 = vmatpush.msrb.mxu3 %v2204_v21  ;;  %v3719_v21 = vld [vmem:[%s4086_s25 + $0xf2] sm:$0xff] }
 0x273   : > { %v4817_v32 = vpop.f32.mrf.mxu0  ;;  %2218 = vmatpush.msrb.mxu3 %v2203_v5  ;;  %v2200_v5 = vld [vmem:[#allocation4 + $0x5a8] sm:$0xff] }
 0x274   : > { %5665 = vst [vmem:[#allocation23_spill] sm:$0xff] %v4817_v32 }
 0x276   : > { %1790 = vmatmul.f32.gmra.mxu0 %v3714_v52 }
 0x27b   : > { %v4820_v41 = vpop.f32.mrf.mxu0 }
 0x27c   : > { %5666 = vst [vmem:[#allocation25_spill] sm:$0xff] %v4820_v41  ;;  %v4857_v41 = vld [vmem:[#allocation7] ss:$0 sm:$0xff] }
 0x27e   : > { %1793 = vmatmul.f32.gmra.mxu0 %v3715_v15  ;;  %v2095_v15 = vld [vmem:[#allocation4 + $0x538] sm:$0xff] }
 0x27f   : > { %2112 = vmatpush.msra.mxu1 %v2095_v15  ;;  %v2091_v15 = vld [vmem:[#allocation4 + $0x518] sm:$0xff] }
 0x281   : > { %2113 = vmatpush.msra.mxu1 %v2094_v17  ;;  %v2201_v17 = vld [vmem:[#allocation4 + $0x5b0] sm:$0xff] }
 0x283   : > { %v4823_v11 = vpop.f32.mrf.mxu0  ;;  %2114 = vmatpush.msra.mxu1 %v2093_v1  ;;  %v2068_v1 = vld [vmem:[#allocation4 + $0x4a8] sm:$0xff] }
 0x284   : > { %5667 = vst [vmem:[#allocation26_spill] sm:$0xff] %v4823_v11 }
 0x285   : > { %2115 = vmatpush.msra.mxu1 %v2092_v53  ;;  %v2089_v53 = vld [vmem:[#allocation4 + $0x508] sm:$0xff] }
 0x286   : > { %1796 = vmatmul.f32.gmra.mxu0 %v3716_v23  ;;  %v3718_v23 = vld [vmem:[%s4086_s25 + $0xe2] sm:$0xff] }
 0x287   : > { %2116 = vmatpush.msra.mxu1 %v2091_v15  ;;  %v2088_v15 = vld [vmem:[#allocation4 + $0x500] sm:$0xff] }
 0x28b   : > { %v4826_v52 = vpop.f32.mrf.mxu0 }
 0x28c   : > { %5668 = vst [vmem:[#allocation31_spill] sm:$0xff] %v4826_v52  ;;  %v2071_v52 = vld [vmem:[#allocation4 + $0x4c0] sm:$0xff] }
 0x28d   : > { %2152 = vmatpush.msrb.mxu2 %v2071_v52 }
 0x28e   : > { %1799 = vmatmul.f32.gmra.mxu0 %v3717_v31  ;;  %v2202_v31 = vld [vmem:[#allocation4 + $0x5b8] sm:$0xff] }
 0x28f   : > { %2153 = vmatpush.msrb.mxu2 %v2070_v2  ;;  %2219 = vmatpush.msrb.mxu3 %v2202_v31  ;;  %v2067_v2 = vld [vmem:[#allocation4 + $0x4a0] sm:$0xff] }
 0x290   : > { %v2199_v31 = vld [vmem:[#allocation4 + $0x5a0] sm:$0xff] }
 0x291   : > { %2154 = vmatpush.msrb.mxu2 %v2069_v61  ;;  %2220 = vmatpush.msrb.mxu3 %v2201_v17  ;;  %v2066_v61 = vld [vmem:[#allocation4 + $0x498] sm:$0xff] }
 0x292   : > { %v2198_v17 = vld [vmem:[#allocation4 + $0x598] sm:$0xff] }
 0x293   : > { %v4829_v11 = vpop.f32.mrf.mxu0  ;;  %2155 = vmatpush.msrb.mxu2 %v2068_v1  ;;  %2221 = vmatpush.msrb.mxu3 %v2200_v5  ;;  %v2065_v1 = vld [vmem:[#allocation4 + $0x490] sm:$0xff] }
 0x294   : > { %5669 = vst [vmem:[#allocation32_spill] sm:$0xff] %v4829_v11  ;;  %v5614_v11 = vmov 0.0   ;;  %v2197_v5 = vld [vmem:[#allocation4 + $0x590] sm:$0xff] }
 0x295   : > { %2025 = vst [vmem:[#allocation2] sm:$0xff] %v5614_v11  ;;  %2156 = vmatpush.msrb.mxu2 %v2067_v2  ;;  %2222 = vmatpush.msrb.mxu3 %v2199_v31  ;;  %v3720_v2 = vld [vmem:[%s4086_s25 + $0xfa] sm:$0xff]  ;;  %v2064_v31 = vld [vmem:[#allocation4 + $0x488] sm:$0xff] }
 0x296   : > { %1802 = vmatmul.f32.gmra.mxu0 %v3718_v23  ;;  %2026 = vst [vmem:[#allocation2 + $0x8] sm:$0x3] %v5614_v11  ;;  %v2090_v23 = vld [vmem:[#allocation4 + $0x510] sm:$0xff] }
 0x297   : > { %2027 = vst [vmem:[#allocation2 + $0x10] sm:$0xff] %v5614_v11  ;;  %2117 = vmatpush.msra.mxu1 %v2090_v23  ;;  %2157 = vmatpush.msrb.mxu2 %v2066_v61  ;;  %v4849_v61 = vpop.f32.mrf.mxu2 }
 0x298   : > { %2028 = vst [vmem:[#allocation2 + $0x18] sm:$0x3] %v5614_v11  ;;  %2223 = vmatpush.msrb.mxu3 %v2198_v17  ;;  %v2063_v17 = vld [vmem:[#allocation4 + $0x480] sm:$0xff] }
 0x299   : > { %2029 = vst [vmem:[#allocation2 + $0x20] sm:$0xff] %v5614_v11  ;;  %2118 = vmatpush.msra.mxu1 %v2089_v53  ;;  %2158 = vmatpush.msrb.mxu2 %v2065_v1 }
 0x29a   : > { %2030 = vst [vmem:[#allocation2 + $0x28] sm:$0x3] %v5614_v11  ;;  %2224 = vmatpush.msrb.mxu3 %v2197_v5  ;;  %v4854_v5 = vpop.f32.mrf.mxu3 }
 0x29b   : > { %v1758_v52 = vpop.f32.mrf.mxu0  ;;  %2031 = vst [vmem:[#allocation2 + $0x30] sm:$0xff] %v5614_v11  ;;  %2119 = vmatpush.msra.mxu1 %v2088_v15  ;;  %v2196_v15 = vld [vmem:[#allocation4 + $0x588] sm:$0xff]  ;;  %2159 = vmatpush.msrb.mxu2 %v2064_v31 }
 0x29c   : > { %2032 = vst [vmem:[#allocation2 + $0x38] sm:$0x3] %v5614_v11  ;;  %2225 = vmatpush.msrb.mxu3 %v2196_v15  ;;  %v1854_v39 = vadd.f32 %v1758_v52, %v4681_v28  ;;  %v3721_v31 = vld [vmem:[%s4086_s25 + $0x10a] sm:$0xff] }
 0x29d   : > { %v2079_v23 = vld [vmem:[#allocation2 + $0x1] sm:$0xff]  ;;  %2033 = vst [vmem:[#allocation2 + $0x40] sm:$0xff] %v5614_v11  ;;  %2160 = vmatpush.msrb.mxu2 %v2063_v17 }
 0x29e   : > { %1805 = vmatmul.f32.gmra.mxu0 %v3719_v21  ;;  %2034 = vst [vmem:[#allocation2 + $0x48] sm:$0x3] %v5614_v11  ;;  %v4843_v21 = vpop.f32.mrf.mxu1  ;;  %2120 = vmatmul.f32.vlgmr.msra.gmra.mxu1 %v2079_v23  ;;  %v2195_v23 = vld [vmem:[#allocation4 + $0x580] sm:$0xff]  ;;  %v1890_v15 = vadd.f32 %v4857_v41, %v1854_v39 }
 0x29f   : > { %2035 = vst [vmem:[#allocation2 + $0x50] sm:$0xff] %v5614_v11  ;;  %2226 = vmatpush.msrb.mxu3 %v2195_v23  ;;  %v2186_v1 = vld [vmem:[#allocation2 + $0x2] sm:$0xff]  ;;  %2161 = vmatmul.f32.vlgmr.msrb.gmra.mxu2 %v5614_v11  ;;  %v4872_v23 = vpop.f32.mrf.mxu2 }
 0x2a0   : > { %2036 = vst [vmem:[#allocation2 + $0x58] sm:$0x3] %v5614_v11  ;;  %2227 = vmatmul.f32.vlgmr.msrb.gmra.mxu3 %v2186_v1  ;;  %v1922_v1 = vmax.f32 %v1890_v15, 0.0 }
 0x2a1   : > { %2037 = vst [vmem:[#allocation2 + $0x60] sm:$0xff] %v5614_v11 }
 0x2a2   : > { %2038 = vst [vmem:[#allocation2 + $0x68] sm:$0x3] %v5614_v11  ;;  %v4875_v39 = vpop.f32.mrf.mxu3 }
 0x2a3   : > { %v1761_v53 = vpop.f32.mrf.mxu0  ;;  %2039 = vst [vmem:[#allocation2 + $0x70] sm:$0xff] %v5614_v11 }
 0x2a4   : > { %2040 = vst [vmem:[#allocation2 + $0x78] sm:$0x3] %v5614_v11  ;;  %v1855_v19 = vadd.f32 %v1761_v53, %v4694_v60 }
 0x2a5   : > { %2041 = vst [vmem:[#allocation2 + $0x80] sm:$0xff] %v5614_v11 }
 0x2a6   : > { %1808 = vmatmul.f32.gmra.mxu0 %v3720_v2  ;;  %2042 = vst [vmem:[#allocation2 + $0x88] sm:$0x3] %v5614_v11  ;;  %v4868_v52 = vpop.f32.mrf.mxu1  ;;  %v1891_v46 = vadd.f32 %v4857_v41, %v1855_v19 }
 0x2a7   : > { %2043 = vst [vmem:[#allocation2 + $0x90] sm:$0xff] %v5614_v11  ;;  %v4883_v53 = vpop.f32.mrf.mxu2 }
 0x2a8   : > { %2044 = vst [vmem:[#allocation2 + $0x98] sm:$0x3] %v5614_v11  ;;  %v1923_v15 = vmax.f32 %v1891_v46, 0.0 }
 0x2a9   : > { %2726 = vst [vmem:[#allocation2] sm:$0xff] %v5614_v11 }
 0x2aa   : > { %2727 = vst [vmem:[#allocation2 + $0x8] sm:$0x3] %v5614_v11  ;;  %v4886_v38 = vpop.f32.mrf.mxu3 }
 0x2ab   : > { %v1764_v2 = vpop.f32.mrf.mxu0 }
 0x2ac   : > { %v1856_v28 = vadd.f32 %v1764_v2, %v4707_v26  ;;  %v3722_v2 = vld [vmem:[%s4086_s25 + $0x112] sm:$0xff] }
 0x2ae   : > { %v1892_v17 = vadd.f32 %v4857_v41, %v1856_v28  ;;  %1811 = vmatmul.f32.gmra.mxu0 %v3721_v31  ;;  %v4881_v31 = vpop.f32.mrf.mxu1 }
 0x2af   : > { %v4890_v19 = vpop.f32.mrf.mxu2 }
 0x2b0   : > { %v1924_v32 = vmax.f32 %v1892_v17, 0.0 }
 0x2b2   : > { %v1954_v29 = vmax.f32 %v1922_v1, %v1924_v32  ;;  %v3723_v1 = vld [vmem:[%s4086_s25 + $0x122] sm:$0xff] }
 0x2b3   : > { %v1767_v26 = vpop.f32.mrf.mxu0 }
 0x2b4   : > { %1970 = vst [vmem:[#allocation3] sm:$0xff] %v1954_v29  ;;  %v1857_v11 = vadd.f32 %v1767_v26, %v4720_v48 }
 0x2b6   : > { %v1893_v28 = vadd.f32 %v4857_v41, %v1857_v11  ;;  %1814 = vmatmul.f32.gmra.mxu0 %v3722_v2  ;;  %v4888_v29 = vpop.f32.mrf.mxu1  ;;  %v3724_v2 = vld [vmem:[%s4086_s25 + $0x12a] sm:$0xff] }
 0x2b8   : > { %v1925_v60 = vmax.f32 %v1893_v28, 0.0  ;;  %v4897_v28 = vpop.f32.mrf.mxu3 }
 0x2ba   : > { %v1955_v32 = vmax.f32 %v1923_v15, %v1925_v60 }
 0x2bb   : > { %v1770_v17 = vpop.f32.mrf.mxu0 }
 0x2bc   : > { %1971 = vst [vmem:[#allocation3 + $0x8] sm:$0xff] %v1955_v32  ;;  %v1858_v15 = vadd.f32 %v1770_v17, %v4733_v33  ;;  %v5673_v33 = vmov 0.0  }
 0x2be   : > { %1817 = vmatmul.f32.gmra.mxu0 %v3723_v1  ;;  %v4900_v60 = vpop.f32.mrf.mxu1  ;;  %v3725_v1 = vld [vmem:[%s4086_s25 + $0x13a] sm:$0xff]  ;;  %v1894_v0 = vadd.f32 %v4857_v41, %v1858_v15 }
 0x2c0   : > { %v1926_v17 = vmax.f32 %v1894_v0, 0.0 }
 0x2c3   : > { %v1986_v48 = vld [vmem:[#allocation3] ss:$2 sm:$0xff]  ;;  %v2002_v11 = vld [vmem:[#allocation3 + $0x1] ss:$2 sm:$0xff]  ;;  %v1773_v26 = vpop.f32.mrf.mxu0 }
 0x2c4   : > { %v4893_v46 = vmax.f32 %v1986_v48, %v2002_v11  ;;  %v4905_v48 = vpop.f32.mrf.mxu2 }
 0x2c6   : > { %5670 = vst [vmem:[#allocation33_spill] sm:$0xff] %v4893_v46  ;;  %1820 = vmatmul.f32.gmra.mxu0 %v3724_v2  ;;  %2123 = vmatmul.f32.gmra.mxu1 %v4893_v46 }
 0x2c7   : > { %2046 = vst [vmem:[#allocation2 + $0x11] sm:$0xff] %v4893_v46 }
 0x2cb   : > { %v1776_v32 = vpop.f32.mrf.mxu0 }
 0x2cc   : > { %v1860_v4 = vadd.f32 %v1776_v32, %v4763_v12  ;;  %v1859_v12 = vadd.f32 %v1773_v26, %v4749_v13  ;;  %v4917_v32 = vpop.f32.mrf.mxu3  ;;  %v4925_v0 = vpop.f32.mrf.mxu2 }
 0x2ce   : > { %v4907_v11 = vld [vmem:[#allocation2 + $0x10] sm:$0xff]  ;;  %v1896_v46 = vadd.f32 %v4857_v41, %v1860_v4  ;;  %1823 = vmatmul.f32.gmra.mxu0 %v3725_v1  ;;  %v1895_v4 = vadd.f32 %v4857_v41, %v1859_v12 }
 0x2cf   : > { %5671 = vst [vmem:[#allocation34_spill] sm:$0xff] %v4907_v11  ;;  %v4909_v2 = vld [vmem:[#allocation2 + $0x12] sm:$0xff]  ;;  %2164 = vmatmul.f32.gmra.mxu2 %v4907_v11  ;;  %v4922_v11 = vpop.f32.mrf.mxu1 }
 0x2d0   : > { %5672 = vst [vmem:[#allocation35_spill] sm:$0xff] %v4909_v2  ;;  %2230 = vmatmul.f32.gmra.mxu3 %v4909_v2  ;;  %v1928_v15 = vmax.f32 %v1896_v46, 0.0  ;;  %v1927_v13 = vmax.f32 %v1895_v4, 0.0 }
 0x2d1   : > { %2728 = vst [vmem:[#allocation2 + $0x10] sm:$0xff] %v5673_v33 }
 0x2d2   : > { %2729 = vst [vmem:[#allocation2 + $0x18] sm:$0x3] %v5673_v33  ;;  %v1956_v27 = vmax.f32 %v1926_v17, %v1928_v15  ;;  %v3727_v15 = vld [vmem:[%s4086_s25 + $0x152] sm:$0xff] }
 0x2d3   : > { %v1779_v47 = vpop.f32.mrf.mxu0 }
 0x2d4   : > { %1972 = vst [vmem:[#allocation3 + $0x10] sm:$0xff] %v1956_v27  ;;  %v1861_v1 = vadd.f32 %v1779_v47, %v4771_v35  ;;  %v4927_v49 = vpop.f32.mrf.mxu3  ;;  %v1085_v27 = vadd.f32 %v4665_v42, %v5674_v44  ;;  %v4937_v12 = vpop.f32.mrf.mxu2  ;;  %v1086_v42 = vadd.f32 %v4676_v45, %v4424_v7  ;;  %v1088_v7 = vadd.f32 %v4699_v24, %v4452_v37 }
 0x2d6   : > { %v1897_v2 = vadd.f32 %v4857_v41, %v1861_v1  ;;  %1826 = vmatmul.f32.gmra.mxu0 %v3726_v55  ;;  %v1279_v35 = vadd.f32 %v4843_v21, %v1085_v27  ;;  %v1087_v55 = vadd.f32 %v4686_v10, %v4439_v54 }
 0x2d7   : > { %v4932_v47 = vpop.f32.mrf.mxu1 }
 0x2d8   : > { %v1929_v26 = vmax.f32 %v1897_v2, 0.0  ;;  %v1474_v2 = vadd.f32 %v4849_v61, %v1279_v35  ;;  %v1281_v44 = vadd.f32 %v4881_v31, %v1087_v55  ;;  %v1280_v61 = vadd.f32 %v4868_v52, %v1086_v42  ;;  %v3729_v35 = vld [vmem:[%s4086_s25 + $0x16a] sm:$0xff] }
 0x2d9   : > { %v1282_v55 = vadd.f32 %v4888_v29, %v1088_v7 }
 0x2da   : > { %v1957_v46 = vmax.f32 %v1927_v13, %v1929_v26  ;;  %v3728_v26 = vld [vmem:[%s4086_s25 + $0x15a] sm:$0xff]  ;;  %v1668_v54 = vadd.f32 %v4854_v5, %v1474_v2  ;;  %v1476_v10 = vadd.f32 %v4883_v53, %v1281_v44 }
 0x2db   : > { %v1782_v17 = vpop.f32.mrf.mxu0  ;;  %v1477_v24 = vadd.f32 %v4890_v19, %v1282_v55 }
 0x2dc   : > { %1973 = vst [vmem:[#allocation3 + $0x18] sm:$0xff] %v1957_v46  ;;  %v4946_v21 = vpop.f32.mrf.mxu3  ;;  %v1862_v45 = vadd.f32 %v1782_v17, %v1668_v54  ;;  %v1670_v27 = vadd.f32 %v4886_v38, %v1476_v10  ;;  %v4959_v5 = vpop.f32.mrf.mxu2  ;;  %v3730_v54 = vld [vmem:[%s4086_s25 + $0x172] sm:$0xff] }
 0x2de   : > { %1829 = vmatmul.f32.gmra.mxu0 %v3727_v15  ;;  %v1475_v15 = vadd.f32 %v4872_v23, %v1280_v61  ;;  %v1898_v2 = vadd.f32 %v4857_v41, %v1862_v45 }
 0x2df   : > { %v4955_v31 = vpop.f32.mrf.mxu1 }
 0x2e0   : > { %v1669_v37 = vadd.f32 %v4875_v39, %v1475_v15  ;;  %v1930_v29 = vmax.f32 %v1898_v2, 0.0  ;;  %v1671_v39 = vadd.f32 %v4897_v28, %v1477_v24 }
 0x2e3   : > { %v1988_v4 = vld [vmem:[#allocation3 + $0x10] ss:$2 sm:$0xff]  ;;  %v2004_v1 = vld [vmem:[#allocation3 + $0x11] ss:$2 sm:$0xff]  ;;  %v1785_v13 = vpop.f32.mrf.mxu0 }
 0x2e4   : > { %v4944_v46 = vmax.f32 %v1988_v4, %v2004_v1  ;;  %v4973_v23 = vpop.f32.mrf.mxu3  ;;  %v1863_v17 = vadd.f32 %v1785_v13, %v1669_v37  ;;  %v4982_v7 = vpop.f32.mrf.mxu2  ;;  %v1091_v37 = vadd.f32 %v4738_v57, %v4491_v20 }
 0x2e6   : > { %2047 = vst [vmem:[#allocation2 + $0x21] sm:$0xff] %v4944_v46  ;;  %1832 = vmatmul.f32.gmra.mxu0 %v3728_v26  ;;  %2126 = vmatmul.f32.gmra.mxu1 %v4944_v46  ;;  %v1899_v10 = vadd.f32 %v4857_v41, %v1863_v17 }
 0x2e7   : > { %v4978_v19 = vpop.f32.mrf.mxu1 }
 0x2e8   : > { %v1931_v15 = vmax.f32 %v1899_v10, 0.0 }
 0x2eb   : > { %v1788_v53 = vpop.f32.mrf.mxu0 }
 0x2ec   : > { %v1864_v4 = vadd.f32 %v1788_v53, %v1670_v27  ;;  %v4985_v13 = vpop.f32.mrf.mxu3  ;;  %v4992_v2 = vpop.f32.mrf.mxu2 }
 0x2ed   : > { %v4964_v52 = vld [vmem:[#allocation2 + $0x20] sm:$0xff] }
 0x2ee   : > { %v4966_v1 = vld [vmem:[#allocation2 + $0x22] sm:$0xff]  ;;  %v1900_v38 = vadd.f32 %v4857_v41, %v1864_v4  ;;  %1835 = vmatmul.f32.gmra.mxu0 %v3729_v35  ;;  %2167 = vmatmul.f32.gmra.mxu2 %v4964_v52  ;;  %v1089_v35 = vadd.f32 %v4712_v58, %v4465_v25  ;;  %v1090_v25 = vadd.f32 %v4725_v16, %v4478_v51 }
 0x2ef   : > { %2730 = vst [vmem:[#allocation2 + $0x20] sm:$0xff] %v5673_v33  ;;  %2233 = vmatmul.f32.gmra.mxu3 %v4966_v1  ;;  %v4989_v55 = vpop.f32.mrf.mxu1  ;;  %v1285_v58 = vadd.f32 %v4932_v47, %v1091_v37  ;;  %v1092_v51 = vadd.f32 %v4754_v63, %v4504_v8 }
 0x2f0   : > { %2731 = vst [vmem:[#allocation2 + $0x28] sm:$0x3] %v5673_v33  ;;  %v1932_v26 = vmax.f32 %v1900_v38, 0.0  ;;  %v1283_v4 = vadd.f32 %v4900_v60, %v1089_v35  ;;  %v1284_v57 = vadd.f32 %v4922_v11, %v1090_v25 }
 0x2f2   : > { %v1958_v42 = vmax.f32 %v1930_v29, %v1932_v26  ;;  %v1478_v24 = vadd.f32 %v4905_v48, %v1283_v4  ;;  %v1479_v47 = vadd.f32 %v4925_v0, %v1284_v57  ;;  %v1095_v57 = vadd.f32 %v4779_v36, %v4531_v50 }
 0x2f3   : > { %v1791_v44 = vpop.f32.mrf.mxu0 }
 0x2f4   : > { %1974 = vst [vmem:[#allocation3 + $0x20] sm:$0xff] %v1958_v42  ;;  %v1865_v61 = vadd.f32 %v1791_v44, %v1671_v39  ;;  %v4998_v38 = vpop.f32.mrf.mxu3  ;;  %v1672_v60 = vadd.f32 %v4917_v32, %v1478_v24  ;;  %v1480_v39 = vadd.f32 %v4937_v12, %v1285_v58  ;;  %v1424_v48 = vpop.f32.mrf.mxu2  ;;  %v3733_v12 = vld [vmem:[%s4086_s25 + $0x19a] sm:$0xff]  ;;  %v1286_v44 = vadd.f32 %v4955_v31, %v1092_v51 }
 0x2f5   : > { %v1673_v8 = vadd.f32 %v4927_v49, %v1479_v47 }
 0x2f6   : > { %v1901_v45 = vadd.f32 %v4857_v41, %v1865_v61  ;;  %1838 = vmatmul.f32.gmra.mxu0 %v3730_v54  ;;  %v1674_v32 = vadd.f32 %v4946_v21, %v1480_v39  ;;  %v1481_v63 = vadd.f32 %v4959_v5, %v1286_v44 }
 0x2f7   : > { %v1229_v20 = vpop.f32.mrf.mxu1 }
 0x2f8   : > { %v1933_v27 = vmax.f32 %v1901_v45, 0.0  ;;  %v1675_v49 = vadd.f32 %v4973_v23, %v1481_v63  ;;  %v1093_v23 = vadd.f32 %v4767_v18, %v4513_v43  ;;  %v1289_v44 = vadd.f32 %v1229_v20, %v1095_v57 }
 0x2f9   : > { %v1099_v57 = vadd.f32 %v4798_v14, %v4567_v6  ;;  %v2358_v6 = vld [vmem:[#allocation4 + $0x6f8] sm:$0xff] }
 0x2fa   : > { %v1959_v53 = vmax.f32 %v1931_v15, %v1933_v27  ;;  %v1287_v39 = vadd.f32 %v4978_v19, %v1093_v23  ;;  %v1484_v19 = vadd.f32 %v1424_v48, %v1289_v44  ;;  %v1097_v23 = vadd.f32 %v4789_v9, %v4549_v59  ;;  %v5675_v44 = vld [vmem:[#allocation17_spill] sm:$0xff]  ;;  %v2432_v14 = vld [vmem:[#allocation4 + $0x778] sm:$0xff]  ;;  %2359 = vmatpush.msra.mxu2 %v2358_v6 }
 0x2fb   : > { %v1794_v28 = vpop.f32.mrf.mxu0  ;;  %2433 = vmatpush.msra.mxu3 %v2432_v14  ;;  %v2351_v6 = vld [vmem:[#allocation4 + $0x6c0] sm:$0xff] }
 0x2fc   : > { %1975 = vst [vmem:[#allocation3 + $0x28] sm:$0xff] %v1959_v53  ;;  %v1866_v16 = vadd.f32 %v1794_v28, %v1672_v60  ;;  %v1618_v10 = vpop.f32.mrf.mxu3  ;;  %v1427_v53 = vpop.f32.mrf.mxu2  ;;  %v3734_v28 = vld [vmem:[%s4086_s25 + $0x1a2] sm:$0xff] }
 0x2fd   : > { %v1678_v20 = vadd.f32 %v1618_v10, %v1484_v19 }
 0x2fe   : > { %1841 = vmatmul.f32.gmra.mxu0 %v4744_v56 }
 0x2ff   : > { %v1232_v15 = vpop.f32.mrf.mxu1 }
 0x303   : > { %v1990_v29 = vld [vmem:[#allocation3 + $0x20] ss:$2 sm:$0xff]  ;;  %v2006_v17 = vld [vmem:[#allocation3 + $0x21] ss:$2 sm:$0xff]  ;;  %v1797_v26 = vpop.f32.mrf.mxu0 }
 0x304   : > { %v5003_v56 = vmax.f32 %v1990_v29, %v2006_v17  ;;  %v1867_v31 = vadd.f32 %v1797_v26, %v1673_v8  ;;  %v1621_v24 = vpop.f32.mrf.mxu3  ;;  %v1430_v60 = vpop.f32.mrf.mxu2 }
 0x306   : > { %2048 = vst [vmem:[#allocation2 + $0x31] sm:$0xff] %v5003_v56  ;;  %1844 = vmatmul.f32.gmra.mxu0 %v4758_v3  ;;  %2129 = vmatmul.f32.gmra.mxu1 %v5003_v56  ;;  %v1902_v3 = vadd.f32 %v4857_v41, %v1866_v16  ;;  %v1903_v35 = vadd.f32 %v4857_v41, %v1867_v31 }
 0x307   : > { %v1235_v26 = vpop.f32.mrf.mxu1  ;;  %v1482_v16 = vadd.f32 %v4982_v7, %v1287_v39  ;;  %v1096_v7 = vadd.f32 %v4784_v30, %v4540_v62 }
 0x308   : > { %v1934_v21 = vmax.f32 %v1902_v3, 0.0  ;;  %v1935_v29 = vmax.f32 %v1903_v35, 0.0  ;;  %v1291_v39 = vadd.f32 %v1235_v26, %v1097_v23 }
 0x309   : > { %v1676_v18 = vadd.f32 %v4985_v13, %v1482_v16  ;;  %v1290_v13 = vadd.f32 %v1232_v15, %v1096_v7  ;;  %v2357_v7 = vld [vmem:[#allocation4 + $0x6f0] sm:$0xff] }
 0x30a   : > { %v1486_v16 = vadd.f32 %v1430_v60, %v1291_v39  ;;  %v2284_v60 = vld [vmem:[#allocation4 + $0x678] sm:$0xff]  ;;  %2360 = vmatpush.msra.mxu2 %v2357_v7 }
 0x30b   : > { %v1800_v42 = vpop.f32.mrf.mxu0  ;;  %v1485_v31 = vadd.f32 %v1427_v53, %v1290_v13  ;;  %2285 = vmatpush.msrb.mxu1 %v2284_v60 }
 0x30c   : > { %v1868_v54 = vadd.f32 %v1800_v42, %v1674_v32  ;;  %v5038_v51 = vpop.f32.mrf.mxu3  ;;  %v5050_v50 = vpop.f32.mrf.mxu2 }
 0x30d   : > { %v5018_v61 = vld [vmem:[#allocation2 + $0x30] sm:$0xff]  ;;  %v1680_v9 = vadd.f32 %v5038_v51, %v1486_v16  ;;  %v2356_v51 = vld [vmem:[#allocation4 + $0x6e8] sm:$0xff] }
 0x30e   : > { %v5020_v11 = vld [vmem:[#allocation2 + $0x32] sm:$0xff]  ;;  %v1904_v0 = vadd.f32 %v4857_v41, %v1868_v54  ;;  %1847 = vmatmul.f32.gmra.mxu0 %v3733_v12  ;;  %2170 = vmatmul.f32.gmra.mxu2 %v5018_v61  ;;  %v1094_v12 = vadd.f32 %v4774_v22, %v4522_v34 }
 0x30f   : > { %2732 = vst [vmem:[#allocation2 + $0x30] sm:$0xff] %v5673_v33  ;;  %2236 = vmatmul.f32.gmra.mxu3 %v5020_v11  ;;  %v5045_v43 = vpop.f32.mrf.mxu1  ;;  %2361 = vmatpush.msra.mxu2 %v2356_v51  ;;  %v2277_v51 = vld [vmem:[#allocation4 + $0x640] sm:$0xff] }
 0x310   : > { %2733 = vst [vmem:[#allocation2 + $0x38] sm:$0x3] %v5673_v33  ;;  %v1936_v45 = vmax.f32 %v1904_v0, 0.0  ;;  %v1288_v36 = vadd.f32 %v4989_v55, %v1094_v12 }
 0x312   : > { %v1960_v27 = vmax.f32 %v1934_v21, %v1936_v45  ;;  %v1483_v22 = vadd.f32 %v4992_v2, %v1288_v36 }
 0x313   : > { %v1803_v5 = vpop.f32.mrf.mxu0 }
 0x314   : > { %1976 = vst [vmem:[#allocation3 + $0x30] sm:$0xff] %v1960_v27  ;;  %v1869_v4 = vadd.f32 %v1803_v5, %v1675_v49  ;;  %v5056_v54 = vpop.f32.mrf.mxu3  ;;  %v1677_v55 = vadd.f32 %v4998_v38, %v1483_v22  ;;  %v1436_v15 = vpop.f32.mrf.mxu2  ;;  %v1679_v49 = vadd.f32 %v1621_v24, %v1485_v31  ;;  %v2282_v31 = vld [vmem:[#allocation4 + $0x668] sm:$0xff] }
 0x316   : > { %v1905_v37 = vadd.f32 %v4857_v41, %v1869_v4  ;;  %1850 = vmatmul.f32.gmra.mxu0 %v3734_v28 }
 0x317   : > { %v1241_v30 = vpop.f32.mrf.mxu1 }
 0x318   : > { %v1937_v17 = vmax.f32 %v1905_v37, 0.0  ;;  %v1293_v19 = vadd.f32 %v1241_v30, %v1099_v57 }
 0x31a   : > { %v1961_v25 = vmax.f32 %v1935_v29, %v1937_v17  ;;  %v1488_v26 = vadd.f32 %v1436_v15, %v1293_v19  ;;  %v2279_v19 = vld [vmem:[#allocation4 + $0x650] sm:$0xff] }
 0x31b   : > { %v1806_v58 = vpop.f32.mrf.mxu0 }
 0x31c   : > { %1977 = vst [vmem:[#allocation3 + $0x38] sm:$0xff] %v1961_v25  ;;  %v1870_v34 = vadd.f32 %v1806_v58, %v1676_v18  ;;  %v1630_v28 = vpop.f32.mrf.mxu3  ;;  %v1439_v25 = vpop.f32.mrf.mxu2  ;;  %v1098_v18 = vadd.f32 %v5675_v44, %v4558_v40  ;;  %v2283_v40 = vld [vmem:[#allocation4 + $0x670] sm:$0xff] }
 0x31d   : > { %v1682_v30 = vadd.f32 %v1630_v28, %v1488_v26  ;;  %2286 = vmatpush.msrb.mxu1 %v2283_v40  ;;  %v2278_v26 = vld [vmem:[#allocation4 + $0x648] sm:$0xff] }
 0x31e   : > { %v1906_v48 = vadd.f32 %v4857_v41, %v1870_v34  ;;  %v2431_v34 = vld [vmem:[#allocation4 + $0x770] sm:$0xff]  ;;  %v1292_v22 = vadd.f32 %v5045_v43, %v1098_v18 }
 0x31f   : > { %v1244_v29 = vpop.f32.mrf.mxu1  ;;  %2434 = vmatpush.msra.mxu3 %v2431_v34  ;;  %2287 = vmatpush.msrb.mxu1 %v2282_v31  ;;  %v2427_v18 = vld [vmem:[#allocation4 + $0x750] sm:$0xff] }
 0x320   : > { %v1938_v2 = vmax.f32 %v1906_v48, 0.0  ;;  %v5680_v31 = vld [vmem:[#allocation30_spill] sm:$0xff] }
 0x323   : > { %v1992_v47 = vld [vmem:[#allocation3 + $0x30] ss:$2 sm:$0xff]  ;;  %v2008_v32 = vld [vmem:[#allocation3 + $0x31] ss:$2 sm:$0xff]  ;;  %v1809_v42 = vpop.f32.mrf.mxu0 }
 0x324   : > { %v5043_v3 = vmax.f32 %v1992_v47, %v2008_v32  ;;  %v1871_v10 = vadd.f32 %v1809_v42, %v1677_v55  ;;  %v5073_v24 = vpop.f32.mrf.mxu3  ;;  %v5083_v59 = vpop.f32.mrf.mxu2 }
 0x326   : > { %2049 = vst [vmem:[#allocation2 + $0x41] sm:$0xff] %v5043_v3  ;;  %2132 = vmatmul.f32.gmra.mxu1 %v5043_v3  ;;  %v1907_v38 = vadd.f32 %v4857_v41, %v1871_v10  ;;  %v2429_v10 = vld [vmem:[#allocation4 + $0x760] sm:$0xff] }
 0x327   : > { %v5077_v47 = vpop.f32.mrf.mxu1 }
 0x328   : > { %v1939_v4 = vmax.f32 %v1907_v38, 0.0 }
 0x32b   : > { %v1812_v8 = vpop.f32.mrf.mxu0 }
 0x32c   : > { %v1872_v63 = vadd.f32 %v1812_v8, %v1678_v20  ;;  %v5676_v20 = vld [vmem:[#allocation28_spill] sm:$0xff]  ;;  %v5091_v55 = vpop.f32.mrf.mxu3 }
 0x32d   : > { %v5059_v0 = vld [vmem:[#allocation2 + $0x40] sm:$0xff] }
 0x32e   : > { %v5061_v21 = vld [vmem:[#allocation2 + $0x42] sm:$0xff]  ;;  %v1908_v62 = vadd.f32 %v4857_v41, %v1872_v63  ;;  %2173 = vmatmul.f32.gmra.mxu2 %v5059_v0 }
 0x32f   : > { %2239 = vmatmul.f32.gmra.mxu3 %v5061_v21  ;;  %2734 = vst [vmem:[#allocation2 + $0x40] sm:$0xff] %v5673_v33  ;;  %v5677_v8 = vld [vmem:[#allocation24_spill] sm:$0xff]  ;;  %v2430_v63 = vld [vmem:[#allocation4 + $0x768] sm:$0xff]  ;;  %v5095_v38 = vpop.f32.mrf.mxu1 }
 0x330   : > { %2735 = vst [vmem:[#allocation2 + $0x48] sm:$0x3] %v5673_v33  ;;  %v1940_v45 = vmax.f32 %v1908_v62, 0.0  ;;  %v1100_v13 = vadd.f32 %v5677_v8, %v5676_v20  ;;  %v1487_v62 = vadd.f32 %v5050_v50, %v1292_v22  ;;  %2435 = vmatpush.msra.mxu3 %v2430_v63  ;;  %v2428_v50 = vld [vmem:[#allocation4 + $0x758] sm:$0xff]  ;;  %v5678_v20 = vld [vmem:[#allocation29_spill] sm:$0xff]  ;;  %v5679_v8 = vld [vmem:[#allocation18_spill] sm:$0xff] }
 0x332   : > { %v1962_v27 = vmax.f32 %v1938_v2, %v1940_v45  ;;  %v2355_v2 = vld [vmem:[#allocation4 + $0x6e0] sm:$0xff]  ;;  %v1294_v43 = vadd.f32 %v1244_v29, %v1100_v13  ;;  %2436 = vmatpush.msra.mxu3 %v2429_v10  ;;  %v1681_v28 = vadd.f32 %v5056_v54, %v1487_v62  ;;  %v2280_v29 = vld [vmem:[#allocation4 + $0x658] sm:$0xff]  ;;  %v1101_v13 = vadd.f32 %v5679_v8, %v5678_v20 }
 0x333   : > { %v1815_v5 = vpop.f32.mrf.mxu0  ;;  %2362 = vmatpush.msra.mxu2 %v2355_v2  ;;  %v5681_v62 = vld [vmem:[#allocation21_spill] sm:$0xff]  ;;  %v2276_v2 = vld [vmem:[#allocation4 + $0x638] sm:$0xff] }
 0x334   : > { %1978 = vst [vmem:[#allocation3 + $0x40] sm:$0xff] %v1962_v27  ;;  %v1873_v53 = vadd.f32 %v1815_v5, %v1679_v49  ;;  %v2281_v27 = vld [vmem:[#allocation4 + $0x660] sm:$0xff]  ;;  %v2354_v5 = vld [vmem:[#allocation4 + $0x6d8] sm:$0xff]  ;;  %2437 = vmatpush.msra.mxu3 %v2428_v50  ;;  %v5110_v16 = vpop.f32.mrf.mxu3  ;;  %v1295_v63 = vadd.f32 %v5077_v47, %v1101_v13  ;;  %v2274_v47 = vld [vmem:[#allocation4 + $0x628] sm:$0xff] }
 0x335   : > { %2288 = vmatpush.msrb.mxu1 %v2281_v27  ;;  %2363 = vmatpush.msra.mxu2 %v2354_v5  ;;  %v5682_v50 = vld [vmem:[#allocation19_spill] sm:$0xff]  ;;  %v2421_v20 = vld [vmem:[#allocation4 + $0x720] sm:$0xff] }
 0x336   : > { %v1909_v35 = vadd.f32 %v4857_v41, %v1873_v53  ;;  %2438 = vmatpush.msra.mxu3 %v2427_v18  ;;  %v2346_v8 = vld [vmem:[#allocation4 + $0x698] sm:$0xff] }
 0x337   : > { %2289 = vmatpush.msrb.mxu1 %v2280_v29 }
 0x338   : > { %v1941_v37 = vmax.f32 %v1909_v35, 0.0 }
 0x339   : > { %2290 = vmatpush.msrb.mxu1 %v2279_v19 }
 0x33a   : > { %v1963_v17 = vmax.f32 %v1939_v4, %v1941_v37  ;;  %v1489_v4 = vadd.f32 %v1439_v25, %v1294_v43  ;;  %v2275_v43 = vld [vmem:[#allocation4 + $0x630] sm:$0xff] }
 0x33b   : > { %v1818_v58 = vpop.f32.mrf.mxu0  ;;  %2291 = vmatpush.msrb.mxu1 %v2278_v26 }
 0x33c   : > { %1979 = vst [vmem:[#allocation3 + $0x48] sm:$0xff] %v1963_v17  ;;  %v1874_v48 = vadd.f32 %v1818_v58, %v1680_v9  ;;  %v2353_v17 = vld [vmem:[#allocation4 + $0x6d0] sm:$0xff]  ;;  %v5106_v58 = vpop.f32.mrf.mxu2  ;;  %v1683_v25 = vadd.f32 %v5073_v24, %v1489_v4  ;;  %v2352_v9 = vld [vmem:[#allocation4 + $0x6c8] sm:$0xff]  ;;  %v1253_v24 = vpop.f32.mrf.mxu1 }
 0x33d   : > { %2364 = vmatpush.msra.mxu2 %v2353_v17  ;;  %2292 = vmatpush.msrb.mxu1 %v2277_v51 }
 0x33e   : > { %v1910_v15 = vadd.f32 %v4857_v41, %v1874_v48  ;;  %v1642_v48 = vpop.f32.mrf.mxu3 }
 0x33f   : > { %2365 = vmatpush.msra.mxu2 %v2352_v9  ;;  %2293 = vmatpush.msrb.mxu1 %v2276_v2  ;;  %v2423_v9 = vld [vmem:[#allocation4 + $0x730] sm:$0xff] }
 0x340   : > { %v1942_v23 = vmax.f32 %v1910_v15, 0.0  ;;  %v2345_v2 = vld [vmem:[#allocation4 + $0x690] sm:$0xff] }
 0x341   : > { %2366 = vmatpush.msra.mxu2 %v2351_v6  ;;  %2294 = vmatpush.msrb.mxu1 %v2275_v43 }
 0x343   : > { %v1994_v32 = vld [vmem:[#allocation3 + $0x40] ss:$2 sm:$0xff]  ;;  %v2010_v42 = vld [vmem:[#allocation3 + $0x41] ss:$2 sm:$0xff]  ;;  %v1821_v12 = vpop.f32.mrf.mxu0  ;;  %2295 = vmatpush.msrb.mxu1 %v2274_v47 }
 0x344   : > { %v5081_v36 = vmax.f32 %v1994_v32, %v2010_v42  ;;  %v1875_v39 = vadd.f32 %v1821_v12, %v1681_v28  ;;  %v2426_v12 = vld [vmem:[#allocation4 + $0x748] sm:$0xff]  ;;  %v1448_v34 = vpop.f32.mrf.mxu2  ;;  %v1256_v10 = vpop.f32.mrf.mxu1  ;;  %v5683_v28 = vld [vmem:[#allocation20_spill] sm:$0xff] }
 0x345   : > { %2439 = vmatpush.msra.mxu3 %v2426_v12  ;;  %v1102_v4 = vadd.f32 %v5683_v28, %v5682_v50  ;;  %v2273_v12 = vld [vmem:[#allocation4 + $0x620] sm:$0xff]  ;;  %v2419_v28 = vld [vmem:[#allocation4 + $0x710] sm:$0xff] }
 0x346   : > { %2050 = vst [vmem:[#allocation2 + $0x51] sm:$0xff] %v5081_v36  ;;  %2135 = vmatmul.f32.gmra.mxu1 %v5081_v36  ;;  %v1911_v42 = vadd.f32 %v4857_v41, %v1875_v39  ;;  %v2350_v39 = vld [vmem:[#allocation4 + $0x6b8] sm:$0xff] }
 0x347   : > { %2367 = vmatpush.msra.mxu2 %v2350_v39  ;;  %2296 = vmatpush.msrb.mxu1 %v2273_v12  ;;  %v2417_v39 = vld [vmem:[#allocation4 + $0x700] sm:$0xff] }
 0x348   : > { %v1943_v60 = vmax.f32 %v1911_v42, 0.0  ;;  %v5684_v42 = vld [vmem:[#allocation22_spill] sm:$0xff] }
 0x34b   : > { %v1824_v45 = vpop.f32.mrf.mxu0 }
 0x34c   : > { %v1876_v49 = vadd.f32 %v1824_v45, %v1682_v30  ;;  %v1103_v30 = vadd.f32 %v5681_v62, %v5680_v31  ;;  %v1490_v45 = vadd.f32 %v5083_v59, %v1295_v63  ;;  %v1451_v15 = vpop.f32.mrf.mxu2  ;;  %v2425_v59 = vld [vmem:[#allocation4 + $0x740] sm:$0xff] }
 0x34d   : > { %v5097_v53 = vld [vmem:[#allocation2 + $0x50] sm:$0xff]  ;;  %2440 = vmatpush.msra.mxu3 %v2425_v59 }
 0x34e   : > { %v5099_v35 = vld [vmem:[#allocation2 + $0x52] sm:$0xff]  ;;  %v1912_v37 = vadd.f32 %v4857_v41, %v1876_v49  ;;  %2176 = vmatmul.f32.gmra.mxu2 %v5097_v53  ;;  %v1684_v17 = vadd.f32 %v5091_v55, %v1490_v45  ;;  %v2348_v55 = vld [vmem:[#allocation4 + $0x6a8] sm:$0xff] }
 0x34f   : > { %2242 = vmatmul.f32.gmra.mxu3 %v5099_v35  ;;  %2736 = vst [vmem:[#allocation2 + $0x50] sm:$0xff] %v5673_v33 }
 0x350   : > { %2737 = vst [vmem:[#allocation2 + $0x58] sm:$0x3] %v5673_v33  ;;  %v1944_v54 = vmax.f32 %v1912_v37, 0.0  ;;  %v1297_v37 = vadd.f32 %v1253_v24, %v1103_v30  ;;  %v2347_v24 = vld [vmem:[#allocation4 + $0x6a0] sm:$0xff]  ;;  %v2420_v30 = vld [vmem:[#allocation4 + $0x718] sm:$0xff] }
 0x352   : > { %v1964_v57 = vmax.f32 %v1942_v23, %v1944_v54  ;;  %v1492_v23 = vadd.f32 %v1448_v34, %v1297_v37  ;;  %v2424_v54 = vld [vmem:[#allocation4 + $0x738] sm:$0xff] }
 0x353   : > { %v1827_v32 = vpop.f32.mrf.mxu0  ;;  %2441 = vmatpush.msra.mxu3 %v2424_v54 }
 0x354   : > { %1980 = vst [vmem:[#allocation3 + $0x50] sm:$0xff] %v1964_v57  ;;  %v1877_v44 = vadd.f32 %v1827_v32, %v1683_v25  ;;  %v1645_v25 = vpop.f32.mrf.mxu3  ;;  %v2349_v57 = vld [vmem:[#allocation4 + $0x6b0] sm:$0xff]  ;;  %v1296_v32 = vadd.f32 %v5095_v38, %v1102_v4  ;;  %v1686_v6 = vadd.f32 %v1642_v48, %v1492_v23  ;;  %v1454_v13 = vpop.f32.mrf.mxu2  ;;  %v2343_v23 = vld [vmem:[#allocation4 + $0x680] sm:$0xff] }
 0x355   : > { %2368 = vmatpush.msra.mxu2 %v2349_v57  ;;  %2442 = vmatpush.msra.mxu3 %v2423_v9  ;;  %v2271_v48 = vld [vmem:[#allocation4 + $0x610] sm:$0xff] }
 0x356   : > { %v1913_v14 = vadd.f32 %v4857_v41, %v1877_v44  ;;  %v5685_v44 = vld [vmem:[#allocation23_spill] sm:$0xff]  ;;  %v1491_v26 = vadd.f32 %v5106_v58, %v1296_v32 }
 0x357   : > { %v1104_v18 = vadd.f32 %v5685_v44, %v5684_v42  ;;  %2369 = vmatpush.msra.mxu2 %v2348_v55 }
 0x358   : > { %v1945_v7 = vmax.f32 %v1913_v14, 0.0  ;;  %v2422_v14 = vld [vmem:[#allocation4 + $0x728] sm:$0xff]  ;;  %v1685_v63 = vadd.f32 %v5110_v16, %v1491_v26  ;;  %v5688_v26 = vld [vmem:[#allocation15_spill] sm:$0xff] }
 0x359   : > { %v1298_v38 = vadd.f32 %v1256_v10, %v1104_v18  ;;  %2443 = vmatpush.msra.mxu3 %v2422_v14  ;;  %2370 = vmatpush.msra.mxu2 %v2347_v24  ;;  %v2270_v10 = vld [vmem:[#allocation4 + $0x608] sm:$0xff] }
 0x35a   : > { %v1965_v40 = vmax.f32 %v1943_v60, %v1945_v7  ;;  %v2272_v60 = vld [vmem:[#allocation4 + $0x618] sm:$0xff]  ;;  %v5131_v7 = vpop.f32.mrf.mxu1  ;;  %v5686_v18 = vld [vmem:[#allocation13_spill] sm:$0xff] }
 0x35b   : > { %v1830_v22 = vpop.f32.mrf.mxu0  ;;  %2297 = vmatpush.msrb.mxu1 %v2272_v60  ;;  %v1493_v31 = vadd.f32 %v1451_v15, %v1298_v38  ;;  %2444 = vmatpush.msra.mxu3 %v2421_v20  ;;  %v2269_v15 = vld [vmem:[#allocation4 + $0x600] sm:$0xff] }
 0x35c   : > { %1981 = vst [vmem:[#allocation3 + $0x58] sm:$0xff] %v1965_v40  ;;  %v1878_v19 = vadd.f32 %v1830_v22, %v1684_v17  ;;  %2371 = vmatpush.msra.mxu2 %v2346_v8  ;;  %v1648_v16 = vpop.f32.mrf.mxu3  ;;  %v2344_v17 = vld [vmem:[#allocation4 + $0x688] sm:$0xff]  ;;  %v1457_v54 = vpop.f32.mrf.mxu2 }
 0x35d   : > { %2298 = vmatpush.msrb.mxu1 %v2271_v48  ;;  %2445 = vmatpush.msra.mxu3 %v2420_v30  ;;  %v2655_v30 = vld [vmem:[#allocation4 + $0x8f8] sm:$0xff] }
 0x35e   : > { %v1914_v40 = vadd.f32 %v4857_v41, %v1878_v19  ;;  %2372 = vmatpush.msra.mxu2 %v2345_v2  ;;  %v5687_v19 = vld [vmem:[#allocation25_spill] sm:$0xff]  ;;  %v2580_v2 = vld [vmem:[#allocation4 + $0x870] sm:$0xff] }
 0x35f   : > { %2299 = vmatpush.msrb.mxu1 %v2270_v10  ;;  %2446 = vmatpush.msra.mxu3 %v2419_v28  ;;  %v1105_v9 = vadd.f32 %v5687_v19, %v5686_v18  ;;  %v2654_v10 = vld [vmem:[#allocation4 + $0x8f0] sm:$0xff]  ;;  %v2653_v28 = vld [vmem:[#allocation4 + $0x8e8] sm:$0xff]  ;;  %v2504_v18 = vld [vmem:[#allocation4 + $0x7e0] sm:$0xff] }
 0x360   : > { %v1946_v45 = vmax.f32 %v1914_v40, 0.0  ;;  %2373 = vmatpush.msra.mxu2 %v2344_v17  ;;  %v5690_v40 = vld [vmem:[#allocation14_spill] sm:$0xff]  ;;  %v2577_v19 = vld [vmem:[#allocation4 + $0x858] sm:$0xff] }
 0x361   : > { %2300 = vmatpush.msrb.mxu1 %v2269_v15  ;;  %v1299_v12 = vadd.f32 %v5131_v7, %v1105_v9  ;;  %v2581_v7 = vld [vmem:[#allocation4 + $0x878] sm:$0xff] }
 0x362   : > { %2374 = vmatpush.msra.mxu2 %v2343_v23  ;;  %v5693_v15 = vld [vmem:[#allocation32_spill] sm:$0xff] }
 0x363   : > { %v1996_v49 = vld [vmem:[#allocation3 + $0x50] ss:$2 sm:$0xff]  ;;  %v2012_v27 = vld [vmem:[#allocation3 + $0x51] ss:$2 sm:$0xff]  ;;  %v1833_v5 = vpop.f32.mrf.mxu0  ;;  %v1494_v24 = vadd.f32 %v1454_v13, %v1299_v12  ;;  %v2578_v23 = vld [vmem:[#allocation4 + $0x860] sm:$0xff] }
 0x364   : > { %v5122_v29 = vmax.f32 %v1996_v49, %v2012_v27  ;;  %v1879_v43 = vadd.f32 %v1833_v5, %v1685_v63  ;;  %v1687_v27 = vadd.f32 %v1645_v25, %v1493_v31  ;;  %v1262_v5 = vpop.f32.mrf.mxu1  ;;  %v1651_v42 = vpop.f32.mrf.mxu3  ;;  %v2507_v13 = vld [vmem:[#allocation4 + $0x7f8] sm:$0xff]  ;;  %2582 = vmatpush.msrb.mxu2 %v2581_v7 }
 0x365   : > { %v1688_v31 = vadd.f32 %v1648_v16, %v1494_v24  ;;  %2508 = vmatpush.msra.mxu1 %v2507_v13  ;;  %v2579_v16 = vld [vmem:[#allocation4 + $0x868] sm:$0xff] }
 0x366   : > { %2051 = vst [vmem:[#allocation2 + $0x61] sm:$0xff] %v5122_v29  ;;  %2138 = vmatmul.f32.gmra.mxu1 %v5122_v29  ;;  %v1915_v37 = vadd.f32 %v4857_v41, %v1879_v43  ;;  %2583 = vmatpush.msrb.mxu2 %v2580_v2 }
 0x368   : > { %v1947_v25 = vmax.f32 %v1915_v37, 0.0  ;;  %2584 = vmatpush.msrb.mxu2 %v2579_v16  ;;  %v2647_v16 = vld [vmem:[#allocation4 + $0x8b8] sm:$0xff] }
 0x36a   : > { %2585 = vmatpush.msrb.mxu2 %v2578_v23 }
 0x36b   : > { %v1836_v34 = vpop.f32.mrf.mxu0 }
 0x36c   : > { %v1880_v22 = vadd.f32 %v1836_v34, %v1686_v6  ;;  %v1265_v55 = vpop.f32.mrf.mxu1  ;;  %v5689_v6 = vld [vmem:[#allocation31_spill] sm:$0xff]  ;;  %v1654_v63 = vpop.f32.mrf.mxu3  ;;  %2586 = vmatpush.msrb.mxu2 %v2577_v19 }
 0x36d   : > { %v5134_v51 = vld [vmem:[#allocation2 + $0x60] sm:$0xff]  ;;  %v1107_v14 = vadd.f32 %v5689_v6, %v5688_v26 }
 0x36e   : > { %v5136_v58 = vld [vmem:[#allocation2 + $0x62] sm:$0xff]  ;;  %v1916_v62 = vadd.f32 %v4857_v41, %v1880_v22  ;;  %2179 = vmatmul.f32.gmra.mxu2 %v5134_v51  ;;  %v5691_v22 = vld [vmem:[#allocation26_spill] sm:$0xff] }
 0x36f   : > { %2245 = vmatmul.f32.gmra.mxu3 %v5136_v58  ;;  %2738 = vst [vmem:[#allocation2 + $0x60] sm:$0xff] %v5673_v33  ;;  %v1106_v20 = vadd.f32 %v5691_v22, %v5690_v40  ;;  %v1301_v8 = vadd.f32 %v1265_v55, %v1107_v14  ;;  %v2576_v14 = vld [vmem:[#allocation4 + $0x850] sm:$0xff] }
 0x370   : > { %2739 = vst [vmem:[#allocation2 + $0x68] sm:$0x3] %v5673_v33  ;;  %v1948_v49 = vmax.f32 %v1916_v62, 0.0  ;;  %v2418_v33 = vld [vmem:[#allocation4 + $0x708] sm:$0xff]  ;;  %v2650_v40 = vld [vmem:[#allocation4 + $0x8d0] sm:$0xff]  ;;  %2587 = vmatpush.msrb.mxu2 %v2576_v14  ;;  %v2495_v14 = vld [vmem:[#allocation4 + $0x798] sm:$0xff] }
 0x371   : > { %2447 = vmatpush.msra.mxu3 %v2418_v33  ;;  %v1300_v43 = vadd.f32 %v1262_v5, %v1106_v20  ;;  %v2983_v22 = vld [vmem:[#allocation4 + $0xaf0] sm:$0xff] }
 0x372   : > { %v1966_v50 = vmax.f32 %v1946_v45, %v1948_v49  ;;  %v2506_v45 = vld [vmem:[#allocation4 + $0x7f0] sm:$0xff]  ;;  %v5692_v49 = vld [vmem:[#allocation16_spill] sm:$0xff] }
 0x373   : > { %v1839_v4 = vpop.f32.mrf.mxu0  ;;  %2448 = vmatpush.msra.mxu3 %v2417_v39  ;;  %v1495_v17 = vadd.f32 %v1457_v54, %v1300_v43  ;;  %2509 = vmatpush.msra.mxu1 %v2506_v45  ;;  %v2651_v54 = vld [vmem:[#allocation4 + $0x8d8] sm:$0xff]  ;;  %v2648_v45 = vld [vmem:[#allocation4 + $0x8c0] sm:$0xff]  ;;  %v2501_v43 = vld [vmem:[#allocation4 + $0x7c8] sm:$0xff] }
 0x374   : > { %1982 = vst [vmem:[#allocation3 + $0x60] sm:$0xff] %v1966_v50  ;;  %v1881_v47 = vadd.f32 %v1839_v4, %v1687_v27  ;;  %v1108_v27 = vadd.f32 %v5693_v15, %v5692_v49  ;;  %v2984_v4 = vld [vmem:[#allocation4 + $0xaf8] sm:$0xff]  ;;  %v1268_v37 = vpop.f32.mrf.mxu1  ;;  %v1657_v24 = vpop.f32.mrf.mxu3  ;;  %v5695_v15 = vld [vmem:[#allocation33_spill] sm:$0xff] }
 0x375   : > { %2656 = vmatpush.msrb.mxu3 %v2655_v30  ;;  %2985 = vmatpush.msrb.mxu0 %v2984_v4  ;;  %v1689_v12 = vadd.f32 %v1651_v42, %v1495_v17  ;;  %v2572_v4 = vld [vmem:[#allocation4 + $0x830] sm:$0xff] }
 0x376   : > { %v1917_v59 = vadd.f32 %v4857_v41, %v1881_v47  ;;  %v1460_v41 = vpop.f32.mrf.mxu2  ;;  %v2505_v47 = vld [vmem:[#allocation4 + $0x7e8] sm:$0xff]  ;;  %v2646_v17 = vld [vmem:[#allocation4 + $0x8b0] sm:$0xff] }
 0x377   : > { %v1496_v62 = vadd.f32 %v1460_v41, %v1301_v8  ;;  %2657 = vmatpush.msrb.mxu3 %v2654_v10  ;;  %2510 = vmatpush.msra.mxu1 %v2505_v47  ;;  %v5167_v41 = vld [vmem:[#allocation2 + $0x80] sm:$0xff] }
 0x378   : > { %v1949_v57 = vmax.f32 %v1917_v59, 0.0  ;;  %v2652_v59 = vld [vmem:[#allocation4 + $0x8e0] sm:$0xff]  ;;  %2986 = vmatpush.msrb.mxu0 %v2983_v22 }
 0x379   : > { %v1690_v33 = vadd.f32 %v1654_v63, %v1496_v62  ;;  %2658 = vmatpush.msrb.mxu3 %v2653_v28  ;;  %2511 = vmatpush.msra.mxu1 %v2504_v18  ;;  %v2575_v63 = vld [vmem:[#allocation4 + $0x848] sm:$0xff]  ;;  %v2500_v28 = vld [vmem:[#allocation4 + $0x7c0] sm:$0xff] }
 0x37a   : > { %v1967_v32 = vmax.f32 %v1947_v25, %v1949_v57  ;;  %v1302_v25 = vadd.f32 %v1268_v37, %v1108_v27  ;;  %v3844_v57 = vld [vmem:[#allocation7] ss:$0 sm:$0xff]  ;;  %v2649_v62 = vld [vmem:[#allocation4 + $0x8c8] sm:$0xff]  ;;  %2588 = vmatpush.msrb.mxu2 %v2575_v63  ;;  %v5696_v27 = vld [vmem:[#allocation35_spill] sm:$0xff] }
 0x37b   : > { %v1842_v44 = vpop.f32.mrf.mxu0  ;;  %2659 = vmatpush.msrb.mxu3 %v2652_v59  ;;  %v2498_v59 = vld [vmem:[#allocation4 + $0x7b0] sm:$0xff]  ;;  %v2981_v63 = vld [vmem:[#allocation4 + $0xae0] sm:$0xff] }
 0x37c   : > { %1983 = vst [vmem:[#allocation3 + $0x68] sm:$0xff] %v1967_v32  ;;  %v1882_v50 = vadd.f32 %v1842_v44, %v1688_v31  ;;  %v2502_v31 = vld [vmem:[#allocation4 + $0x7d0] sm:$0xff] }
 0x37d   : > { %2660 = vmatpush.msrb.mxu3 %v2651_v54 }
 0x37e   : > { %v1463_v39 = vpop.f32.mrf.mxu2  ;;  %v1918_v32 = vadd.f32 %v3844_v57, %v1882_v50  ;;  %v2573_v50 = vld [vmem:[#allocation4 + $0x838] sm:$0xff] }
 0x37f   : > { %v1497_v26 = vadd.f32 %v1463_v39, %v1302_v25  ;;  %2661 = vmatpush.msrb.mxu3 %v2650_v40  ;;  %v2571_v39 = vld [vmem:[#allocation4 + $0x828] sm:$0xff] }
 0x380   : > { %v1950_v42 = vmax.f32 %v1918_v32, 0.0  ;;  %v2982_v25 = vld [vmem:[#allocation4 + $0xae8] sm:$0xff]  ;;  %v2570_v32 = vld [vmem:[#allocation4 + $0x820] sm:$0xff] }
 0x381   : > { %v1691_v7 = vadd.f32 %v1657_v24, %v1497_v26  ;;  %2662 = vmatpush.msrb.mxu3 %v2649_v62  ;;  %2987 = vmatpush.msrb.mxu0 %v2982_v25  ;;  %v2569_v26 = vld [vmem:[#allocation4 + $0x818] sm:$0xff]  ;;  %v2568_v24 = vld [vmem:[#allocation4 + $0x810] sm:$0xff]  ;;  %v2566_v62 = vld [vmem:[#allocation4 + $0x800] sm:$0xff] }
 0x382   : > { %v2778_v25 = vld [vmem:[#allocation4 + $0x978] sm:$0xff] }
 0x383   : > { %v1998_v60 = vld [vmem:[#allocation3 + $0x60] ss:$2 sm:$0xff]  ;;  %v2014_v34 = vld [vmem:[#allocation3 + $0x61] ss:$2 sm:$0xff]  ;;  %v5151_v38 = vpop.f32.mrf.mxu0  ;;  %2663 = vmatpush.msrb.mxu3 %v2648_v45  ;;  %2988 = vmatpush.msrb.mxu0 %v2981_v63  ;;  %v5214_v45 = vpop.f32.mrf.mxu3 }
 0x384   : > { %v5155_v48 = vmax.f32 %v1998_v60, %v2014_v34  ;;  %v5694_v60 = vld [vmem:[#allocation34_spill] sm:$0xff]  ;;  %v2503_v34 = vld [vmem:[#allocation4 + $0x7d8] sm:$0xff]  ;;  %v1883_v20 = vadd.f32 %v5151_v38, %v1689_v12  ;;  %v2574_v38 = vld [vmem:[#allocation4 + $0x840] sm:$0xff] }
 0x385   : > { %2512 = vmatpush.msra.mxu1 %v2503_v34  ;;  %2589 = vmatpush.msrb.mxu2 %v2574_v38  ;;  %v2496_v12 = vld [vmem:[#allocation4 + $0x7a0] sm:$0xff]  ;;  %v2494_v34 = vld [vmem:[#allocation4 + $0x790] sm:$0xff]  ;;  %v2772_v63 = vld [vmem:[#allocation4 + $0x948] sm:$0xff] }
 0x386   : > { %2052 = vst [vmem:[#allocation2 + $0x71] sm:$0xff] %v5155_v48  ;;  %2141 = vmatmul.f32.gmra.mxu1 %v5155_v48  ;;  %v1919_v2 = vadd.f32 %v3844_v57, %v1883_v20  ;;  %2664 = vmatpush.msrb.mxu3 %v2647_v16  ;;  %v2567_v20 = vld [vmem:[#allocation4 + $0x808] sm:$0xff]  ;;  %v5212_v38 = vpop.f32.mrf.mxu2 }
 0x387   : > { %2513 = vmatpush.msra.mxu1 %v2502_v31  ;;  %2590 = vmatpush.msrb.mxu2 %v2573_v50  ;;  %v2492_v31 = vld [vmem:[#allocation4 + $0x780] sm:$0xff]  ;;  %v2976_v50 = vld [vmem:[#allocation4 + $0xab8] sm:$0xff] }
 0x388   : > { %v1951_v37 = vmax.f32 %v1919_v2, 0.0  ;;  %2665 = vmatpush.msrb.mxu3 %v2646_v17  ;;  %v2979_v2 = vld [vmem:[#allocation4 + $0xad0] sm:$0xff] }
 0x389   : > { %2514 = vmatpush.msra.mxu1 %v2501_v43  ;;  %2591 = vmatpush.msrb.mxu2 %v2572_v4  ;;  %v2975_v17 = vld [vmem:[#allocation4 + $0xab0] sm:$0xff] }
 0x38b   : > { %v1848_v5 = vpop.f32.mrf.mxu0  ;;  %2515 = vmatpush.msra.mxu1 %v2500_v28  ;;  %2592 = vmatpush.msrb.mxu2 %v2571_v39  ;;  %v2802_v28 = vld [vmem:[#allocation4 + $0x9f0] sm:$0xff]  ;;  %v2799_v39 = vld [vmem:[#allocation4 + $0x9d8] sm:$0xff] }
 0x38c   : > { %v1884_v44 = vadd.f32 %v1848_v5, %v1690_v33  ;;  %v2499_v33 = vld [vmem:[#allocation4 + $0x7b8] sm:$0xff]  ;;  %v2645_v5 = vld [vmem:[#allocation4 + $0x8a8] sm:$0xff] }
 0x38d   : > { %v5161_v9 = vld [vmem:[#allocation2 + $0x70] sm:$0xff]  ;;  %2516 = vmatpush.msra.mxu1 %v2499_v33  ;;  %2666 = vmatpush.msrb.mxu3 %v2645_v5 }
 0x38e   : > { %v5163_v55 = vld [vmem:[#allocation2 + $0x72] sm:$0xff]  ;;  %v1920_v6 = vadd.f32 %v3844_v57, %v1884_v44  ;;  %2182 = vmatmul.f32.gmra.mxu2 %v5161_v9  ;;  %2301 = vmatmul.f32.vlgmr.msrb.gmra.mxu1 %v5694_v60  ;;  %v2644_v44 = vld [vmem:[#allocation4 + $0x8a0] sm:$0xff] }
 0x38f   : > { %2248 = vmatmul.f32.gmra.mxu3 %v5163_v55  ;;  %2740 = vst [vmem:[#allocation2 + $0x70] sm:$0xff] %v5167_v41  ;;  %2517 = vmatpush.msra.mxu1 %v2498_v59  ;;  %v2642_v60 = vld [vmem:[#allocation4 + $0x890] sm:$0xff] }
 0x390   : > { %2741 = vst [vmem:[#allocation2 + $0x78] sm:$0x3] %v5167_v41  ;;  %v1952_v8 = vmax.f32 %v1920_v6, 0.0  ;;  %2593 = vmatpush.msrb.mxu2 %v2570_v32  ;;  %2667 = vmatpush.msrb.mxu3 %v2644_v44  ;;  %v2643_v6 = vld [vmem:[#allocation4 + $0x898] sm:$0xff]  ;;  %v2798_v5 = vld [vmem:[#allocation4 + $0x9d0] sm:$0xff] }
 0x391   : > { %v2910_v32 = vld [vmem:[#allocation4 + $0xa78] sm:$0xff] }
 0x392   : > { %v1968_v30 = vmax.f32 %v1950_v42, %v1952_v8  ;;  %2594 = vmatpush.msrb.mxu2 %v2569_v26  ;;  %2668 = vmatpush.msrb.mxu3 %v2643_v6  ;;  %v2493_v42 = vld [vmem:[#allocation4 + $0x788] sm:$0xff]  ;;  %v2796_v6 = vld [vmem:[#allocation4 + $0x9c0] sm:$0xff] }
 0x393   : > { %v1851_v13 = vpop.f32.mrf.mxu0  ;;  %v2641_v8 = vld [vmem:[#allocation4 + $0x888] sm:$0xff] }
 0x394   : > { %1984 = vst [vmem:[#allocation3 + $0x70] sm:$0xff] %v1968_v30  ;;  %v1885_v10 = vadd.f32 %v1851_v13, %v1691_v7  ;;  %2595 = vmatpush.msrb.mxu2 %v2568_v24  ;;  %2669 = vmatpush.msrb.mxu3 %v2642_v60  ;;  %v2640_v7 = vld [vmem:[#allocation4 + $0x880] sm:$0xff]  ;;  %v2980_v30 = vld [vmem:[#allocation4 + $0xad8] sm:$0xff]  ;;  %v5203_v13 = vpop.f32.mrf.mxu1  ;;  %v2797_v26 = vld [vmem:[#allocation4 + $0x9c8] sm:$0xff] }
 0x395   : > { %2989 = vmatpush.msrb.mxu0 %v2980_v30  ;;  %v2775_v24 = vld [vmem:[#allocation4 + $0x960] sm:$0xff]  ;;  %v2908_v60 = vld [vmem:[#allocation4 + $0xa68] sm:$0xff]  ;;  %v2794_v30 = vld [vmem:[#allocation4 + $0x9b0] sm:$0xff] }
 0x396   : > { %v1921_v49 = vadd.f32 %v3844_v57, %v1885_v10  ;;  %2375 = vmatmul.f32.vlgmr.msra.gmra.mxu2 %v5695_v15  ;;  %2304 = vmatmul.f32.gmra.mxu1 %v4964_v52  ;;  %v2497_v57 = vld [vmem:[#allocation4 + $0x7a8] sm:$0xff]  ;;  %v2638_v15 = vld [vmem:[#allocation2 + $0x92] sm:$0xff] }
 0x397   : > { %2449 = vmatmul.f32.vlgmr.msra.gmra.mxu3 %v5696_v27  ;;  %2518 = vmatpush.msra.mxu1 %v2497_v57  ;;  %v2977_v27 = vld [vmem:[#allocation4 + $0xac0] sm:$0xff]  ;;  %v2777_v57 = vld [vmem:[#allocation4 + $0x970] sm:$0xff] }
 0x398   : > { %v1953_v47 = vmax.f32 %v1921_v49, 0.0  ;;  %2596 = vmatpush.msrb.mxu2 %v2567_v20  ;;  %2670 = vmatpush.msrb.mxu3 %v2641_v8  ;;  %v5222_v49 = vpop.f32.mrf.mxu2 }
 0x399   : > { %2519 = vmatpush.msra.mxu1 %v2496_v12  ;;  %2990 = vmatpush.msrb.mxu0 %v2979_v2  ;;  %v2771_v2 = vld [vmem:[#allocation4 + $0x940] sm:$0xff] }
 0x39a   : > { %v1969_v23 = vmax.f32 %v1951_v37, %v1953_v47  ;;  %2597 = vmatpush.msrb.mxu2 %v2566_v62  ;;  %2671 = vmatpush.msrb.mxu3 %v2640_v7  ;;  %v2801_v37 = vld [vmem:[#allocation4 + $0x9e8] sm:$0xff]  ;;  %v2800_v47 = vld [vmem:[#allocation4 + $0x9e0] sm:$0xff]  ;;  %v2795_v7 = vld [vmem:[#allocation4 + $0x9b8] sm:$0xff] }
 0x39b   : > { %2520 = vmatpush.msra.mxu1 %v2495_v14  ;;  %v2974_v14 = vld [vmem:[#allocation4 + $0xaa8] sm:$0xff] }
 0x39c   : > { %1985 = vst [vmem:[#allocation3 + $0x78] sm:$0xff] %v1969_v23  ;;  %v5208_v10 = vpop.f32.mrf.mxu1  ;;  %2845 = vmatpush.msra.mxu2 %v2778_v25  ;;  %2911 = vmatpush.msra.mxu3 %v2910_v32  ;;  %v2973_v25 = vld [vmem:[#allocation4 + $0xaa0] sm:$0xff]  ;;  %v2900_v32 = vld [vmem:[#allocation4 + $0xa28] sm:$0xff] }
 0x39d   : > { %2521 = vmatpush.msra.mxu1 %v2494_v34  ;;  %v2774_v34 = vld [vmem:[#allocation4 + $0x958] sm:$0xff] }
 0x39e   : > { %2378 = vmatmul.f32.gmra.mxu2 %v4944_v46  ;;  %2307 = vmatmul.f32.gmra.mxu1 %v5018_v61 }
 0x39f   : > { %2452 = vmatmul.f32.gmra.mxu3 %v4966_v1  ;;  %2522 = vmatpush.msra.mxu1 %v2493_v42  ;;  %v2906_v42 = vld [vmem:[#allocation4 + $0xa58] sm:$0xff] }
 0x3a0   : > { %2846 = vmatpush.msra.mxu2 %v2777_v57  ;;  %v2767_v57 = vld [vmem:[#allocation4 + $0x920] sm:$0xff] }
 0x3a1   : > { %2523 = vmatpush.msra.mxu1 %v2492_v31  ;;  %v2905_v31 = vld [vmem:[#allocation4 + $0xa50] sm:$0xff] }
 0x3a3   : > { %v2000_v18 = vld [vmem:[#allocation3 + $0x70] ss:$2 sm:$0xff]  ;;  %v2016_v19 = vld [vmem:[#allocation3 + $0x71] ss:$2 sm:$0xff] }
 0x3a4   : > { %v5179_v54 = vmax.f32 %v2000_v18, %v2016_v19  ;;  %v5217_v43 = vpop.f32.mrf.mxu1  ;;  %v2776_v19 = vld [vmem:[#allocation4 + $0x968] sm:$0xff] }
 0x3a5   : > { %2847 = vmatpush.msra.mxu2 %v2776_v19  ;;  %v2766_v19 = vld [vmem:[#allocation4 + $0x918] sm:$0xff] }
 0x3a6   : > { %2053 = vst [vmem:[#allocation2 + $0x81] sm:$0xff] %v5179_v54  ;;  %2381 = vmatmul.f32.gmra.mxu2 %v5003_v56  ;;  %2310 = vmatmul.f32.gmra.mxu1 %v5059_v0 }
 0x3a7   : > { %2455 = vmatmul.f32.gmra.mxu3 %v5020_v11  ;;  %2848 = vmatpush.msra.mxu2 %v2775_v24 }
 0x3a9   : > { %2849 = vmatpush.msra.mxu2 %v2774_v34  ;;  %v2897_v34 = vld [vmem:[#allocation4 + $0xa10] sm:$0xff] }
 0x3ad   : > { %v5185_v40 = vld [vmem:[#allocation2 + $0x80] sm:$0xff] }
 0x3ae   : > { %v5187_v22 = vld [vmem:[#allocation2 + $0x82] sm:$0xff]  ;;  %2384 = vmatmul.f32.gmra.mxu2 %v5043_v3  ;;  %2313 = vmatmul.f32.gmra.mxu1 %v5097_v53 }
 0x3af   : > { %2458 = vmatmul.f32.gmra.mxu3 %v5061_v21  ;;  %2742 = vst [vmem:[#allocation2 + $0x80] sm:$0xff] %v5167_v41 }
 0x3b0   : > { %2743 = vst [vmem:[#allocation2 + $0x88] sm:$0x3] %v5167_v41 }
 0x3b6   : > { %2387 = vmatmul.f32.gmra.mxu2 %v5081_v36  ;;  %2316 = vmatmul.f32.gmra.mxu1 %v5134_v51 }
 0x3b7   : > { %2461 = vmatmul.f32.gmra.mxu3 %v5099_v35 }
 0x3be   : > { %2390 = vmatmul.f32.gmra.mxu2 %v5122_v29  ;;  %2319 = vmatmul.f32.gmra.mxu1 %v5161_v9 }
 0x3bf   : > { %2464 = vmatmul.f32.gmra.mxu3 %v5136_v58 }
 0x3c6   : > { %2393 = vmatmul.f32.gmra.mxu2 %v5155_v48  ;;  %2322 = vmatmul.f32.gmra.mxu1 %v5185_v40 }
 0x3c7   : > { %2467 = vmatmul.f32.gmra.mxu3 %v5163_v55 }
 0x3ce   : > { %2396 = vmatmul.f32.gmra.mxu2 %v5179_v54  ;;  %2524 = vmatmul.f32.vlgmr.msra.gmra.mxu1 %v4964_v52  ;;  %v2978_v52 = vld [vmem:[#allocation4 + $0xac8] sm:$0xff] }
 0x3cf   : > { %2470 = vmatmul.f32.gmra.mxu3 %v5187_v22  ;;  %2991 = vmatpush.msrb.mxu0 %v2978_v52  ;;  %v2904_v52 = vld [vmem:[#allocation4 + $0xa48] sm:$0xff] }
 0x3d1   : > { %2992 = vmatpush.msrb.mxu0 %v2977_v27  ;;  %v2769_v27 = vld [vmem:[#allocation4 + $0x930] sm:$0xff] }
 0x3d3   : > { %2993 = vmatpush.msrb.mxu0 %v2976_v50  ;;  %v2902_v50 = vld [vmem:[#allocation4 + $0xa38] sm:$0xff] }
 0x3d5   : > { %2994 = vmatpush.msrb.mxu0 %v2975_v17 }
 0x3d6   : > { %2598 = vmatmul.f32.vlgmr.msrb.gmra.mxu2 %v4944_v46  ;;  %2527 = vmatmul.f32.gmra.mxu1 %v5018_v61  ;;  %v5224_v46 = vpop.f32.mrf.mxu3  ;;  %v5231_v61 = vpop.f32.mrf.mxu2 }
 0x3d7   : > { %2672 = vmatmul.f32.vlgmr.msrb.gmra.mxu3 %v4966_v1  ;;  %v5226_v1 = vpop.f32.mrf.mxu1  ;;  %2995 = vmatpush.msrb.mxu0 %v2974_v14 }
 0x3d9   : > { %2996 = vmatpush.msrb.mxu0 %v2973_v25  ;;  %v2970_v25 = vld [vmem:[#allocation4 + $0xa88] sm:$0xff] }
 0x3de   : > { %2601 = vmatmul.f32.gmra.mxu2 %v5003_v56  ;;  %2530 = vmatmul.f32.gmra.mxu1 %v5059_v0  ;;  %v5233_v56 = vpop.f32.mrf.mxu3  ;;  %v2564_v0 = vld [vmem:[#allocation2 + $0x91] sm:$0xff] }
 0x3df   : > { %2675 = vmatmul.f32.gmra.mxu3 %v5020_v11  ;;  %v5235_v11 = vpop.f32.mrf.mxu1  ;;  %2744 = vst [vmem:[#allocation2 + $0x90] sm:$0xff] %v5167_v41 }
 0x3e0   : > { %2745 = vst [vmem:[#allocation2 + $0x98] sm:$0x3] %v5167_v41 }
 0x3e6   : > { %2604 = vmatmul.f32.gmra.mxu2 %v5043_v3  ;;  %2533 = vmatmul.f32.gmra.mxu1 %v5097_v53  ;;  %v5242_v3 = vpop.f32.mrf.mxu2 }
 0x3e7   : > { %2678 = vmatmul.f32.gmra.mxu3 %v5061_v21  ;;  %v5244_v21 = vpop.f32.mrf.mxu3  ;;  %v5246_v53 = vpop.f32.mrf.mxu1 }
 0x3ee   : > { %2607 = vmatmul.f32.gmra.mxu2 %v5081_v36  ;;  %2536 = vmatmul.f32.gmra.mxu1 %v5134_v51  ;;  %v5251_v36 = vpop.f32.mrf.mxu2 }
 0x3ef   : > { %2681 = vmatmul.f32.gmra.mxu3 %v5099_v35  ;;  %v5253_v35 = vpop.f32.mrf.mxu3  ;;  %v5255_v51 = vpop.f32.mrf.mxu1 }
 0x3f6   : > { %2610 = vmatmul.f32.gmra.mxu2 %v5122_v29  ;;  %2539 = vmatmul.f32.gmra.mxu1 %v5161_v9  ;;  %v5260_v16 = vpop.f32.mrf.mxu2  ;;  %v2803_v9 = vld [vmem:[#allocation4 + $0x9f8] sm:$0xff] }
 0x3f7   : > { %2684 = vmatmul.f32.gmra.mxu3 %v5136_v58  ;;  %v5262_v29 = vpop.f32.mrf.mxu3  ;;  %2804 = vmatpush.msrb.mxu1 %v2803_v9 }
 0x3f9   : > { %2805 = vmatpush.msrb.mxu1 %v2802_v28 }
 0x3fb   : > { %2806 = vmatpush.msrb.mxu1 %v2801_v37  ;;  %v2768_v37 = vld [vmem:[#allocation4 + $0x928] sm:$0xff] }
 0x3fd   : > { %2807 = vmatpush.msrb.mxu1 %v2800_v47  ;;  %v2901_v47 = vld [vmem:[#allocation4 + $0xa30] sm:$0xff] }
 0x3fe   : > { %2613 = vmatmul.f32.gmra.mxu2 %v5155_v48  ;;  %2542 = vmatmul.f32.gmra.mxu1 %v5185_v40  ;;  %v5269_v48 = vpop.f32.mrf.mxu2  ;;  %v2907_v40 = vld [vmem:[#allocation4 + $0xa60] sm:$0xff] }
 0x3ff   : > { %2687 = vmatmul.f32.gmra.mxu3 %v5163_v55  ;;  %v5271_v55 = vpop.f32.mrf.mxu3  ;;  %2808 = vmatpush.msrb.mxu1 %v2799_v39  ;;  %v2793_v39 = vld [vmem:[#allocation4 + $0x9a8] sm:$0xff] }
 0x401   : > { %2809 = vmatpush.msrb.mxu1 %v2798_v5  ;;  %v2792_v5 = vld [vmem:[#allocation4 + $0x9a0] sm:$0xff] }
 0x403   : > { %v5264_v58 = vpop.f32.mrf.mxu1  ;;  %2810 = vmatpush.msrb.mxu1 %v2797_v26  ;;  %v2765_v26 = vld [vmem:[#allocation4 + $0x910] sm:$0xff] }
 0x405   : > { %2811 = vmatpush.msrb.mxu1 %v2796_v6  ;;  %v2898_v6 = vld [vmem:[#allocation4 + $0xa18] sm:$0xff] }
 0x406   : > { %2616 = vmatmul.f32.gmra.mxu2 %v5179_v54  ;;  %2545 = vmatmul.f32.gmra.mxu1 %v5167_v41  ;;  %v2909_v54 = vld [vmem:[#allocation4 + $0xa70] sm:$0xff] }
 0x407   : > { %2690 = vmatmul.f32.gmra.mxu3 %v5187_v22  ;;  %v2773_v22 = vld [vmem:[#allocation4 + $0x950] sm:$0xff]  ;;  %2812 = vmatpush.msrb.mxu1 %v2795_v7  ;;  %v2895_v7 = vld [vmem:[#allocation4 + $0xa00] sm:$0xff] }
 0x408   : > { %2912 = vmatpush.msra.mxu3 %v2909_v54  ;;  %2850 = vmatpush.msra.mxu2 %v2773_v22  ;;  %v2899_v54 = vld [vmem:[#allocation4 + $0xa20] sm:$0xff]  ;;  %v2791_v22 = vld [vmem:[#allocation4 + $0x998] sm:$0xff] }
 0x409   : > { %2813 = vmatpush.msrb.mxu1 %v2794_v30  ;;  %v2886_v30 = vld [vmem:[#allocation2 + $0x2] sm:$0xff] }
 0x40a   : > { %2913 = vmatpush.msra.mxu3 %v2908_v60  ;;  %2851 = vmatpush.msra.mxu2 %v2772_v63  ;;  %v2764_v60 = vld [vmem:[#allocation4 + $0x908] sm:$0xff]  ;;  %v2763_v63 = vld [vmem:[#allocation4 + $0x900] sm:$0xff] }
 0x40b   : > { %v5273_v4 = vpop.f32.mrf.mxu1  ;;  %2814 = vmatpush.msrb.mxu1 %v2793_v39 }
 0x40c   : > { %2914 = vmatpush.msra.mxu3 %v2907_v40  ;;  %2852 = vmatpush.msra.mxu2 %v2771_v2  ;;  %v2789_v2 = vld [vmem:[#allocation4 + $0x988] sm:$0xff] }
 0x40d   : > { %2815 = vmatpush.msrb.mxu1 %v2792_v5  ;;  %v2971_v5 = vld [vmem:[#allocation4 + $0xa90] sm:$0xff] }
 0x40e   : > { %2619 = vmatmul.f32.gmra.mxu2 %v2564_v0  ;;  %2915 = vmatpush.msra.mxu3 %v2906_v42  ;;  %v2770_v0 = vld [vmem:[#allocation4 + $0x938] sm:$0xff]  ;;  %v2790_v42 = vld [vmem:[#allocation4 + $0x990] sm:$0xff] }
 0x40f   : > { %2693 = vmatmul.f32.gmra.mxu3 %v2638_v15  ;;  %v2903_v15 = vld [vmem:[#allocation4 + $0xa40] sm:$0xff]  ;;  %2853 = vmatpush.msra.mxu2 %v2770_v0 }
 0x410   : > { %2916 = vmatpush.msra.mxu3 %v2905_v31  ;;  %2816 = vmatpush.msrb.mxu1 %v2791_v22  ;;  %v2896_v31 = vld [vmem:[#allocation4 + $0xa08] sm:$0xff] }
 0x411   : > { %v5275_v33 = vpop.f32.mrf.mxu2  ;;  %2854 = vmatpush.msra.mxu2 %v2769_v27  ;;  %v2779_v27 = vld [vmem:[#allocation2 + $0x1] sm:$0xff] }
 0x412   : > { %v5277_v23 = vpop.f32.mrf.mxu3  ;;  %2917 = vmatpush.msra.mxu3 %v2904_v52  ;;  %2817 = vmatpush.msrb.mxu1 %v2790_v42 }
 0x413   : > { %v5279_v59 = vpop.f32.mrf.mxu1  ;;  %2855 = vmatpush.msra.mxu2 %v2768_v37 }
 0x414   : > { %2918 = vmatpush.msra.mxu3 %v2903_v15  ;;  %2818 = vmatpush.msrb.mxu1 %v2789_v2  ;;  %v2788_v15 = vld [vmem:[#allocation4 + $0x980] sm:$0xff] }
 0x415   : > { %2856 = vmatpush.msra.mxu2 %v2767_v57 }
 0x416   : > { %2919 = vmatpush.msra.mxu3 %v2902_v50  ;;  %2819 = vmatpush.msrb.mxu1 %v2788_v15 }
 0x417   : > { %2857 = vmatpush.msra.mxu2 %v2766_v19  ;;  %2820 = vmatmul.f32.vlgmr.msrb.gmra.mxu1 %v2779_v27  ;;  %v2163_v19 = vadd.f32 %v5212_v38, %v5203_v13  ;;  %v3056_v38 = vld [vmem:[#allocation4 + $0xb68] sm:$0xff] }
 0x418   : > { %2920 = vmatpush.msra.mxu3 %v2901_v47 }
 0x419   : > { %v5281_v44 = vpop.f32.mrf.mxu2  ;;  %2858 = vmatpush.msra.mxu2 %v2765_v26  ;;  %v3057_v26 = vld [vmem:[#allocation4 + $0xb70] sm:$0xff] }
 0x41a   : > { %v5283_v18 = vpop.f32.mrf.mxu3  ;;  %2921 = vmatpush.msra.mxu3 %v2900_v32 }
 0x41b   : > { %v5285_v12 = vpop.f32.mrf.mxu1  ;;  %2859 = vmatpush.msra.mxu2 %v2764_v60 }
 0x41c   : > { %2922 = vmatpush.msra.mxu3 %v2899_v54  ;;  %v3058_v54 = vld [vmem:[#allocation4 + $0xb78] sm:$0xff] }
 0x41d   : > { %2860 = vmatpush.msra.mxu2 %v2763_v63  ;;  %3059 = vmatpush.msra.mxu1 %v3058_v54 }
 0x41e   : > { %2923 = vmatpush.msra.mxu3 %v2898_v6  ;;  %2861 = vmatmul.f32.vlgmr.msra.gmra.mxu2 %v5167_v41  ;;  %v2972_v41 = vld [vmem:[#allocation4 + $0xa98] sm:$0xff]  ;;  %v2969_v6 = vld [vmem:[#allocation4 + $0xa80] sm:$0xff] }
 0x41f   : > { %2997 = vmatpush.msrb.mxu0 %v2972_v41  ;;  %3060 = vmatpush.msra.mxu1 %v3057_v26 }
 0x420   : > { %2924 = vmatpush.msra.mxu3 %v2897_v34  ;;  %v2252_v34 = vadd.f32 %v5214_v45, %v2163_v19  ;;  %v3053_v19 = vld [vmem:[#allocation4 + $0xb50] sm:$0xff] }
 0x421   : > { %v5287_v20 = vpop.f32.mrf.mxu2  ;;  %2998 = vmatpush.msrb.mxu0 %v2971_v5  ;;  %3061 = vmatpush.msra.mxu1 %v3056_v38  ;;  %v2169_v5 = vadd.f32 %v5231_v61, %v5217_v43  ;;  %v3132_v38 = vld [vmem:[#allocation4 + $0xbf8] sm:$0xff] }
 0x422   : > { %v5289_v8 = vpop.f32.mrf.mxu3  ;;  %2925 = vmatpush.msra.mxu3 %v2896_v31  ;;  %v2326_v22 = vadd.f32 %v5273_v4, %v2252_v34  ;;  %v2166_v31 = vadd.f32 %v5222_v49, %v5208_v10  ;;  %v2172_v34 = vadd.f32 %v5242_v3, %v5226_v1  ;;  %3133 = vmatpush.msrb.mxu2 %v3132_v38 }
 0x423   : > { %v5291_v62 = vpop.f32.mrf.mxu1  ;;  %2999 = vmatpush.msrb.mxu0 %v2970_v25  ;;  %v3054_v25 = vld [vmem:[#allocation4 + $0xb58] sm:$0xff] }
 0x424   : > { %2926 = vmatpush.msra.mxu3 %v2895_v7  ;;  %v2400_v13 = vadd.f32 %v5281_v44, %v2326_v22  ;;  %v3055_v7 = vld [vmem:[#allocation4 + $0xb60] sm:$0xff]  ;;  %v2253_v2 = vadd.f32 %v5224_v46, %v2166_v31 }
 0x425   : > { %2927 = vmatmul.f32.vlgmr.msra.gmra.mxu3 %v2886_v30  ;;  %3000 = vmatpush.msrb.mxu0 %v2969_v6  ;;  %v5339_v44 = vld [vmem:[#allocation7 + $0x1] ss:$0 sm:$0xff] }
 0x426   : > { %3062 = vmatpush.msra.mxu1 %v3055_v7  ;;  %v2474_v45 = vadd.f32 %v5283_v18, %v2400_v13  ;;  %v2327_v4 = vadd.f32 %v5279_v59, %v2253_v2  ;;  %v2254_v18 = vadd.f32 %v5233_v56, %v2169_v5  ;;  %v3052_v56 = vld [vmem:[#allocation4 + $0xb48] sm:$0xff]  ;;  %v3206_v7 = vld [vmem:[#allocation4 + $0xc78] sm:$0xff]  ;;  %v3205_v2 = vld [vmem:[#allocation4 + $0xc70] sm:$0xff] }
 0x427   : > { %3207 = vmatpush.msrb.mxu3 %v3206_v7  ;;  %v3201_v7 = vld [vmem:[#allocation4 + $0xc50] sm:$0xff] }
 0x428   : > { %v2401_v10 = vadd.f32 %v5287_v20, %v2327_v4  ;;  %3063 = vmatpush.msra.mxu1 %v3054_v25  ;;  %v2328_v6 = vadd.f32 %v5285_v12, %v2254_v18  ;;  %v3203_v18 = vld [vmem:[#allocation4 + $0xc60] sm:$0xff] }
 0x429   : > { %v5293_v9 = vpop.f32.mrf.mxu2  ;;  %3208 = vmatpush.msrb.mxu3 %v3205_v2  ;;  %v3200_v2 = vld [vmem:[#allocation4 + $0xc48] sm:$0xff] }
 0x42a   : > { %v5295_v28 = vpop.f32.mrf.mxu3  ;;  %3064 = vmatpush.msra.mxu1 %v3053_v19  ;;  %v2475_v59 = vadd.f32 %v5289_v8, %v2401_v10  ;;  %v2402_v22 = vadd.f32 %v5293_v9, %v2328_v6  ;;  %v3051_v8 = vld [vmem:[#allocation4 + $0xb40] sm:$0xff]  ;;  %v3131_v9 = vld [vmem:[#allocation4 + $0xbf0] sm:$0xff]  ;;  %v3050_v19 = vld [vmem:[#allocation4 + $0xb38] sm:$0xff] }
 0x42b   : > { %v5297_v17 = vpop.f32.mrf.mxu1  ;;  %3134 = vmatpush.msrb.mxu2 %v3131_v9  ;;  %v3278_v9 = vld [vmem:[#allocation4 + $0xce8] sm:$0xff] }
 0x42c   : > { %3065 = vmatpush.msra.mxu1 %v3052_v56  ;;  %v2476_v1 = vadd.f32 %v5295_v28, %v2402_v22  ;;  %v2175_v28 = vadd.f32 %v5251_v36, %v5235_v11  ;;  %v3280_v11 = vld [vmem:[#allocation4 + $0xcf8] sm:$0xff] }
 0x42d   : > { %v3202_v36 = vld [vmem:[#allocation4 + $0xc58] sm:$0xff]  ;;  %3281 = vmatpush.msra.mxu0 %v3280_v11  ;;  %v2181_v11 = vadd.f32 %v5269_v48, %v5255_v51  ;;  %v3274_v51 = vld [vmem:[#allocation4 + $0xcc8] sm:$0xff] }
 0x42e   : > { %3066 = vmatpush.msra.mxu1 %v3051_v8  ;;  %v3048_v8 = vld [vmem:[#allocation4 + $0xb28] sm:$0xff] }
 0x42f   : > { %v3196_v48 = vld [vmem:[#allocation4 + $0xc28] sm:$0xff] }
 0x430   : > { %3067 = vmatpush.msra.mxu1 %v3050_v19 }
 0x431   : > { %v5299_v14 = vpop.f32.mrf.mxu2 }
 0x432   : > { %v5301_v24 = vpop.f32.mrf.mxu3 }
 0x433   : > { %v5303_v40 = vpop.f32.mrf.mxu1 }
 0x439   : > { %v5306_v52 = vpop.f32.mrf.mxu2 }
 0x43a   : > { %v5308_v0 = vpop.f32.mrf.mxu3 }
 0x43b   : > { %v5310_v50 = vpop.f32.mrf.mxu1 }
 0x441   : > { %v5312_v37 = vpop.f32.mrf.mxu2 }
 0x442   : > { %v5314_v47 = vpop.f32.mrf.mxu3 }
 0x443   : > { %v5316_v39 = vpop.f32.mrf.mxu1 }
 0x449   : > { %v5318_v57 = vpop.f32.mrf.mxu2 }
 0x44a   : > { %v5320_v32 = vpop.f32.mrf.mxu3 }
 0x44b   : > { %v2525_v60 = vpop.f32.mrf.mxu1 }
 0x44c   : > { %v2549_v15 = vadd.f32 %v2525_v60, %v2474_v45 }
 0x451   : > { %v5326_v42 = vpop.f32.mrf.mxu2 }
 0x452   : > { %v5328_v63 = vpop.f32.mrf.mxu3 }
 0x453   : > { %v2528_v30 = vpop.f32.mrf.mxu1 }
 0x454   : > { %v2550_v61 = vadd.f32 %v2528_v30, %v2475_v59  ;;  %v2255_v30 = vadd.f32 %v5244_v21, %v2172_v34  ;;  %v3204_v21 = vld [vmem:[#allocation4 + $0xc68] sm:$0xff]  ;;  %v3279_v34 = vld [vmem:[#allocation4 + $0xcf0] sm:$0xff] }
 0x455   : > { %3209 = vmatpush.msrb.mxu3 %v3204_v21  ;;  %3282 = vmatpush.msra.mxu0 %v3279_v34  ;;  %v3276_v21 = vld [vmem:[#allocation4 + $0xcd8] sm:$0xff]  ;;  %v3043_v34 = vld [vmem:[#allocation4 + $0xb00] sm:$0xff] }
 0x456   : > { %v2329_v45 = vadd.f32 %v5291_v62, %v2255_v30  ;;  %v2178_v30 = vadd.f32 %v5260_v16, %v5246_v53  ;;  %v3125_v53 = vld [vmem:[#allocation4 + $0xbc0] sm:$0xff] }
 0x457   : > { %3210 = vmatpush.msrb.mxu3 %v3203_v18  ;;  %v3277_v16 = vld [vmem:[#allocation4 + $0xce0] sm:$0xff]  ;;  %3283 = vmatpush.msra.mxu0 %v3278_v9  ;;  %v2184_v9 = vadd.f32 %v5275_v33, %v5264_v58  ;;  %v3271_v58 = vld [vmem:[#allocation4 + $0xcb0] sm:$0xff] }
 0x458   : > { %v2403_v25 = vadd.f32 %v5299_v14, %v2329_v45  ;;  %v2256_v14 = vadd.f32 %v5253_v35, %v2175_v28  ;;  %v3046_v45 = vld [vmem:[#allocation4 + $0xb18] sm:$0xff]  ;;  %v3045_v28 = vld [vmem:[#allocation4 + $0xb10] sm:$0xff] }
 0x459   : > { %v2599_v27 = vpop.f32.mrf.mxu2  ;;  %3211 = vmatpush.msrb.mxu3 %v3202_v36  ;;  %3284 = vmatpush.msra.mxu0 %v3277_v16  ;;  %v3119_v16 = vld [vmem:[#allocation4 + $0xb90] sm:$0xff] }
 0x45a   : > { %v2673_v41 = vpop.f32.mrf.mxu3  ;;  %v2623_v49 = vadd.f32 %v2599_v27, %v2549_v15  ;;  %v3130_v27 = vld [vmem:[#allocation4 + $0xbe8] sm:$0xff]  ;;  %v2477_v6 = vadd.f32 %v5301_v24, %v2403_v25  ;;  %v2330_v22 = vadd.f32 %v5297_v17, %v2256_v14  ;;  %v3275_v14 = vld [vmem:[#allocation4 + $0xcd0] sm:$0xff] }
 0x45b   : > { %v2531_v46 = vpop.f32.mrf.mxu1  ;;  %3135 = vmatpush.msrb.mxu2 %v3130_v27  ;;  %3212 = vmatpush.msrb.mxu3 %v3201_v7  ;;  %v2257_v27 = vadd.f32 %v5262_v29, %v2178_v30  ;;  %v3353_v33 = vld [vmem:[#allocation4 + $0xd70] sm:$0xff] }
 0x45c   : > { %v2697_v54 = vadd.f32 %v2673_v41, %v2623_v49  ;;  %v2551_v15 = vadd.f32 %v2531_v46, %v2476_v1  ;;  %v3049_v46 = vld [vmem:[#allocation4 + $0xb30] sm:$0xff]  ;;  %v2404_v1 = vadd.f32 %v5306_v52, %v2330_v22  ;;  %v3199_v52 = vld [vmem:[#allocation4 + $0xc40] sm:$0xff]  ;;  %3285 = vmatpush.msra.mxu0 %v3276_v21  ;;  %v2258_v22 = vadd.f32 %v5271_v55, %v2181_v11 }
 0x45d   : > { %3068 = vmatpush.msra.mxu1 %v3049_v46  ;;  %3213 = vmatpush.msrb.mxu3 %v3200_v2  ;;  %v2331_v25 = vadd.f32 %v5303_v40, %v2257_v27  ;;  %v3198_v46 = vld [vmem:[#allocation4 + $0xc38] sm:$0xff] }
 0x45e   : > { %v2710_v26 = vadd.f32 %v5339_v44, %v2697_v54  ;;  %v3129_v54 = vld [vmem:[#allocation4 + $0xbe0] sm:$0xff]  ;;  %3286 = vmatpush.msra.mxu0 %v3275_v14  ;;  %v3352_v14 = vld [vmem:[#allocation4 + $0xd68] sm:$0xff] }
 0x45f   : > { %3136 = vmatpush.msrb.mxu2 %v3129_v54  ;;  %3069 = vmatpush.msra.mxu1 %v3048_v8  ;;  %v2405_v40 = vadd.f32 %v5312_v37, %v2331_v25  ;;  %v3121_v37 = vld [vmem:[#allocation4 + $0xba0] sm:$0xff] }
 0x460   : > { %v5345_v43 = vmax.f32 %v2710_v26, 0.0  ;;  %v3128_v26 = vld [vmem:[#allocation4 + $0xbd8] sm:$0xff]  ;;  %3214 = vmatpush.msrb.mxu3 %v3199_v52  ;;  %3287 = vmatpush.msra.mxu0 %v3274_v51 }
 0x461   : > { %v2602_v20 = vpop.f32.mrf.mxu2  ;;  %3137 = vmatpush.msrb.mxu2 %v3128_v26  ;;  %v3123_v26 = vld [vmem:[#allocation4 + $0xbb0] sm:$0xff]  ;;  %v3354_v52 = vld [vmem:[#allocation4 + $0xd78] sm:$0xff] }
 0x462   : > { %v2676_v60 = vpop.f32.mrf.mxu3  ;;  %2746 = vst [vmem:[#allocation2 + $0x11] sm:$0xff] %v5345_v43  ;;  %v2624_v31 = vadd.f32 %v2602_v20, %v2550_v61  ;;  %2823 = vmatmul.f32.gmra.mxu1 %v5345_v43  ;;  %3215 = vmatpush.msrb.mxu3 %v3198_v46  ;;  %v3192_v46 = vld [vmem:[#allocation4 + $0xc08] sm:$0xff] }
 0x463   : > { %v2534_v12 = vpop.f32.mrf.mxu1 }
 0x464   : > { %v2698_v13 = vadd.f32 %v2676_v60, %v2624_v31  ;;  %v3127_v60 = vld [vmem:[#allocation4 + $0xbd0] sm:$0xff]  ;;  %v2552_v56 = vadd.f32 %v2534_v12, %v2477_v6  ;;  %v3047_v12 = vld [vmem:[#allocation4 + $0xb20] sm:$0xff]  ;;  %v3044_v6 = vld [vmem:[#allocation4 + $0xb08] sm:$0xff] }
 0x465   : > { %3138 = vmatpush.msrb.mxu2 %v3127_v60  ;;  %3070 = vmatpush.msra.mxu1 %v3047_v12 }
 0x466   : > { %v2711_v3 = vadd.f32 %v5339_v44, %v2698_v13 }
 0x467   : > { %3071 = vmatpush.msra.mxu1 %v3046_v45  ;;  %v3272_v45 = vld [vmem:[#allocation4 + $0xcb8] sm:$0xff] }
 0x468   : > { %v5356_v4 = vmax.f32 %v2711_v3, 0.0  ;;  %v3126_v3 = vld [vmem:[#allocation4 + $0xbc8] sm:$0xff] }
 0x469   : > { %v2605_v41 = vpop.f32.mrf.mxu2  ;;  %v2755_v10 = vld [vmem:[#allocation2 + $0x10] sm:$0xff]  ;;  %3139 = vmatpush.msrb.mxu2 %v3126_v3  ;;  %3072 = vmatpush.msra.mxu1 %v3045_v28  ;;  %v3120_v3 = vld [vmem:[#allocation4 + $0xb98] sm:$0xff]  ;;  %v3270_v28 = vld [vmem:[#allocation4 + $0xca8] sm:$0xff] }
 0x46a   : > { %v2679_v5 = vpop.f32.mrf.mxu3  ;;  %v5358_v49 = vld [vmem:[#allocation2 + $0x12] sm:$0xff]  ;;  %2747 = vst [vmem:[#allocation2 + $0x21] sm:$0xff] %v5356_v4  ;;  %v2625_v62 = vadd.f32 %v2605_v41, %v2551_v15  ;;  %2864 = vmatmul.f32.gmra.mxu2 %v2755_v10  ;;  %3001 = vmatmul.f32.vlgmr.msrb.gmra.mxu0 %v2755_v10  ;;  %v2478_v41 = vadd.f32 %v5308_v0, %v2404_v1  ;;  %v3195_v1 = vld [vmem:[#allocation4 + $0xc20] sm:$0xff] }
 0x46b   : > { %2930 = vmatmul.f32.gmra.mxu3 %v5358_v49  ;;  %2826 = vmatmul.f32.gmra.mxu1 %v5356_v4  ;;  %v2537_v20 = vpop.f32.mrf.mxu1  ;;  %v3124_v10 = vld [vmem:[#allocation4 + $0xbb8] sm:$0xff] }
 0x46c   : > { %v2699_v59 = vadd.f32 %v2679_v5, %v2625_v62  ;;  %3140 = vmatpush.msrb.mxu2 %v3125_v53  ;;  %v2553_v19 = vadd.f32 %v2537_v20, %v2478_v41  ;;  %v3122_v20 = vld [vmem:[#allocation4 + $0xba8] sm:$0xff]  ;;  %3073 = vmatpush.msra.mxu1 %v3044_v6  ;;  %v3194_v53 = vld [vmem:[#allocation4 + $0xc18] sm:$0xff] }
 0x46d   : > { %v3118_v41 = vld [vmem:[#allocation4 + $0xb88] sm:$0xff] }
 0x46e   : > { %v2712_v61 = vadd.f32 %v5339_v44, %v2699_v59  ;;  %3141 = vmatpush.msrb.mxu2 %v3124_v10  ;;  %3074 = vmatpush.msra.mxu1 %v3043_v34 }
 0x470   : > { %v5370_v31 = vmax.f32 %v2712_v61, 0.0  ;;  %v3197_v61 = vld [vmem:[#allocation4 + $0xc30] sm:$0xff]  ;;  %3142 = vmatpush.msrb.mxu2 %v3123_v26  ;;  %3355 = vmatpush.msrb.mxu1 %v3354_v52  ;;  %v3117_v26 = vld [vmem:[#allocation4 + $0xb80] sm:$0xff] }
 0x471   : > { %v2608_v13 = vpop.f32.mrf.mxu2  ;;  %v5372_v38 = vld [vmem:[#allocation2 + $0x20] sm:$0xff]  ;;  %3216 = vmatpush.msrb.mxu3 %v3197_v61  ;;  %v3268_v61 = vld [vmem:[#allocation4 + $0xc98] sm:$0xff] }
 0x472   : > { %v2682_v35 = vpop.f32.mrf.mxu3  ;;  %v5374_v24 = vld [vmem:[#allocation2 + $0x22] sm:$0xff]  ;;  %2748 = vst [vmem:[#allocation2 + $0x31] sm:$0xff] %v5370_v31  ;;  %v2626_v17 = vadd.f32 %v2608_v13, %v2552_v56  ;;  %2867 = vmatmul.f32.gmra.mxu2 %v5372_v38  ;;  %3004 = vmatmul.f32.gmra.mxu0 %v5372_v38  ;;  %v2479_v56 = vadd.f32 %v5314_v47, %v2405_v40 }
 0x473   : > { %2933 = vmatmul.f32.gmra.mxu3 %v5374_v24  ;;  %2829 = vmatmul.f32.gmra.mxu1 %v5370_v31  ;;  %v2540_v54 = vpop.f32.mrf.mxu1  ;;  %v3273_v13 = vld [vmem:[#allocation4 + $0xcc0] sm:$0xff] }
 0x474   : > { %v2700_v15 = vadd.f32 %v2682_v35, %v2626_v17  ;;  %3143 = vmatpush.msrb.mxu2 %v3122_v20  ;;  %v2332_v35 = vadd.f32 %v5310_v50, %v2258_v22  ;;  %v2554_v30 = vadd.f32 %v2540_v54, %v2479_v56  ;;  %3217 = vmatpush.msrb.mxu3 %v3196_v48  ;;  %v3351_v20 = vld [vmem:[#allocation4 + $0xd60] sm:$0xff]  ;;  %v3267_v48 = vld [vmem:[#allocation4 + $0xc90] sm:$0xff] }
 0x475   : > { %3288 = vmatpush.msra.mxu0 %v3273_v13  ;;  %3356 = vmatpush.msrb.mxu1 %v3353_v33  ;;  %v3343_v52 = vld [vmem:[#allocation4 + $0xd20] sm:$0xff] }
 0x476   : > { %v2713_v5 = vadd.f32 %v5339_v44, %v2700_v15  ;;  %3144 = vmatpush.msrb.mxu2 %v3121_v37  ;;  %v2406_v2 = vadd.f32 %v5318_v57, %v2332_v35  ;;  %3218 = vmatpush.msrb.mxu3 %v3195_v1  ;;  %v3193_v57 = vld [vmem:[#allocation4 + $0xc10] sm:$0xff]  ;;  %v3266_v35 = vld [vmem:[#allocation4 + $0xc88] sm:$0xff]  ;;  %v3350_v1 = vld [vmem:[#allocation4 + $0xd58] sm:$0xff] }
 0x477   : > { %3289 = vmatpush.msra.mxu0 %v3272_v45  ;;  %3357 = vmatpush.msrb.mxu1 %v3352_v14  ;;  %v3348_v45 = vld [vmem:[#allocation4 + $0xd48] sm:$0xff] }
 0x478   : > { %v5388_v62 = vmax.f32 %v2713_v5, 0.0  ;;  %3145 = vmatpush.msrb.mxu2 %v3120_v3  ;;  %v2259_v5 = vadd.f32 %v5277_v23, %v2184_v9  ;;  %v2480_v10 = vadd.f32 %v5320_v32, %v2406_v2  ;;  %3219 = vmatpush.msrb.mxu3 %v3194_v53 }
 0x479   : > { %v2611_v29 = vpop.f32.mrf.mxu2  ;;  %v5390_v18 = vld [vmem:[#allocation2 + $0x30] sm:$0xff]  ;;  %3290 = vmatpush.msra.mxu0 %v3271_v58  ;;  %3358 = vmatpush.msrb.mxu1 %v3351_v20 }
 0x47a   : > { %v2685_v0 = vpop.f32.mrf.mxu3  ;;  %v5392_v59 = vld [vmem:[#allocation2 + $0x32] sm:$0xff]  ;;  %2749 = vst [vmem:[#allocation2 + $0x41] sm:$0xff] %v5388_v62  ;;  %v2627_v36 = vadd.f32 %v2611_v29, %v2553_v19  ;;  %2870 = vmatmul.f32.gmra.mxu2 %v5390_v18  ;;  %3007 = vmatmul.f32.gmra.mxu0 %v5390_v18  ;;  %v2333_v25 = vadd.f32 %v5316_v39, %v2259_v5  ;;  %v3269_v39 = vld [vmem:[#allocation4 + $0xca0] sm:$0xff] }
 0x47b   : > { %2936 = vmatmul.f32.gmra.mxu3 %v5392_v59  ;;  %2832 = vmatmul.f32.gmra.mxu1 %v5388_v62  ;;  %v2543_v15 = vpop.f32.mrf.mxu1 }
 0x47c   : > { %v2701_v60 = vadd.f32 %v2685_v0, %v2627_v36  ;;  %3146 = vmatpush.msrb.mxu2 %v3119_v16  ;;  %v2555_v54 = vadd.f32 %v2543_v15, %v2480_v10  ;;  %3220 = vmatpush.msrb.mxu3 %v3193_v57  ;;  %v2407_v11 = vadd.f32 %v5326_v42, %v2333_v25  ;;  %v3191_v36 = vld [vmem:[#allocation4 + $0xc00] sm:$0xff]  ;;  %v3345_v16 = vld [vmem:[#allocation4 + $0xd30] sm:$0xff] }
 0x47d   : > { %3291 = vmatpush.msra.mxu0 %v3270_v28  ;;  %3359 = vmatpush.msrb.mxu1 %v3350_v1  ;;  %v3347_v15 = vld [vmem:[#allocation4 + $0xd40] sm:$0xff] }
 0x47e   : > { %v2714_v8 = vadd.f32 %v5339_v44, %v2701_v60  ;;  %3147 = vmatpush.msrb.mxu2 %v3118_v41  ;;  %3221 = vmatpush.msrb.mxu3 %v3192_v46  ;;  %v2481_v60 = vadd.f32 %v5328_v63, %v2407_v11 }
 0x47f   : > { %3292 = vmatpush.msra.mxu0 %v3269_v39 }
 0x480   : > { %v5406_v7 = vmax.f32 %v2714_v8, 0.0  ;;  %3148 = vmatpush.msrb.mxu2 %v3117_v26  ;;  %3222 = vmatpush.msrb.mxu3 %v3191_v36 }
 0x481   : > { %v2614_v17 = vpop.f32.mrf.mxu2  ;;  %v5408_v55 = vld [vmem:[#allocation2 + $0x40] sm:$0xff]  ;;  %3293 = vmatpush.msra.mxu0 %v3268_v61 }
 0x482   : > { %v2688_v12 = vpop.f32.mrf.mxu3  ;;  %v5410_v47 = vld [vmem:[#allocation2 + $0x42] sm:$0xff]  ;;  %2750 = vst [vmem:[#allocation2 + $0x51] sm:$0xff] %v5406_v7  ;;  %v2628_v50 = vadd.f32 %v2614_v17, %v2554_v30  ;;  %2873 = vmatmul.f32.gmra.mxu2 %v5408_v55  ;;  %3010 = vmatmul.f32.gmra.mxu0 %v5408_v55  ;;  %v3349_v17 = vld [vmem:[#allocation4 + $0xd50] sm:$0xff] }
 0x483   : > { %2939 = vmatmul.f32.gmra.mxu3 %v5410_v47  ;;  %2835 = vmatmul.f32.gmra.mxu1 %v5406_v7  ;;  %v2546_v42 = vpop.f32.mrf.mxu1  ;;  %v3265_v30 = vld [vmem:[#allocation4 + $0xc80] sm:$0xff] }
 0x484   : > { %v2702_v27 = vadd.f32 %v2688_v12, %v2628_v50  ;;  %v2556_v34 = vadd.f32 %v2546_v42, %v2481_v60  ;;  %3294 = vmatpush.msra.mxu0 %v3267_v48  ;;  %3360 = vmatpush.msrb.mxu1 %v3349_v17 }
 0x486   : > { %v2715_v21 = vadd.f32 %v5339_v44, %v2702_v27  ;;  %3295 = vmatpush.msra.mxu0 %v3266_v35  ;;  %3361 = vmatpush.msrb.mxu1 %v3348_v45  ;;  %v3263_v27 = vld [vmem:[#allocation2 + $0x91] sm:$0xff] }
 0x488   : > { %v5424_v19 = vmax.f32 %v2715_v21, 0.0  ;;  %3296 = vmatpush.msra.mxu0 %v3265_v30  ;;  %3362 = vmatpush.msrb.mxu1 %v3347_v15 }
 0x489   : > { %v2617_v29 = vpop.f32.mrf.mxu2  ;;  %v5426_v23 = vld [vmem:[#allocation2 + $0x50] sm:$0xff] }
 0x48a   : > { %v2691_v0 = vpop.f32.mrf.mxu3  ;;  %v5428_v32 = vld [vmem:[#allocation2 + $0x52] sm:$0xff]  ;;  %2751 = vst [vmem:[#allocation2 + $0x61] sm:$0xff] %v5424_v19  ;;  %v2629_v40 = vadd.f32 %v2617_v29, %v2555_v54  ;;  %2876 = vmatmul.f32.gmra.mxu2 %v5426_v23  ;;  %3013 = vmatmul.f32.gmra.mxu0 %v5426_v23 }
 0x48b   : > { %2942 = vmatmul.f32.gmra.mxu3 %v5428_v32  ;;  %2838 = vmatmul.f32.gmra.mxu1 %v5424_v19 }
 0x48c   : > { %v2703_v6 = vadd.f32 %v2691_v0, %v2629_v40  ;;  %v3337_v0 = vld [vmem:[#allocation2 + $0x92] sm:$0xff] }
 0x48e   : > { %v2716_v51 = vadd.f32 %v5339_v44, %v2703_v6 }
 0x490   : > { %v5438_v37 = vmax.f32 %v2716_v51, 0.0 }
 0x491   : > { %v2620_v22 = vpop.f32.mrf.mxu2  ;;  %v5440_v56 = vld [vmem:[#allocation2 + $0x60] sm:$0xff] }
 0x492   : > { %v5442_v8 = vld [vmem:[#allocation2 + $0x62] sm:$0xff]  ;;  %v2694_v13 = vpop.f32.mrf.mxu3  ;;  %2752 = vst [vmem:[#allocation2 + $0x71] sm:$0xff] %v5438_v37  ;;  %v2630_v63 = vadd.f32 %v2620_v22, %v2556_v34  ;;  %2879 = vmatmul.f32.gmra.mxu2 %v5440_v56  ;;  %3016 = vmatmul.f32.gmra.mxu0 %v5440_v56 }
 0x493   : > { %2945 = vmatmul.f32.gmra.mxu3 %v5442_v8  ;;  %2841 = vmatmul.f32.gmra.mxu1 %v5438_v37 }
 0x494   : > { %v2704_v12 = vadd.f32 %v2694_v13, %v2630_v63 }
 0x496   : > { %v2717_v3 = vadd.f32 %v5339_v44, %v2704_v12  ;;  %v3346_v44 = vld [vmem:[#allocation4 + $0xd38] sm:$0xff] }
 0x497   : > { %3363 = vmatpush.msrb.mxu1 %v3346_v44 }
 0x498   : > { %v2725_v9 = vmax.f32 %v2717_v3, 0.0 }
 0x499   : > { %v2761_v2 = vld [vmem:[#allocation2 + $0x70] sm:$0xff]  ;;  %3364 = vmatpush.msrb.mxu1 %v3345_v16 }
 0x49a   : > { %v5450_v50 = vld [vmem:[#allocation2 + $0x72] sm:$0xff]  ;;  %2753 = vst [vmem:[#allocation2 + $0x81] sm:$0xff] %v2725_v9  ;;  %2882 = vmatmul.f32.gmra.mxu2 %v2761_v2  ;;  %3019 = vmatmul.f32.gmra.mxu0 %v2761_v2 }
 0x49b   : > { %2948 = vmatmul.f32.gmra.mxu3 %v5450_v50  ;;  %3075 = vmatmul.f32.vlgmr.msra.gmra.mxu1 %v5345_v43  ;;  %v3344_v43 = vld [vmem:[#allocation4 + $0xd28] sm:$0xff] }
 0x49c   : > { %3365 = vmatpush.msrb.mxu1 %v3344_v43 }
 0x49e   : > { %3366 = vmatpush.msrb.mxu1 %v3343_v52 }
 0x4a1   : > { %v2967_v53 = vld [vmem:[#allocation2 + $0x80] sm:$0xff]  ;;  %v2862_v33 = vpop.f32.mrf.mxu2 }
 0x4a2   : > { %3149 = vmatmul.f32.vlgmr.msrb.gmra.mxu2 %v5358_v49  ;;  %3022 = vmatmul.f32.gmra.mxu0 %v2967_v53  ;;  %v3342_v49 = vld [vmem:[#allocation4 + $0xd18] sm:$0xff] }
 0x4a3   : > { %3223 = vmatmul.f32.vlgmr.msrb.gmra.mxu3 %v5372_v38  ;;  %3078 = vmatmul.f32.gmra.mxu1 %v5356_v4  ;;  %v3341_v38 = vld [vmem:[#allocation4 + $0xd10] sm:$0xff] }
 0x4a4   : > { %3367 = vmatpush.msrb.mxu1 %v3342_v49 }
 0x4a6   : > { %3368 = vmatpush.msrb.mxu1 %v3341_v38 }
 0x4a8   : > { %v2928_v41 = vpop.f32.mrf.mxu3 }
 0x4aa   : > { %3152 = vmatmul.f32.gmra.mxu2 %v5374_v24  ;;  %3297 = vmatmul.f32.vlgmr.msra.gmra.mxu0 %v5356_v4  ;;  %v3339_v4 = vld [vmem:[#allocation4 + $0xd00] sm:$0xff] }
 0x4ab   : > { %3226 = vmatmul.f32.gmra.mxu3 %v5390_v18  ;;  %3081 = vmatmul.f32.gmra.mxu1 %v5370_v31  ;;  %v3340_v18 = vld [vmem:[#allocation4 + $0xd08] sm:$0xff] }
 0x4ac   : > { %3369 = vmatpush.msrb.mxu1 %v3340_v18 }
 0x4ae   : > { %3370 = vmatpush.msrb.mxu1 %v3339_v4 }
 0x4b2   : > { %3155 = vmatmul.f32.gmra.mxu2 %v5392_v59  ;;  %3300 = vmatmul.f32.gmra.mxu0 %v5370_v31  ;;  %v2821_v31 = vpop.f32.mrf.mxu1 }
 0x4b3   : > { %3229 = vmatmul.f32.gmra.mxu3 %v5408_v55  ;;  %3084 = vmatmul.f32.gmra.mxu1 %v5388_v62  ;;  %v3846_v55 = vld [vmem:[#allocation2] sm:$0xff]  ;;  %v2863_v63 = vadd.f32 %v2862_v33, %v2821_v31 }
 0x4b5   : > { %v2952_v12 = vadd.f32 %v2928_v41, %v2863_v63 }
 0x4ba   : > { %3158 = vmatmul.f32.gmra.mxu2 %v5410_v47  ;;  %3303 = vmatmul.f32.gmra.mxu0 %v5388_v62  ;;  %v3115_v62 = vld [vmem:[#allocation2 + $0x82] sm:$0xff] }
 0x4bb   : > { %3232 = vmatmul.f32.gmra.mxu3 %v5426_v23  ;;  %3087 = vmatmul.f32.gmra.mxu1 %v5406_v7 }
 0x4c2   : > { %3161 = vmatmul.f32.gmra.mxu2 %v5428_v32  ;;  %3306 = vmatmul.f32.gmra.mxu0 %v5406_v7 }
 0x4c3   : > { %3235 = vmatmul.f32.gmra.mxu3 %v5440_v56  ;;  %3090 = vmatmul.f32.gmra.mxu1 %v5424_v19 }
 0x4ca   : > { %3164 = vmatmul.f32.gmra.mxu2 %v5442_v8  ;;  %3309 = vmatmul.f32.gmra.mxu0 %v5424_v19 }
 0x4cb   : > { %3238 = vmatmul.f32.gmra.mxu3 %v2761_v2  ;;  %3093 = vmatmul.f32.gmra.mxu1 %v5438_v37 }
 0x4d2   : > { %3167 = vmatmul.f32.gmra.mxu2 %v5450_v50  ;;  %3312 = vmatmul.f32.gmra.mxu0 %v5438_v37 }
 0x4d3   : > { %3241 = vmatmul.f32.gmra.mxu3 %v2967_v53  ;;  %3096 = vmatmul.f32.gmra.mxu1 %v2725_v9 }
 0x4da   : > { %3170 = vmatmul.f32.gmra.mxu2 %v3115_v62  ;;  %3315 = vmatmul.f32.gmra.mxu0 %v2725_v9 }
 0x4db   : > { %3244 = vmatmul.f32.gmra.mxu3 %v3846_v55  ;;  %3371 = vmatmul.f32.vlgmr.msrb.gmra.mxu1 %v5374_v24 }
 0x4df   : > { %v2824_v7 = vpop.f32.mrf.mxu1 }
 0x4e2   : > { %3318 = vmatmul.f32.gmra.mxu0 %v3263_v27 }
 0x4e3   : > { %3374 = vmatmul.f32.gmra.mxu1 %v5392_v59 }
 0x4e7   : > { %v3002_v5 = vpop.f32.mrf.mxu0 }
 0x4e8   : > { %v2827_v58 = vpop.f32.mrf.mxu1  ;;  %v3026_v3 = vadd.f32 %v3002_v5, %v2952_v12 }
 0x4eb   : > { %3377 = vmatmul.f32.gmra.mxu1 %v5410_v47 }
 0x4ed   : > { %v2865_v10 = vpop.f32.mrf.mxu2 }
 0x4ee   : > { %v2931_v24 = vpop.f32.mrf.mxu3  ;;  %v2866_v9 = vadd.f32 %v2865_v10, %v2824_v7 }
 0x4ef   : > { %v3005_v25 = vpop.f32.mrf.mxu0 }
 0x4f0   : > { %v5481_v57 = vpop.f32.mrf.mxu1  ;;  %v2953_v45 = vadd.f32 %v2931_v24, %v2866_v9 }
 0x4f2   : > { %v3027_v43 = vadd.f32 %v3005_v25, %v2953_v45 }
 0x4f3   : > { %3380 = vmatmul.f32.gmra.mxu1 %v5428_v32 }
 0x4f5   : > { %v2868_v59 = vpop.f32.mrf.mxu2 }
 0x4f6   : > { %v2934_v47 = vpop.f32.mrf.mxu3  ;;  %v2869_v52 = vadd.f32 %v2868_v59, %v2827_v58 }
 0x4f7   : > { %v3008_v54 = vpop.f32.mrf.mxu0 }
 0x4f8   : > { %v5484_v21 = vpop.f32.mrf.mxu1  ;;  %v2954_v18 = vadd.f32 %v2934_v47, %v2869_v52 }
 0x4fa   : > { %v3028_v33 = vadd.f32 %v3008_v54, %v2954_v18 }
 0x4fb   : > { %3383 = vmatmul.f32.gmra.mxu1 %v5442_v8 }
 0x4fd   : > { %v2871_v46 = vpop.f32.mrf.mxu2 }
 0x4fe   : > { %v2937_v23 = vpop.f32.mrf.mxu3  ;;  %v2872_v41 = vadd.f32 %v2871_v46, %v5481_v57 }
 0x4ff   : > { %v5494_v32 = vpop.f32.mrf.mxu0 }
 0x500   : > { %v5487_v28 = vpop.f32.mrf.mxu1  ;;  %v2955_v47 = vadd.f32 %v2937_v23, %v2872_v41 }
 0x502   : > { %v3029_v57 = vadd.f32 %v5494_v32, %v2955_v47 }
 0x503   : > { %3386 = vmatmul.f32.gmra.mxu1 %v5450_v50 }
 0x505   : > { %v5496_v26 = vpop.f32.mrf.mxu2 }
 0x506   : > { %v5498_v40 = vpop.f32.mrf.mxu3  ;;  %v2875_v46 = vadd.f32 %v5496_v26, %v5484_v21 }
 0x507   : > { %v5500_v39 = vpop.f32.mrf.mxu0 }
 0x508   : > { %v5490_v19 = vpop.f32.mrf.mxu1  ;;  %v2956_v12 = vadd.f32 %v5498_v40, %v2875_v46 }
 0x50a   : > { %v3030_v32 = vadd.f32 %v5500_v39, %v2956_v12 }
 0x50b   : > { %3389 = vmatmul.f32.gmra.mxu1 %v3115_v62  ;;  %v5529_v62 = vld [vmem:[#allocation7 + $0x2] ss:$0 sm:$0xff] }
 0x50d   : > { %v5502_v36 = vpop.f32.mrf.mxu2 }
 0x50e   : > { %v5504_v6 = vpop.f32.mrf.mxu3  ;;  %v2878_v21 = vadd.f32 %v5502_v36, %v5487_v28 }
 0x50f   : > { %v5506_v20 = vpop.f32.mrf.mxu0 }
 0x510   : > { %v5492_v29 = vpop.f32.mrf.mxu1  ;;  %v2957_v40 = vadd.f32 %v5504_v6, %v2878_v21 }
 0x512   : > { %v3031_v18 = vadd.f32 %v5506_v20, %v2957_v40 }
 0x513   : > { %3392 = vmatmul.f32.gmra.mxu1 %v3337_v0 }
 0x515   : > { %v5508_v42 = vpop.f32.mrf.mxu2 }
 0x516   : > { %v5510_v60 = vpop.f32.mrf.mxu3  ;;  %v2881_v28 = vadd.f32 %v5508_v42, %v5490_v19 }
 0x517   : > { %v5512_v48 = vpop.f32.mrf.mxu0 }
 0x518   : > { %v3076_v11 = vpop.f32.mrf.mxu1 }
 0x519   : > { %v3100_v2 = vadd.f32 %v3076_v11, %v3026_v3 }
 0x51d   : > { %v5514_v37 = vpop.f32.mrf.mxu2 }
 0x51e   : > { %v5518_v22 = vpop.f32.mrf.mxu3  ;;  %v2884_v19 = vadd.f32 %v5514_v37, %v5492_v29 }
 0x51f   : > { %v5520_v56 = vpop.f32.mrf.mxu0 }
 0x520   : > { %v3079_v14 = vpop.f32.mrf.mxu1 }
 0x521   : > { %v3101_v38 = vadd.f32 %v3079_v14, %v3027_v43 }
 0x525   : > { %v3150_v8 = vpop.f32.mrf.mxu2 }
 0x526   : > { %v3224_v35 = vpop.f32.mrf.mxu3  ;;  %v3174_v15 = vadd.f32 %v3150_v8, %v3100_v2 }
 0x527   : > { %v3298_v30 = vpop.f32.mrf.mxu0 }
 0x528   : > { %v3082_v61 = vpop.f32.mrf.mxu1  ;;  %v3248_v49 = vadd.f32 %v3224_v35, %v3174_v15 }
 0x529   : > { %v3102_v25 = vadd.f32 %v3082_v61, %v3028_v33 }
 0x52a   : > { %v3322_v4 = vadd.f32 %v3298_v30, %v3248_v49 }
 0x52d   : > { %v3153_v1 = vpop.f32.mrf.mxu2 }
 0x52e   : > { %v3227_v50 = vpop.f32.mrf.mxu3  ;;  %v3175_v31 = vadd.f32 %v3153_v1, %v3101_v38 }
 0x52f   : > { %v3301_v44 = vpop.f32.mrf.mxu0 }
 0x530   : > { %v3085_v51 = vpop.f32.mrf.mxu1  ;;  %v3249_v5 = vadd.f32 %v3227_v50, %v3175_v31 }
 0x531   : > { %v3103_v63 = vadd.f32 %v3085_v51, %v3029_v57 }
 0x532   : > { %v3323_v0 = vadd.f32 %v3301_v44, %v3249_v5 }
 0x535   : > { %v3156_v16 = vpop.f32.mrf.mxu2 }
 0x536   : > { %v3230_v55 = vpop.f32.mrf.mxu3  ;;  %v3176_v11 = vadd.f32 %v3156_v16, %v3102_v25 }
 0x537   : > { %v3304_v10 = vpop.f32.mrf.mxu0 }
 0x538   : > { %v5516_v34 = vpop.f32.mrf.mxu1  ;;  %v3250_v35 = vadd.f32 %v3230_v55, %v3176_v11  ;;  %v2958_v55 = vadd.f32 %v5510_v60, %v2881_v28  ;;  %v2959_v60 = vadd.f32 %v5518_v22, %v2884_v19 }
 0x539   : > { %v3104_v15 = vadd.f32 %v5516_v34, %v3030_v32 }
 0x53a   : > { %v3324_v3 = vadd.f32 %v3304_v10, %v3250_v35  ;;  %v3032_v10 = vadd.f32 %v5512_v48, %v2958_v55  ;;  %v3033_v48 = vadd.f32 %v5520_v56, %v2959_v60 }
 0x53d   : > { %v3159_v24 = vpop.f32.mrf.mxu2 }
 0x53e   : > { %v3233_v54 = vpop.f32.mrf.mxu3  ;;  %v3177_v9 = vadd.f32 %v3159_v24, %v3103_v63 }
 0x53f   : > { %v3307_v23 = vpop.f32.mrf.mxu0 }
 0x540   : > { %v5522_v13 = vpop.f32.mrf.mxu1  ;;  %v3251_v26 = vadd.f32 %v3233_v54, %v3177_v9 }
 0x541   : > { %v3105_v34 = vadd.f32 %v5522_v13, %v3031_v18 }
 0x542   : > { %v3325_v16 = vadd.f32 %v3307_v23, %v3251_v26 }
 0x545   : > { %v3162_v1 = vpop.f32.mrf.mxu2 }
 0x546   : > { %v3236_v51 = vpop.f32.mrf.mxu3  ;;  %v3178_v43 = vadd.f32 %v3162_v1, %v3104_v15 }
 0x547   : > { %v3310_v52 = vpop.f32.mrf.mxu0 }
 0x548   : > { %v5524_v17 = vpop.f32.mrf.mxu1  ;;  %v3252_v36 = vadd.f32 %v3236_v51, %v3178_v43 }
 0x54d   : > { %v3165_v49 = vpop.f32.mrf.mxu2 }
 0x54e   : > { %v3239_v6 = vpop.f32.mrf.mxu3 }
 0x54f   : > { %v3313_v5 = vpop.f32.mrf.mxu0 }
 0x550   : > { %v5526_v53 = vpop.f32.mrf.mxu1 }
 0x555   : > { %v3168_v20 = vpop.f32.mrf.mxu2 }
 0x556   : > { %v3242_v47 = vpop.f32.mrf.mxu3 }
 0x557   : > { %v3316_v37 = vpop.f32.mrf.mxu0 }
 0x558   : > { %v3372_v7 = vpop.f32.mrf.mxu1 }
 0x559   : > { %v3396_v27 = vadd.f32 %v3372_v7, %v3322_v4  ;;  %v3326_v7 = vadd.f32 %v3310_v52, %v3252_v36 }
 0x55b   : > { %v3409_v58 = vadd.f32 %v5529_v62, %v3396_v27  ;;  %v3179_v27 = vadd.f32 %v3165_v49, %v3105_v34 }
 0x55d   : > { %v3417_v59 = vmax.f32 %v3409_v58, 0.0  ;;  %v3253_v42 = vadd.f32 %v3239_v6, %v3179_v27  ;;  %v3106_v58 = vadd.f32 %v5524_v17, %v3032_v10  ;;  %v3107_v17 = vadd.f32 %v5526_v53, %v3033_v48 }
 0x55e   : > { %v3245_v46 = vpop.f32.mrf.mxu3 }
 0x55f   : > { %3425 = vst [vmem:[%s5535_s28] sm:$0xff] %v3417_v59  ;;  %v3327_v25 = vadd.f32 %v3313_v5, %v3253_v42  ;;  %v3180_v59 = vadd.f32 %v3168_v20, %v3106_v58  ;;  %v3319_v23 = vpop.f32.mrf.mxu0 }
 0x560   : > { %v3375_v14 = vpop.f32.mrf.mxu1 }
 0x561   : > { %v3397_v8 = vadd.f32 %v3375_v14, %v3323_v0  ;;  %v3254_v14 = vadd.f32 %v3242_v47, %v3180_v59 }
 0x563   : > { %v3410_v61 = vadd.f32 %v5529_v62, %v3397_v8  ;;  %v3171_v8 = vpop.f32.mrf.mxu2  ;;  %v3328_v22 = vadd.f32 %v3316_v37, %v3254_v14 }
 0x564   : > { %v3181_v57 = vadd.f32 %v3171_v8, %v3107_v17 }
 0x565   : > { %v3418_v30 = vmax.f32 %v3410_v61, 0.0 }
 0x566   : > { %v3255_v63 = vadd.f32 %v3245_v46, %v3181_v57 }
 0x567   : > { %3426 = vst [vmem:[%s5535_s28 + $0x8] sm:$0xff] %v3418_v30 }
 0x568   : > { %v3378_v2 = vpop.f32.mrf.mxu1  ;;  %v3329_v1 = vadd.f32 %v3319_v23, %v3255_v63 }
 0x569   : > { %v3398_v50 = vadd.f32 %v3378_v2, %v3324_v3 }
 0x56b   : > { %v3411_v45 = vadd.f32 %v5529_v62, %v3398_v50 }
 0x56d   : > { %v3419_v44 = vmax.f32 %v3411_v45, 0.0 }
 0x56f   : > { %3427 = vst [vmem:[%s5535_s28 + $0x10] sm:$0xff] %v3419_v44 }
 0x570   : > { %v3381_v38 = vpop.f32.mrf.mxu1 }
 0x571   : > { %v3399_v39 = vadd.f32 %v3381_v38, %v3325_v16 }
 0x573   : > { %v3412_v4 = vadd.f32 %v5529_v62, %v3399_v39 }
 0x575   : > { %v3420_v31 = vmax.f32 %v3412_v4, 0.0 }
 0x577   : > { %3428 = vst [vmem:[%s5535_s28 + $0x18] sm:$0xff] %v3420_v31 }
 0x578   : > { %v3384_v33 = vpop.f32.mrf.mxu1 }
 0x579   : > { %v3400_v41 = vadd.f32 %v3384_v33, %v3326_v7 }
 0x57b   : > { %v3413_v13 = vadd.f32 %v5529_v62, %v3400_v41 }
 0x57d   : > { %v3421_v24 = vmax.f32 %v3413_v13, 0.0 }
 0x57f   : > { %3429 = vst [vmem:[%s5535_s28 + $0x20] sm:$0xff] %v3421_v24 }
 0x580   : > { %v3387_v0 = vpop.f32.mrf.mxu1 }
 0x581   : > { %v3401_v11 = vadd.f32 %v3387_v0, %v3327_v25 }
 0x583   : > { %v3414_v29 = vadd.f32 %v5529_v62, %v3401_v11 }
 0x585   : > { %v3422_v54 = vmax.f32 %v3414_v29, 0.0 }
 0x587   : > { %3430 = vst [vmem:[%s5535_s28 + $0x28] sm:$0xff] %v3422_v54 }
 0x588   : > { %v3390_v35 = vpop.f32.mrf.mxu1 }
 0x589   : > { %v3402_v61 = vadd.f32 %v3390_v35, %v3328_v22 }
 0x58b   : > { %v3415_v56 = vadd.f32 %v5529_v62, %v3402_v61 }
 0x58d   : > { %v3423_v30 = vmax.f32 %v3415_v56, 0.0 }
 0x58f   : > { %3431 = vst [vmem:[%s5535_s28 + $0x30] sm:$0xff] %v3423_v30 }
 0x590   : > { %v3393_v53 = vpop.f32.mrf.mxu1 }
 0x591   : > { %v3403_v12 = vadd.f32 %v3393_v53, %v3329_v1 }
 0x593   : > { %v3416_v3 = vadd.f32 %v5529_v62, %v3403_v12 }
 0x595   : > { %v3424_v9 = vmax.f32 %v3416_v3, 0.0 }
 0x597   : > { %3432 = vst [vmem:[%s5535_s28 + $0x38] sm:$0xff] %v3424_v9 }
 0x598   : > { %3934 = shalt.err (!%p3931_p8)
}
 0x599   : > { %s3986_s24 = smov 128   ;;  %s3987_s25 = smov 8  }
 0x59a   : > { %3782 = dma.vmem_to_hbm [thread:$0]  (%p4046_p5), %s3447_s6, 1024, %s3449_s7, %s3434_s16, %s3986_s24, %s3986_s24, %s3987_s25  }
 0x59b PF: > { %p3799_p9 = scmp.ge.s32.totalorder %s3977_s15, 2  ;;  %s3463_s26 = sand.u32 1, %s3965_s12  }
 0x59c   : > { %s3464_s27 = scalar_lea.sflag [#allocation6], %s3463_s26 }
 0x59d   : > { %p3792_p10 = pnand %p3799_p9, %p4050_p6 }
 0x59f   : > { %p3793_p11 = pneg %p3792_p10 }
 0x5a1   : > { %3960 = dma.done.wait (%p3793_p11), %s3464_s27, 1024  }
 0x5a2   : > { %3962 = vsyncadd (%p3793_p11), %s3464_s27, 4294966272  ;;  %p15_p12 = scmp.ge.s32.totalorder %s4033_s18, 4   ;;  %s5697_s12 = smov %s3969_s13 }
 0x5a3   : > { %s5698_s13 = smov %s3973_s14  ;;  %s5699_s14 = smov %s4044_s21 }
 0x5a4   : > { %s5700_s15 = smov %s4033_s18  ;;  %17 = sbr.rel (!%p15_p12) target bundleno = 5 (0x5), region = 123 }
 0x5a9   :  { %3470 = vsyncpa [#allocation5], 1 }
 0x5aa   :  { %3472 = vsyncpa [#allocation5 + $0x1], 1 }
 0x5ab   :  { %3473 = vsyncpa [#allocation8], 1 }
 0x5ac   :  { %3474 = vsyncpa [#allocation6], 1 }
 0x5ad   :  { %3476 = vsyncpa [#allocation6 + $0x1], 1 }

</bundles_post_ra>
